<compile_context>
chip_gen: v7x
topology: tpu7x:2x2x1
jax: 0.10.0
libtpu: 0.0.40
codegen_flags: <defaults>
</compile_context>

<pallas_src>
import jax
import jax.numpy as jnp
from jax import lax
from jax.experimental import pallas as pl
from jax.experimental.pallas import tpu as pltpu


def _bilstm_kernel(emb_ref, wx_ref, wh_ref, b_ref, fcw_ref, fcb_ref,
                   out_ref, xg_ref):
    TB = emb_ref.shape[0]
    Bp = out_ref.shape[0]
    T = TB // Bp
    G2 = wh_ref.shape[0]              # 2 * Hp  (fwd | bwd stacked on lanes)

    # (1) Hoisted input projection: one large MXU matmul covering every time
    #     step and both directions; bias folded in once.
    xg_ref[...] = (
        jnp.dot(emb_ref[...], wx_ref[...], preferred_element_type=jnp.float32)
        + b_ref[...])

    wh = wh_ref[...]                  # recurrent weights stay resident

    def step(t, carry):
        h, c = carry                  # each (Bp, 2*Hp): [forward | backward]
        row = pl.multiple_of(t * Bp, Bp)
        # Single fused (Bp, 2Hp) @ (2Hp, 8Hp) block-diagonal matmul for both
        # directions; x-projection slab is just added (already includes bias).
        gates = xg_ref[pl.ds(row, Bp), :] + jnp.dot(
            h, wh, preferred_element_type=jnp.float32)
        # Lane-aligned full-width gate slices (each 2*Hp lanes wide).
        i = jax.nn.sigmoid(gates[:, 0 * G2:1 * G2])
        f = jax.nn.sigmoid(gates[:, 1 * G2:2 * G2])
        g = jnp.tanh(gates[:, 2 * G2:3 * G2])
        o = jax.nn.sigmoid(gates[:, 3 * G2:4 * G2])
        c_new = f * c + i * g
        h_new = o * jnp.tanh(c_new)
        return h_new, c_new

    h0 = jnp.zeros((Bp, G2), jnp.float32)
    c0 = jnp.zeros((Bp, G2), jnp.float32)
    unroll = True if T <= 32 else 8
    h_fin, _ = lax.fori_loop(0, T, step, (h0, c0), unroll=unroll)

    # (2) Final FC: h_fin is already [h_fwd | h_bwd] on the lane axis, so no
    #     cross-lane concatenate is needed.
    out_ref[...] = (
        jnp.dot(h_fin, fcw_ref[...], preferred_element_type=jnp.float32)
        + fcb_ref[...])


def _pack_params(params, Hp):
    """Repack PyTorch-layout LSTM/FC weights into the lane-aligned fused layout.

    Gate-column layout (width 8*Hp): [i_f, i_b, f_f, f_b, g_f, g_b, o_f, o_b],
    each block Hp lanes wide; real weights occupy the first H lanes of each
    block, padding lanes are zero (=> padded h/c provably stay zero).
    """
    E = params["w_ih_f"].shape[1]
    H = params["w_hh_f"].shape[1]
    O = params["fc_w"].shape[0]

    w_x = jnp.zeros((2 * E, 8 * Hp), jnp.float32)       # rows: [x_t | x_{T-1-t}]
    w_h = jnp.zeros((2 * Hp, 8 * Hp), jnp.float32)      # block-diag fwd/bwd
    b = jnp.zeros((8 * Hp,), jnp.float32)

    for g in range(4):                                   # PyTorch order i, f, g, o
        cf = (2 * g) * Hp                                # forward gate block
        cb = (2 * g + 1) * Hp                            # backward gate block
        w_x = w_x.at[:E, cf:cf + H].set(params["w_ih_f"][g * H:(g + 1) * H, :].T)
        w_x = w_x.at[E:, cb:cb + H].set(params["w_ih_b"][g * H:(g + 1) * H, :].T)
        w_h = w_h.at[:H, cf:cf + H].set(params["w_hh_f"][g * H:(g + 1) * H, :].T)
        w_h = w_h.at[Hp:Hp + H, cb:cb + H].set(
            params["w_hh_b"][g * H:(g + 1) * H, :].T)
        b = b.at[cf:cf + H].set(params["b_ih_f"][g * H:(g + 1) * H]
                                + params["b_hh_f"][g * H:(g + 1) * H])
        b = b.at[cb:cb + H].set(params["b_ih_b"][g * H:(g + 1) * H]
                                + params["b_hh_b"][g * H:(g + 1) * H])

    fcw = jnp.zeros((2 * Hp, O), jnp.float32)
    fcw = fcw.at[:H, :].set(params["fc_w"][:, :H].T)          # forward hidden
    fcw = fcw.at[Hp:Hp + H, :].set(params["fc_w"][:, H:2 * H].T)  # backward hidden
    fcb = params["fc_b"][None, :]
    return w_x, w_h, b[None, :], fcw, fcb


def lstm_forward(x_ids, params):
    """x_ids: (seq, batch) int32. Returns (batch, output_dim) f32."""
    T, B = x_ids.shape
    emb_table = params["embedding"]
    E = emb_table.shape[1]
    H = params["w_hh_f"].shape[1]
    O = params["fc_w"].shape[0]

    Hp = 128 * pl.cdiv(H, 128)            # lane-align each gate block
    Bp = 8 * pl.cdiv(B, 8)                # sublane-align batch

    # Embedding gather as JAX glue.
    # TODO(synk): for large vocab/E, fuse the gather into the kernel via a
    # scalar-prefetch pl.Element row-gather and stream (T-chunked) the slab.
    emb = jnp.take(emb_table, x_ids, axis=0).astype(jnp.float32)   # (T, B, E)
    if Bp > B:
        emb = jnp.pad(emb, ((0, 0), (0, Bp - B), (0, 0)))
    # Pair x_t with x_{T-1-t} so one slab row feeds both directions at step t.
    emb_pair = jnp.concatenate([emb, emb[::-1]], axis=-1)          # (T, Bp, 2E)
    emb2 = emb_pair.reshape(T * Bp, 2 * E)

    w_x, w_h, b, fcw, fcb = _pack_params(params, Hp)

    vmem = pl.BlockSpec(memory_space=pltpu.MemorySpace.VMEM)
    out = pl.pallas_call(
        _bilstm_kernel,
        out_shape=jax.ShapeDtypeStruct((Bp, O), jnp.float32),
        in_specs=[vmem] * 6,
        out_specs=vmem,
        scratch_shapes=[pltpu.VMEM((T * Bp, 8 * Hp), jnp.float32)],
        # Keep an explicit, v7x(64 MiB)-safe VMEM budget.
        compiler_params=pltpu.CompilerParams(
            vmem_limit_bytes=32 * 1024 * 1024),
    )(emb2, w_x, w_h, b, fcw, fcb)
    return out[:B]


def _ref_forward(x_ids, params):
    """Pure-JAX reference matching PyTorch nn.LSTM(bidirectional=True) + fc."""
    emb = jnp.take(params["embedding"], x_ids, axis=0)   # (T, B, E)
    H = params["w_hh_f"].shape[1]
    B = x_ids.shape[1]

    def run(dirn, xs):
        wih = params[f"w_ih_{dirn}"]
        whh = params[f"w_hh_{dirn}"]
        bias = params[f"b_ih_{dirn}"] + params[f"b_hh_{dirn}"]

        def step(carry, x_t):
            h, c = carry
            gates = x_t @ wih.T + h @ whh.T + bias
            i = jax.nn.sigmoid(gates[:, 0:H])
            f = jax.nn.sigmoid(gates[:, H:2 * H])
            g = jnp.tanh(gates[:, 2 * H:3 * H])
            o = jax.nn.sigmoid(gates[:, 3 * H:4 * H])
            c = f * c + i * g
            h = o * jnp.tanh(c)
            return (h, c), None

        init = (jnp.zeros((B, H), jnp.float32), jnp.zeros((B, H), jnp.float32))
        (h, _), _ = lax.scan(step, init, xs)
        return h

    h_f = run("f", emb)            # hidden[-2]
    h_b = run("b", emb[::-1])      # hidden[-1]
    hidden = jnp.concatenate([h_f, h_b], axis=1)
    return hidden @ params["fc_w"].T + params["fc_b"]


def init_params(key, vocab_size, embedding_dim, hidden_size, output_dim):
    ks = jax.random.split(key, 12)
    H, E, O = hidden_size, embedding_dim, output_dim
    s = 0.1
    return {
        "embedding": jax.random.normal(ks[0], (vocab_size, E), jnp.float32) * s,
        "w_ih_f": jax.random.normal(ks[1], (4 * H, E), jnp.float32) * s,
        "w_hh_f": jax.random.normal(ks[2], (4 * H, H), jnp.float32) * s,
        "b_ih_f": jax.random.normal(ks[3], (4 * H,), jnp.float32) * s,
        "b_hh_f": jax.random.normal(ks[4], (4 * H,), jnp.float32) * s,
        "w_ih_b": jax.random.normal(ks[5], (4 * H, E), jnp.float32) * s,
        "w_hh_b": jax.random.normal(ks[6], (4 * H, H), jnp.float32) * s,
        "b_ih_b": jax.random.normal(ks[7], (4 * H,), jnp.float32) * s,
        "b_hh_b": jax.random.normal(ks[8], (4 * H,), jnp.float32) * s,
        "fc_w": jax.random.normal(ks[9], (O, 2 * H), jnp.float32) * s,
        "fc_b": jax.random.normal(ks[10], (O,), jnp.float32) * s,
    }


if __name__ == "__main__":
    vocab_size, embedding_dim, hidden_size, output_dim = 50, 32, 32, 4
    seq_len, batch = 8, 2

    key = jax.random.PRNGKey(0)
    pkey, xkey = jax.random.split(key)
    params = init_params(pkey, vocab_size, embedding_dim, hidden_size, output_dim)
    x = jax.random.randint(xkey, (seq_len, batch), 0, vocab_size, dtype=jnp.int32)

    out = lstm_forward(x, params)
    jax.block_until_ready(out)
    assert out.shape == (batch, output_dim)

    ref = _ref_forward(x, params)
    assert jnp.allclose(out, ref, rtol=2e-4, atol=2e-4), (
        f"mismatch: max abs err {jnp.max(jnp.abs(out - ref))}")

    print("KERNEL_OK")
</pallas_src>

<mosaic_0001>
module attributes {stable_mosaic.version = 11 : i64} {
  func.func @_bilstm_kernel(%arg0: memref<64x64xf32, #tpu.memory_space<vmem>>, %arg1: memref<64x1024xf32, #tpu.memory_space<vmem>>, %arg2: memref<256x1024xf32, #tpu.memory_space<vmem>>, %arg3: memref<1x1024xf32, #tpu.memory_space<vmem>>, %arg4: memref<256x4xf32, #tpu.memory_space<vmem>>, %arg5: memref<1x4xf32, #tpu.memory_space<vmem>>, %arg6: memref<8x4xf32, #tpu.memory_space<vmem>>, %arg7: memref<64x1024xf32, #tpu.memory_space<vmem>>) attributes {dimension_semantics = [], scalar_prefetch = 0 : i64, scratch_operands = 1 : i64, tpu.core_type = #tpu.core_type<tc>} {
    %c0 = arith.constant 0 : index
    %c0_0 = arith.constant 0 : index
    %0 = vector.load %arg0[%c0, %c0_0] : memref<64x64xf32, #tpu.memory_space<vmem>>, vector<64x64xf32>
    %c0_1 = arith.constant 0 : index
    %c0_2 = arith.constant 0 : index
    %1 = vector.load %arg1[%c0_1, %c0_2] : memref<64x1024xf32, #tpu.memory_space<vmem>>, vector<64x1024xf32>
    %cst = arith.constant dense<0.000000e+00> : vector<64x1024xf32>
    %2 = tpu.matmul %0, %1, %cst {dimension_numbers = #tpu.dot_dimension_numbers<[1], [0], [0], [1], [0, 0, 1, 1], [], []>} : vector<64x64xf32>, vector<64x1024xf32>, vector<64x1024xf32> -> vector<64x1024xf32>
    %c0_3 = arith.constant 0 : index
    %c0_4 = arith.constant 0 : index
    %3 = vector.load %arg3[%c0_3, %c0_4] : memref<1x1024xf32, #tpu.memory_space<vmem>>, vector<1x1024xf32>
    %4 = vector.broadcast %3 : vector<1x1024xf32> to vector<64x1024xf32>
    %5 = arith.addf %2, %4 : vector<64x1024xf32>
    %c0_5 = arith.constant 0 : index
    %c0_6 = arith.constant 0 : index
    %6 = vector.load %arg7[%c0_5, %c0_6] : memref<64x1024xf32, #tpu.memory_space<vmem>>, vector<64x1024xf32>
    tpu.vector_store %arg7[%c0_5, %c0_6], %5 {strides = array<i32>} : memref<64x1024xf32, #tpu.memory_space<vmem>>, vector<64x1024xf32>,
    %c0_7 = arith.constant 0 : index
    %c0_8 = arith.constant 0 : index
    %7 = vector.load %arg2[%c0_7, %c0_8] : memref<256x1024xf32, #tpu.memory_space<vmem>>, vector<256x1024xf32>
    %cst_9 = arith.constant 0.000000e+00 : f32
    %8 = vector.broadcast %cst_9 : f32 to vector<8x256xf32>
    %cst_10 = arith.constant 0.000000e+00 : f32
    %9 = vector.broadcast %cst_10 : f32 to vector<8x256xf32>
    %c0_i32 = arith.constant 0 : i32
    %c8_i32 = arith.constant 8 : i32
    %10 = arith.muli %c0_i32, %c8_i32 : i32
    %11 = tpu.assume_multiple %10, 8 : i32
    %12 = arith.index_cast %11 : i32 to index
    %c0_11 = arith.constant 0 : index
    %13 = vector.load %arg7[%12, %c0_11] : memref<64x1024xf32, #tpu.memory_space<vmem>>, vector<8x1024xf32>
    %cst_12 = arith.constant dense<0.000000e+00> : vector<8x1024xf32>
    %14 = tpu.matmul %8, %7, %cst_12 {dimension_numbers = #tpu.dot_dimension_numbers<[1], [0], [0], [1], [0, 0, 1, 1], [], []>} : vector<8x256xf32>, vector<256x1024xf32>, vector<8x1024xf32> -> vector<8x1024xf32>
    %15 = arith.addf %13, %14 : vector<8x1024xf32>
    %16 = vector.extract_strided_slice %15 {offsets = [0, 0], sizes = [8, 256], strides = [1, 1]} : vector<8x1024xf32> to vector<8x256xf32>
    %17 = arith.negf %16 : vector<8x256xf32>
    %18 = math.exp %17 : vector<8x256xf32>
    %cst_13 = arith.constant 1.000000e+00 : f32
    %19 = vector.broadcast %cst_13 : f32 to vector<8x256xf32>
    %20 = arith.addf %19, %18 : vector<8x256xf32>
    %21 = arith.divf %19, %20 : vector<8x256xf32>
    %22 = vector.extract_strided_slice %15 {offsets = [0, 256], sizes = [8, 256], strides = [1, 1]} : vector<8x1024xf32> to vector<8x256xf32>
    %23 = arith.negf %22 : vector<8x256xf32>
    %24 = math.exp %23 : vector<8x256xf32>
    %cst_14 = arith.constant 1.000000e+00 : f32
    %25 = vector.broadcast %cst_14 : f32 to vector<8x256xf32>
    %26 = arith.addf %25, %24 : vector<8x256xf32>
    %27 = arith.divf %25, %26 : vector<8x256xf32>
    %28 = vector.extract_strided_slice %15 {offsets = [0, 512], sizes = [8, 256], strides = [1, 1]} : vector<8x1024xf32> to vector<8x256xf32>
    %29 = math.tanh %28 : vector<8x256xf32>
    %30 = vector.extract_strided_slice %15 {offsets = [0, 768], sizes = [8, 256], strides = [1, 1]} : vector<8x1024xf32> to vector<8x256xf32>
    %31 = arith.negf %30 : vector<8x256xf32>
    %32 = math.exp %31 : vector<8x256xf32>
    %cst_15 = arith.constant 1.000000e+00 : f32
    %33 = vector.broadcast %cst_15 : f32 to vector<8x256xf32>
    %34 = arith.addf %33, %32 : vector<8x256xf32>
    %35 = arith.divf %33, %34 : vector<8x256xf32>
    %36 = arith.mulf %27, %9 : vector<8x256xf32>
    %37 = arith.mulf %21, %29 : vector<8x256xf32>
    %38 = arith.addf %36, %37 : vector<8x256xf32>
    %39 = math.tanh %38 : vector<8x256xf32>
    %40 = arith.mulf %35, %39 : vector<8x256xf32>
    %c1_i32 = arith.constant 1 : i32
    %c8_i32_16 = arith.constant 8 : i32
    %41 = arith.muli %c1_i32, %c8_i32_16 : i32
    %42 = tpu.assume_multiple %41, 8 : i32
    %43 = arith.index_cast %42 : i32 to index
    %c0_17 = arith.constant 0 : index
    %44 = vector.load %arg7[%43, %c0_17] : memref<64x1024xf32, #tpu.memory_space<vmem>>, vector<8x1024xf32>
    %cst_18 = arith.constant dense<0.000000e+00> : vector<8x1024xf32>
    %45 = tpu.matmul %40, %7, %cst_18 {dimension_numbers = #tpu.dot_dimension_numbers<[1], [0], [0], [1], [0, 0, 1, 1], [], []>} : vector<8x256xf32>, vector<256x1024xf32>, vector<8x1024xf32> -> vector<8x1024xf32>
    %46 = arith.addf %44, %45 : vector<8x1024xf32>
    %47 = vector.extract_strided_slice %46 {offsets = [0, 0], sizes = [8, 256], strides = [1, 1]} : vector<8x1024xf32> to vector<8x256xf32>
    %48 = arith.negf %47 : vector<8x256xf32>
    %49 = math.exp %48 : vector<8x256xf32>
    %cst_19 = arith.constant 1.000000e+00 : f32
    %50 = vector.broadcast %cst_19 : f32 to vector<8x256xf32>
    %51 = arith.addf %50, %49 : vector<8x256xf32>
    %52 = arith.divf %50, %51 : vector<8x256xf32>
    %53 = vector.extract_strided_slice %46 {offsets = [0, 256], sizes = [8, 256], strides = [1, 1]} : vector<8x1024xf32> to vector<8x256xf32>
    %54 = arith.negf %53 : vector<8x256xf32>
    %55 = math.exp %54 : vector<8x256xf32>
    %cst_20 = arith.constant 1.000000e+00 : f32
    %56 = vector.broadcast %cst_20 : f32 to vector<8x256xf32>
    %57 = arith.addf %56, %55 : vector<8x256xf32>
    %58 = arith.divf %56, %57 : vector<8x256xf32>
    %59 = vector.extract_strided_slice %46 {offsets = [0, 512], sizes = [8, 256], strides = [1, 1]} : vector<8x1024xf32> to vector<8x256xf32>
    %60 = math.tanh %59 : vector<8x256xf32>
    %61 = vector.extract_strided_slice %46 {offsets = [0, 768], sizes = [8, 256], strides = [1, 1]} : vector<8x1024xf32> to vector<8x256xf32>
    %62 = arith.negf %61 : vector<8x256xf32>
    %63 = math.exp %62 : vector<8x256xf32>
    %cst_21 = arith.constant 1.000000e+00 : f32
    %64 = vector.broadcast %cst_21 : f32 to vector<8x256xf32>
    %65 = arith.addf %64, %63 : vector<8x256xf32>
    %66 = arith.divf %64, %65 : vector<8x256xf32>
    %67 = arith.mulf %58, %38 : vector<8x256xf32>
    %68 = arith.mulf %52, %60 : vector<8x256xf32>
    %69 = arith.addf %67, %68 : vector<8x256xf32>
    %70 = math.tanh %69 : vector<8x256xf32>
    %71 = arith.mulf %66, %70 : vector<8x256xf32>
    %c2_i32 = arith.constant 2 : i32
    %c8_i32_22 = arith.constant 8 : i32
    %72 = arith.muli %c2_i32, %c8_i32_22 : i32
    %73 = tpu.assume_multiple %72, 8 : i32
    %74 = arith.index_cast %73 : i32 to index
    %c0_23 = arith.constant 0 : index
    %75 = vector.load %arg7[%74, %c0_23] : memref<64x1024xf32, #tpu.memory_space<vmem>>, vector<8x1024xf32>
    %cst_24 = arith.constant dense<0.000000e+00> : vector<8x1024xf32>
    %76 = tpu.matmul %71, %7, %cst_24 {dimension_numbers = #tpu.dot_dimension_numbers<[1], [0], [0], [1], [0, 0, 1, 1], [], []>} : vector<8x256xf32>, vector<256x1024xf32>, vector<8x1024xf32> -> vector<8x1024xf32>
    %77 = arith.addf %75, %76 : vector<8x1024xf32>
    %78 = vector.extract_strided_slice %77 {offsets = [0, 0], sizes = [8, 256], strides = [1, 1]} : vector<8x1024xf32> to vector<8x256xf32>
    %79 = arith.negf %78 : vector<8x256xf32>
    %80 = math.exp %79 : vector<8x256xf32>
    %cst_25 = arith.constant 1.000000e+00 : f32
    %81 = vector.broadcast %cst_25 : f32 to vector<8x256xf32>
    %82 = arith.addf %81, %80 : vector<8x256xf32>
    %83 = arith.divf %81, %82 : vector<8x256xf32>
    %84 = vector.extract_strided_slice %77 {offsets = [0, 256], sizes = [8, 256], strides = [1, 1]} : vector<8x1024xf32> to vector<8x256xf32>
    %85 = arith.negf %84 : vector<8x256xf32>
    %86 = math.exp %85 : vector<8x256xf32>
    %cst_26 = arith.constant 1.000000e+00 : f32
    %87 = vector.broadcast %cst_26 : f32 to vector<8x256xf32>
    %88 = arith.addf %87, %86 : vector<8x256xf32>
    %89 = arith.divf %87, %88 : vector<8x256xf32>
    %90 = vector.extract_strided_slice %77 {offsets = [0, 512], sizes = [8, 256], strides = [1, 1]} : vector<8x1024xf32> to vector<8x256xf32>
    %91 = math.tanh %90 : vector<8x256xf32>
    %92 = vector.extract_strided_slice %77 {offsets = [0, 768], sizes = [8, 256], strides = [1, 1]} : vector<8x1024xf32> to vector<8x256xf32>
    %93 = arith.negf %92 : vector<8x256xf32>
    %94 = math.exp %93 : vector<8x256xf32>
    %cst_27 = arith.constant 1.000000e+00 : f32
    %95 = vector.broadcast %cst_27 : f32 to vector<8x256xf32>
    %96 = arith.addf %95, %94 : vector<8x256xf32>
    %97 = arith.divf %95, %96 : vector<8x256xf32>
    %98 = arith.mulf %89, %69 : vector<8x256xf32>
    %99 = arith.mulf %83, %91 : vector<8x256xf32>
    %100 = arith.addf %98, %99 : vector<8x256xf32>
    %101 = math.tanh %100 : vector<8x256xf32>
    %102 = arith.mulf %97, %101 : vector<8x256xf32>
    %c3_i32 = arith.constant 3 : i32
    %c8_i32_28 = arith.constant 8 : i32
    %103 = arith.muli %c3_i32, %c8_i32_28 : i32
    %104 = tpu.assume_multiple %103, 8 : i32
    %105 = arith.index_cast %104 : i32 to index
    %c0_29 = arith.constant 0 : index
    %106 = vector.load %arg7[%105, %c0_29] : memref<64x1024xf32, #tpu.memory_space<vmem>>, vector<8x1024xf32>
    %cst_30 = arith.constant dense<0.000000e+00> : vector<8x1024xf32>
    %107 = tpu.matmul %102, %7, %cst_30 {dimension_numbers = #tpu.dot_dimension_numbers<[1], [0], [0], [1], [0, 0, 1, 1], [], []>} : vector<8x256xf32>, vector<256x1024xf32>, vector<8x1024xf32> -> vector<8x1024xf32>
    %108 = arith.addf %106, %107 : vector<8x1024xf32>
    %109 = vector.extract_strided_slice %108 {offsets = [0, 0], sizes = [8, 256], strides = [1, 1]} : vector<8x1024xf32> to vector<8x256xf32>
    %110 = arith.negf %109 : vector<8x256xf32>
    %111 = math.exp %110 : vector<8x256xf32>
    %cst_31 = arith.constant 1.000000e+00 : f32
    %112 = vector.broadcast %cst_31 : f32 to vector<8x256xf32>
    %113 = arith.addf %112, %111 : vector<8x256xf32>
    %114 = arith.divf %112, %113 : vector<8x256xf32>
    %115 = vector.extract_strided_slice %108 {offsets = [0, 256], sizes = [8, 256], strides = [1, 1]} : vector<8x1024xf32> to vector<8x256xf32>
    %116 = arith.negf %115 : vector<8x256xf32>
    %117 = math.exp %116 : vector<8x256xf32>
    %cst_32 = arith.constant 1.000000e+00 : f32
    %118 = vector.broadcast %cst_32 : f32 to vector<8x256xf32>
    %119 = arith.addf %118, %117 : vector<8x256xf32>
    %120 = arith.divf %118, %119 : vector<8x256xf32>
    %121 = vector.extract_strided_slice %108 {offsets = [0, 512], sizes = [8, 256], strides = [1, 1]} : vector<8x1024xf32> to vector<8x256xf32>
    %122 = math.tanh %121 : vector<8x256xf32>
    %123 = vector.extract_strided_slice %108 {offsets = [0, 768], sizes = [8, 256], strides = [1, 1]} : vector<8x1024xf32> to vector<8x256xf32>
    %124 = arith.negf %123 : vector<8x256xf32>
    %125 = math.exp %124 : vector<8x256xf32>
    %cst_33 = arith.constant 1.000000e+00 : f32
    %126 = vector.broadcast %cst_33 : f32 to vector<8x256xf32>
    %127 = arith.addf %126, %125 : vector<8x256xf32>
    %128 = arith.divf %126, %127 : vector<8x256xf32>
    %129 = arith.mulf %120, %100 : vector<8x256xf32>
    %130 = arith.mulf %114, %122 : vector<8x256xf32>
    %131 = arith.addf %129, %130 : vector<8x256xf32>
    %132 = math.tanh %131 : vector<8x256xf32>
    %133 = arith.mulf %128, %132 : vector<8x256xf32>
    %c4_i32 = arith.constant 4 : i32
    %c8_i32_34 = arith.constant 8 : i32
    %134 = arith.muli %c4_i32, %c8_i32_34 : i32
    %135 = tpu.assume_multiple %134, 8 : i32
    %136 = arith.index_cast %135 : i32 to index
    %c0_35 = arith.constant 0 : index
    %137 = vector.load %arg7[%136, %c0_35] : memref<64x1024xf32, #tpu.memory_space<vmem>>, vector<8x1024xf32>
    %cst_36 = arith.constant dense<0.000000e+00> : vector<8x1024xf32>
    %138 = tpu.matmul %133, %7, %cst_36 {dimension_numbers = #tpu.dot_dimension_numbers<[1], [0], [0], [1], [0, 0, 1, 1], [], []>} : vector<8x256xf32>, vector<256x1024xf32>, vector<8x1024xf32> -> vector<8x1024xf32>
    %139 = arith.addf %137, %138 : vector<8x1024xf32>
    %140 = vector.extract_strided_slice %139 {offsets = [0, 0], sizes = [8, 256], strides = [1, 1]} : vector<8x1024xf32> to vector<8x256xf32>
    %141 = arith.negf %140 : vector<8x256xf32>
    %142 = math.exp %141 : vector<8x256xf32>
    %cst_37 = arith.constant 1.000000e+00 : f32
    %143 = vector.broadcast %cst_37 : f32 to vector<8x256xf32>
    %144 = arith.addf %143, %142 : vector<8x256xf32>
    %145 = arith.divf %143, %144 : vector<8x256xf32>
    %146 = vector.extract_strided_slice %139 {offsets = [0, 256], sizes = [8, 256], strides = [1, 1]} : vector<8x1024xf32> to vector<8x256xf32>
    %147 = arith.negf %146 : vector<8x256xf32>
    %148 = math.exp %147 : vector<8x256xf32>
    %cst_38 = arith.constant 1.000000e+00 : f32
    %149 = vector.broadcast %cst_38 : f32 to vector<8x256xf32>
    %150 = arith.addf %149, %148 : vector<8x256xf32>
    %151 = arith.divf %149, %150 : vector<8x256xf32>
    %152 = vector.extract_strided_slice %139 {offsets = [0, 512], sizes = [8, 256], strides = [1, 1]} : vector<8x1024xf32> to vector<8x256xf32>
    %153 = math.tanh %152 : vector<8x256xf32>
    %154 = vector.extract_strided_slice %139 {offsets = [0, 768], sizes = [8, 256], strides = [1, 1]} : vector<8x1024xf32> to vector<8x256xf32>
    %155 = arith.negf %154 : vector<8x256xf32>
    %156 = math.exp %155 : vector<8x256xf32>
    %cst_39 = arith.constant 1.000000e+00 : f32
    %157 = vector.broadcast %cst_39 : f32 to vector<8x256xf32>
    %158 = arith.addf %157, %156 : vector<8x256xf32>
    %159 = arith.divf %157, %158 : vector<8x256xf32>
    %160 = arith.mulf %151, %131 : vector<8x256xf32>
    %161 = arith.mulf %145, %153 : vector<8x256xf32>
    %162 = arith.addf %160, %161 : vector<8x256xf32>
    %163 = math.tanh %162 : vector<8x256xf32>
    %164 = arith.mulf %159, %163 : vector<8x256xf32>
    %c5_i32 = arith.constant 5 : i32
    %c8_i32_40 = arith.constant 8 : i32
    %165 = arith.muli %c5_i32, %c8_i32_40 : i32
    %166 = tpu.assume_multiple %165, 8 : i32
    %167 = arith.index_cast %166 : i32 to index
    %c0_41 = arith.constant 0 : index
    %168 = vector.load %arg7[%167, %c0_41] : memref<64x1024xf32, #tpu.memory_space<vmem>>, vector<8x1024xf32>
    %cst_42 = arith.constant dense<0.000000e+00> : vector<8x1024xf32>
    %169 = tpu.matmul %164, %7, %cst_42 {dimension_numbers = #tpu.dot_dimension_numbers<[1], [0], [0], [1], [0, 0, 1, 1], [], []>} : vector<8x256xf32>, vector<256x1024xf32>, vector<8x1024xf32> -> vector<8x1024xf32>
    %170 = arith.addf %168, %169 : vector<8x1024xf32>
    %171 = vector.extract_strided_slice %170 {offsets = [0, 0], sizes = [8, 256], strides = [1, 1]} : vector<8x1024xf32> to vector<8x256xf32>
    %172 = arith.negf %171 : vector<8x256xf32>
    %173 = math.exp %172 : vector<8x256xf32>
    %cst_43 = arith.constant 1.000000e+00 : f32
    %174 = vector.broadcast %cst_43 : f32 to vector<8x256xf32>
    %175 = arith.addf %174, %173 : vector<8x256xf32>
    %176 = arith.divf %174, %175 : vector<8x256xf32>
    %177 = vector.extract_strided_slice %170 {offsets = [0, 256], sizes = [8, 256], strides = [1, 1]} : vector<8x1024xf32> to vector<8x256xf32>
    %178 = arith.negf %177 : vector<8x256xf32>
    %179 = math.exp %178 : vector<8x256xf32>
    %cst_44 = arith.constant 1.000000e+00 : f32
    %180 = vector.broadcast %cst_44 : f32 to vector<8x256xf32>
    %181 = arith.addf %180, %179 : vector<8x256xf32>
    %182 = arith.divf %180, %181 : vector<8x256xf32>
    %183 = vector.extract_strided_slice %170 {offsets = [0, 512], sizes = [8, 256], strides = [1, 1]} : vector<8x1024xf32> to vector<8x256xf32>
    %184 = math.tanh %183 : vector<8x256xf32>
    %185 = vector.extract_strided_slice %170 {offsets = [0, 768], sizes = [8, 256], strides = [1, 1]} : vector<8x1024xf32> to vector<8x256xf32>
    %186 = arith.negf %185 : vector<8x256xf32>
    %187 = math.exp %186 : vector<8x256xf32>
    %cst_45 = arith.constant 1.000000e+00 : f32
    %188 = vector.broadcast %cst_45 : f32 to vector<8x256xf32>
    %189 = arith.addf %188, %187 : vector<8x256xf32>
    %190 = arith.divf %188, %189 : vector<8x256xf32>
    %191 = arith.mulf %182, %162 : vector<8x256xf32>
    %192 = arith.mulf %176, %184 : vector<8x256xf32>
    %193 = arith.addf %191, %192 : vector<8x256xf32>
    %194 = math.tanh %193 : vector<8x256xf32>
    %195 = arith.mulf %190, %194 : vector<8x256xf32>
    %c6_i32 = arith.constant 6 : i32
    %c8_i32_46 = arith.constant 8 : i32
    %196 = arith.muli %c6_i32, %c8_i32_46 : i32
    %197 = tpu.assume_multiple %196, 8 : i32
    %198 = arith.index_cast %197 : i32 to index
    %c0_47 = arith.constant 0 : index
    %199 = vector.load %arg7[%198, %c0_47] : memref<64x1024xf32, #tpu.memory_space<vmem>>, vector<8x1024xf32>
    %cst_48 = arith.constant dense<0.000000e+00> : vector<8x1024xf32>
    %200 = tpu.matmul %195, %7, %cst_48 {dimension_numbers = #tpu.dot_dimension_numbers<[1], [0], [0], [1], [0, 0, 1, 1], [], []>} : vector<8x256xf32>, vector<256x1024xf32>, vector<8x1024xf32> -> vector<8x1024xf32>
    %201 = arith.addf %199, %200 : vector<8x1024xf32>
    %202 = vector.extract_strided_slice %201 {offsets = [0, 0], sizes = [8, 256], strides = [1, 1]} : vector<8x1024xf32> to vector<8x256xf32>
    %203 = arith.negf %202 : vector<8x256xf32>
    %204 = math.exp %203 : vector<8x256xf32>
    %cst_49 = arith.constant 1.000000e+00 : f32
    %205 = vector.broadcast %cst_49 : f32 to vector<8x256xf32>
    %206 = arith.addf %205, %204 : vector<8x256xf32>
    %207 = arith.divf %205, %206 : vector<8x256xf32>
    %208 = vector.extract_strided_slice %201 {offsets = [0, 256], sizes = [8, 256], strides = [1, 1]} : vector<8x1024xf32> to vector<8x256xf32>
    %209 = arith.negf %208 : vector<8x256xf32>
    %210 = math.exp %209 : vector<8x256xf32>
    %cst_50 = arith.constant 1.000000e+00 : f32
    %211 = vector.broadcast %cst_50 : f32 to vector<8x256xf32>
    %212 = arith.addf %211, %210 : vector<8x256xf32>
    %213 = arith.divf %211, %212 : vector<8x256xf32>
    %214 = vector.extract_strided_slice %201 {offsets = [0, 512], sizes = [8, 256], strides = [1, 1]} : vector<8x1024xf32> to vector<8x256xf32>
    %215 = math.tanh %214 : vector<8x256xf32>
    %216 = vector.extract_strided_slice %201 {offsets = [0, 768], sizes = [8, 256], strides = [1, 1]} : vector<8x1024xf32> to vector<8x256xf32>
    %217 = arith.negf %216 : vector<8x256xf32>
    %218 = math.exp %217 : vector<8x256xf32>
    %cst_51 = arith.constant 1.000000e+00 : f32
    %219 = vector.broadcast %cst_51 : f32 to vector<8x256xf32>
    %220 = arith.addf %219, %218 : vector<8x256xf32>
    %221 = arith.divf %219, %220 : vector<8x256xf32>
    %222 = arith.mulf %213, %193 : vector<8x256xf32>
    %223 = arith.mulf %207, %215 : vector<8x256xf32>
    %224 = arith.addf %222, %223 : vector<8x256xf32>
    %225 = math.tanh %224 : vector<8x256xf32>
    %226 = arith.mulf %221, %225 : vector<8x256xf32>
    %c7_i32 = arith.constant 7 : i32
    %c8_i32_52 = arith.constant 8 : i32
    %227 = arith.muli %c7_i32, %c8_i32_52 : i32
    %228 = tpu.assume_multiple %227, 8 : i32
    %229 = arith.index_cast %228 : i32 to index
    %c0_53 = arith.constant 0 : index
    %230 = vector.load %arg7[%229, %c0_53] : memref<64x1024xf32, #tpu.memory_space<vmem>>, vector<8x1024xf32>
    %cst_54 = arith.constant dense<0.000000e+00> : vector<8x1024xf32>
    %231 = tpu.matmul %226, %7, %cst_54 {dimension_numbers = #tpu.dot_dimension_numbers<[1], [0], [0], [1], [0, 0, 1, 1], [], []>} : vector<8x256xf32>, vector<256x1024xf32>, vector<8x1024xf32> -> vector<8x1024xf32>
    %232 = arith.addf %230, %231 : vector<8x1024xf32>
    %233 = vector.extract_strided_slice %232 {offsets = [0, 0], sizes = [8, 256], strides = [1, 1]} : vector<8x1024xf32> to vector<8x256xf32>
    %234 = arith.negf %233 : vector<8x256xf32>
    %235 = math.exp %234 : vector<8x256xf32>
    %cst_55 = arith.constant 1.000000e+00 : f32
    %236 = vector.broadcast %cst_55 : f32 to vector<8x256xf32>
    %237 = arith.addf %236, %235 : vector<8x256xf32>
    %238 = arith.divf %236, %237 : vector<8x256xf32>
    %239 = vector.extract_strided_slice %232 {offsets = [0, 256], sizes = [8, 256], strides = [1, 1]} : vector<8x1024xf32> to vector<8x256xf32>
    %240 = arith.negf %239 : vector<8x256xf32>
    %241 = math.exp %240 : vector<8x256xf32>
    %cst_56 = arith.constant 1.000000e+00 : f32
    %242 = vector.broadcast %cst_56 : f32 to vector<8x256xf32>
    %243 = arith.addf %242, %241 : vector<8x256xf32>
    %244 = arith.divf %242, %243 : vector<8x256xf32>
    %245 = vector.extract_strided_slice %232 {offsets = [0, 512], sizes = [8, 256], strides = [1, 1]} : vector<8x1024xf32> to vector<8x256xf32>
    %246 = math.tanh %245 : vector<8x256xf32>
    %247 = vector.extract_strided_slice %232 {offsets = [0, 768], sizes = [8, 256], strides = [1, 1]} : vector<8x1024xf32> to vector<8x256xf32>
    %248 = arith.negf %247 : vector<8x256xf32>
    %249 = math.exp %248 : vector<8x256xf32>
    %cst_57 = arith.constant 1.000000e+00 : f32
    %250 = vector.broadcast %cst_57 : f32 to vector<8x256xf32>
    %251 = arith.addf %250, %249 : vector<8x256xf32>
    %252 = arith.divf %250, %251 : vector<8x256xf32>
    %253 = arith.mulf %244, %224 : vector<8x256xf32>
    %254 = arith.mulf %238, %246 : vector<8x256xf32>
    %255 = arith.addf %253, %254 : vector<8x256xf32>
    %256 = math.tanh %255 : vector<8x256xf32>
    %257 = arith.mulf %252, %256 : vector<8x256xf32>
    %c8_i32_58 = arith.constant 8 : i32
    %c0_59 = arith.constant 0 : index
    %c0_60 = arith.constant 0 : index
    %258 = vector.load %arg4[%c0_59, %c0_60] : memref<256x4xf32, #tpu.memory_space<vmem>>, vector<256x4xf32>
    %cst_61 = arith.constant dense<0.000000e+00> : vector<8x4xf32>
    %259 = tpu.matmul %257, %258, %cst_61 {dimension_numbers = #tpu.dot_dimension_numbers<[1], [0], [0], [1], [0, 0, 1, 1], [], []>} : vector<8x256xf32>, vector<256x4xf32>, vector<8x4xf32> -> vector<8x4xf32>
    %c0_62 = arith.constant 0 : index
    %c0_63 = arith.constant 0 : index
    %260 = vector.load %arg5[%c0_62, %c0_63] : memref<1x4xf32, #tpu.memory_space<vmem>>, vector<1x4xf32>
    %261 = vector.broadcast %260 : vector<1x4xf32> to vector<8x4xf32>
    %262 = arith.addf %259, %261 : vector<8x4xf32>
    %c0_64 = arith.constant 0 : index
    %c0_65 = arith.constant 0 : index
    %263 = vector.load %arg6[%c0_64, %c0_65] : memref<8x4xf32, #tpu.memory_space<vmem>>, vector<8x4xf32>
    tpu.vector_store %arg6[%c0_64, %c0_65], %262 {strides = array<i32>} : memref<8x4xf32, #tpu.memory_space<vmem>>, vector<8x4xf32>,
    return
  }
}

</mosaic_0001>

<bundles_post_ra>
// kernel: tpu_custom_call.1
= control target key start
LH: loop header
LB: loop body
LE: loop exit
PB: predicated region body
PF: predicated region fallthrough
CT: control target
= control target key end

     0   :  { %11 = vsyncpa [#allocation4], 0  ;;  %s8394_s0 = inlined_call_operand.vmem [shape: f32[64,64], index: 0, kind: input, shape index: {}]   ;;  %s8395_s1 = inlined_call_operand.hbm [shape: f32[64,1024], index: 1, kind: input, shape index: {}]   ;;  %s8396_s2 = inlined_call_operand.hbm [shape: f32[256,1024], index: 2, kind: input, shape index: {}]   ;;  %s8397_s3 = inlined_call_operand.vmem [shape: f32[1,1024], index: 3, kind: input, shape index: {}]   ;;  %s8398_s4 = inlined_call_operand.vmem [shape: f32[256,4], index: 4, kind: input, shape index: {}]   ;;  %s8399_s5 = inlined_call_operand.vmem [shape: f32[1,4], index: 5, kind: input, shape index: {}]   ;;  %s8400_s6 = inlined_call_operand.vmem [shape: f32[8,4], index: 6, kind: output, shape index: {}]  }
   0x1   :  { %12 = vsyncpa [#allocation6], 0  ;;  %s6599_s21 = smov [#allocation3]   ;;  %s6551_s25 = scalar_lea.hbm %s8395_s1, 8192 }
   0x2   :  { %s20_s22 = sshll.u32 %s6599_s21, 4  ;;  %p6552_p0 = scmp.ne.s32.totalorder %s8395_s1, %s6551_s25  ;;  %s21_s22 = int_to_ptr.vmem [resolvable:$true] %s20_s22 }
   0x3   :  { %p6555_p1 = scmp.lt.u32.totalorder %s6551_s25, %s8395_s1 }
   0x5   :  { %p6557_p2 = pnand %p6555_p1, %p6552_p0 }
   0x7   :  { %6560 = shalt.err (!%p6557_p2)
}
   0x8   :  { %s6561_s30 = scalar_lea.vmem %s21_s22, 8192  ;;  %p6566_p4 = scmp.lt.s32.totalorder %s21_s22, %s21_s22 }
   0x9   :  { %p6562_p3 = scmp.ne.s32.totalorder %s21_s22, %s6561_s30  ;;  %p6567_p5 = scmp.lt.s32.totalorder %s6561_s30, %s6561_s30 }
   0xb   :  { %p6568_p6 = por %p6567_p5, %p6566_p4 }
   0xd   :  { %p6569_p7 = pnand %p6568_p6, %p6562_p3 }
   0xf   :  { %6572 = shalt.err (!%p6569_p7)
}
  0x10   :  { %s6600_s7 = smov 1024   ;;  %s6601_s8 = smov 64  }
  0x11   :  { %26 = dma.hbm_to_vmem [thread:$0]  %s8395_s1, 8192, %s21_s22, [#allocation4], %s6600_s7, %s6600_s7, %s6601_s8  }
  0x12   :  { %s6602_s11 = smov [#allocation5]   ;;  %s6573_s15 = scalar_lea.hbm %s8396_s2, 32768 }
  0x13   :  { %s32_s12 = sshll.u32 %s6602_s11, 4  ;;  %p6574_p8 = scmp.ne.s32.totalorder %s8396_s2, %s6573_s15  ;;  %s33_s12 = int_to_ptr.vmem [resolvable:$true] %s32_s12 }
  0x14   :  { %p6577_p9 = scmp.lt.u32.totalorder %s6573_s15, %s8396_s2 }
  0x16   :  { %p6579_p10 = pnand %p6577_p9, %p6574_p8 }
  0x18   :  { %6582 = shalt.err (!%p6579_p10)
}
  0x19   :  { %s6583_s20 = scalar_lea.vmem %s33_s12, 32768  ;;  %p6588_p12 = scmp.lt.s32.totalorder %s33_s12, %s33_s12 }
  0x1a   :  { %p6584_p11 = scmp.ne.s32.totalorder %s33_s12, %s6583_s20  ;;  %p6589_p13 = scmp.lt.s32.totalorder %s6583_s20, %s6583_s20 }
  0x1c   :  { %p6590_p0 = por %p6589_p13, %p6588_p12 }
  0x1e   :  { %p6591_p1 = pnand %p6590_p0, %p6584_p11 }
  0x20   :  { %6594 = shalt.err (!%p6591_p1)
}
  0x21   :  { %38 = dma.hbm_to_vmem [thread:$0]  %s8396_s2, 32768, %s33_s12, [#allocation6], %s6600_s7, %s6600_s7, %s6601_s8  }
  0x22   :  { %6595 = dma.done.wait [#allocation4], 8192  }
  0x23   :  { %6596 = vsyncadd [#allocation4], 4294959104 }
  0x24   :  { %6597 = dma.done.wait [#allocation6], 32768  }
  0x25   :  { %6598 = vsyncadd [#allocation6], 4294934528  ;;  %v8401_v0 = vmov 0.0   ;;  %v60_v1 = vld [vmem:[#allocation3 + $0x8] sm:$0xff]  ;;  %v59_v3 = vld [vmem:[#allocation3] sm:$0xff]  ;;  %vm165_vm0 = vcmask 523264  }
  0x26   :  { %278 = vmatprep.mubr.f32.mxu1 %v8401_v0  ;;  %254 = vmatprep.mubr.f32.mxu0 %v8401_v0  ;;  %v68_v2 = vld [vmem:[#allocation3 + $0x48] sm:$0xff]  ;;  %v67_v5 = vld [vmem:[#allocation3 + $0x40] sm:$0xff]  ;;  %v62_v24 = vld [vmem:[#allocation3 + $0x18] sm:$0xff]  ;;  %vm3879_vm1 = vcmask 31744  }
  0x27   :  { %v4010_v4 = vpack.c.bf16 %v68_v2, %v60_v1  ;;  %v76_v6 = vld [vmem:[#allocation3 + $0x88] sm:$0xff]  ;;  %v4012_v8 = vpack.c.bf16 %v67_v5, %v59_v3  ;;  %v75_v10 = vld [vmem:[#allocation3 + $0x80] sm:$0xff]  ;;  %v70_v25 = vld [vmem:[#allocation3 + $0x58] sm:$0xff] }
  0x28   :  { %v84_v7 = vld [vmem:[#allocation3 + $0xc8] sm:$0xff]  ;;  %v83_v11 = vld [vmem:[#allocation3 + $0xc0] sm:$0xff]  ;;  %v61_v29 = vld [vmem:[#allocation3 + $0x10] sm:$0xff]  ;;  %v4026_v30 = vpack.c.bf16 %v70_v25, %v62_v24 }
  0x29   :  { %v4014_v9 = vpack.c.bf16 %v84_v7, %v76_v6  ;;  %v92_v12 = vld [vmem:[#allocation3 + $0x108] sm:$0xff]  ;;  %4011 = vmatprep.subr.bf16.mxu0 %v4010_v4  ;;  %6154 = vmatprep.subr.bf16.mxu1 %v4010_v4  ;;  %v4016_v14 = vpack.c.bf16 %v83_v11, %v75_v10  ;;  %v91_v16 = vld [vmem:[#allocation3 + $0x100] sm:$0xff]  ;;  %v69_v32 = vld [vmem:[#allocation3 + $0x50] sm:$0xff] }
  0x2a   :  { %v100_v13 = vld [vmem:[#allocation3 + $0x148] sm:$0xff]  ;;  %4013 = vmatpush1.bf16.msra.mxu0 %v4012_v8  ;;  %6158 = vmatpush1.bf16.msra.mxu1 %v4012_v8  ;;  %v99_v17 = vld [vmem:[#allocation3 + $0x140] sm:$0xff]  ;;  %v78_v35 = vld [vmem:[#allocation3 + $0x98] sm:$0xff]  ;;  %v4028_v41 = vpack.c.bf16 %v69_v32, %v61_v29 }
  0x2b   :  { %4015 = vmatprep.subr.bf16.mxu0 %v4014_v9  ;;  %6155 = vmatprep.subr.bf16.mxu1 %v4014_v9  ;;  %v4018_v15 = vpack.c.bf16 %v100_v13, %v92_v12  ;;  %v108_v18 = vld [vmem:[#allocation3 + $0x188] sm:$0xff]  ;;  %v4020_v20 = vpack.c.bf16 %v99_v17, %v91_v16  ;;  %v107_v22 = vld [vmem:[#allocation3 + $0x180] sm:$0xff]  ;;  %v86_v36 = vld [vmem:[#allocation3 + $0xd8] sm:$0xff] }
  0x2c   :  { %v116_v19 = vld [vmem:[#allocation3 + $0x1c8] sm:$0xff]  ;;  %v115_v23 = vld [vmem:[#allocation3 + $0x1c0] sm:$0xff]  ;;  %v77_v43 = vld [vmem:[#allocation3 + $0x90] sm:$0xff]  ;;  %v4030_v47 = vpack.c.bf16 %v86_v36, %v78_v35 }
  0x2d   :  { %v4022_v21 = vpack.c.bf16 %v116_v19, %v108_v18  ;;  %v64_v26 = vld [vmem:[#allocation3 + $0x28] sm:$0xff]  ;;  %v4024_v28 = vpack.c.bf16 %v115_v23, %v107_v22  ;;  %v63_v33 = vld [vmem:[#allocation3 + $0x20] sm:$0xff]  ;;  %v85_v44 = vld [vmem:[#allocation3 + $0xd0] sm:$0xff] }
  0x2e   :  { %4017 = vmatpush1.bf16.msra.mxu0 %v4016_v14  ;;  %6159 = vmatpush1.bf16.msra.mxu1 %v4016_v14  ;;  %v72_v27 = vld [vmem:[#allocation3 + $0x68] sm:$0xff]  ;;  %v71_v34 = vld [vmem:[#allocation3 + $0x60] sm:$0xff]  ;;  %v94_v49 = vld [vmem:[#allocation3 + $0x118] sm:$0xff]  ;;  %v4032_v55 = vpack.c.bf16 %v85_v44, %v77_v43 }
  0x2f   :  { %4019 = vmatprep.subr.bf16.mxu0 %v4018_v15  ;;  %6156 = vmatprep.subr.bf16.mxu1 %v4018_v15  ;;  %v4042_v31 = vpack.c.bf16 %v72_v27, %v64_v26  ;;  %v80_v37 = vld [vmem:[#allocation3 + $0xa8] sm:$0xff]  ;;  %v6668_v39 = vld [vmem:[%s8394_s0 + $0x20] sm:$0xff]  ;;  %v4044_v42 = vpack.c.bf16 %v71_v34, %v63_v33  ;;  %v102_v50 = vld [vmem:[#allocation3 + $0x158] sm:$0xff] }
  0x30   :  { %v88_v38 = vld [vmem:[#allocation3 + $0xe8] sm:$0xff]  ;;  %v6673_v40 = vld [vmem:[%s8394_s0] sm:$0xff]  ;;  %v93_v57 = vld [vmem:[#allocation3 + $0x110] sm:$0xff]  ;;  %v4034_v61 = vpack.c.bf16 %v102_v50, %v94_v49 }
  0x31   :  { %v79_v45 = vld [vmem:[#allocation3 + $0xa0] sm:$0xff]  ;;  %v4046_v48 = vpack.c.bf16 %v88_v38, %v80_v37  ;;  %v96_v51 = vld [vmem:[#allocation3 + $0x128] sm:$0xff]  ;;  %v101_v58 = vld [vmem:[#allocation3 + $0x150] sm:$0xff] }
  0x32   :  { %4021 = vmatpush1.bf16.msra.mxu0 %v4020_v20  ;;  %6160 = vmatpush1.bf16.msra.mxu1 %v4020_v20  ;;  %v87_v46 = vld [vmem:[#allocation3 + $0xe0] sm:$0xff]  ;;  %v104_v52 = vld [vmem:[#allocation3 + $0x168] sm:$0xff]  ;;  %v110_v63 = vld [vmem:[#allocation3 + $0x198] sm:$0xff]  ;;  %v4036_v6 = vpack.c.bf16 %v101_v58, %v93_v57 }
  0x33   :  { %4023 = vmatprep.subr.bf16.mxu0 %v4022_v21  ;;  %6157 = vmatprep.subr.bf16.mxu1 %v4022_v21  ;;  %v6682_v53 = vld [vmem:[%s8394_s0 + $0x28] sm:$0xff]  ;;  %v4048_v56 = vpack.c.bf16 %v87_v46, %v79_v45  ;;  %v95_v59 = vld [vmem:[#allocation3 + $0x120] sm:$0xff]  ;;  %v4050_v62 = vpack.c.bf16 %v104_v52, %v96_v51  ;;  %v118_v1 = vld [vmem:[#allocation3 + $0x1d8] sm:$0xff] }
  0x34   :  { %v6687_v54 = vld [vmem:[%s8394_s0 + $0x8] sm:$0xff]  ;;  %v103_v60 = vld [vmem:[#allocation3 + $0x160] sm:$0xff]  ;;  %v6698_v4 = vld [vmem:[%s8394_s0 + $0x30] sm:$0xff]  ;;  %v4038_v12 = vpack.c.bf16 %v118_v1, %v110_v63 }
  0x35   :  { %v112_v2 = vld [vmem:[#allocation3 + $0x1a8] sm:$0xff]  ;;  %v6703_v5 = vld [vmem:[%s8394_s0 + $0x10] sm:$0xff]  ;;  %v4052_v7 = vpack.c.bf16 %v103_v60, %v95_v59  ;;  %v111_v10 = vld [vmem:[#allocation3 + $0x1a0] sm:$0xff] }
  0x36   :  { %4025 = vmatpush1.bf16.msra.mxu0 %v4024_v28  ;;  %6161 = vmatpush1.bf16.msra.mxu1 %v4024_v28  ;;  %v120_v3 = vld [vmem:[#allocation3 + $0x1e8] sm:$0xff]  ;;  %v109_v8 = vld [vmem:[#allocation3 + $0x190] sm:$0xff]  ;;  %v119_v11 = vld [vmem:[#allocation3 + $0x1e0] sm:$0xff] }
  0x37   :  { %4027 = vmatprep.subr.bf16.mxu1 %v4026_v30  ;;  %4043 = vmatprep.subr.bf16.mxu0 %v4042_v31  ;;  %v117_v9 = vld [vmem:[#allocation3 + $0x1d0] sm:$0xff]  ;;  %v4054_v13 = vpack.c.bf16 %v120_v3, %v112_v2  ;;  %v66_v14 = vld [vmem:[#allocation3 + $0x38] sm:$0xff]  ;;  %v707_v16 = vld [vmem:[#allocation5 + $0x8] sm:$0xff]  ;;  %v4056_v21 = vpack.c.bf16 %v119_v11, %v111_v10 }
  0x38   :  { %v74_v15 = vld [vmem:[#allocation3 + $0x78] sm:$0xff]  ;;  %v715_v17 = vld [vmem:[#allocation5 + $0x48] sm:$0xff]  ;;  %v4040_v20 = vpack.c.bf16 %v117_v9, %v109_v8  ;;  %v65_v22 = vld [vmem:[#allocation3 + $0x30] sm:$0xff] }
  0x39   :  { %3898 = vmatmul.mubr.msk.f32.vlgmr.msra.gmra.mrb[0].mxu1 %vm165_vm0, %v6668_v39  ;;  %3894 = vmatmul.mubr.msk.f32.vlgmr.msra.gmra.mrb[0].mxu0 %vm165_vm0, %v6673_v40  ;;  %v6714_v18 = vld [vmem:[%s8394_s0 + $0x38] sm:$0xff]  ;;  %v73_v23 = vld [vmem:[#allocation3 + $0x70] sm:$0xff]  ;;  %v706_v24 = vld [vmem:[#allocation5] sm:$0xff]  ;;  %v4058_v26 = vpack.c.bf16 %v74_v15, %v66_v14  ;;  %v6723_v27 = vpack.c.bf16 %v715_v17, %v707_v16 }
  0x3a   :  { %4029 = vmatpush1.bf16.msra.mxu1 %v4028_v41  ;;  %4045 = vmatpush1.bf16.msra.mxu0 %v4044_v42  ;;  %v6719_v19 = vld [vmem:[%s8394_s0 + $0x18] sm:$0xff]  ;;  %v714_v25 = vld [vmem:[#allocation5 + $0x40] sm:$0xff]  ;;  %v723_v28 = vld [vmem:[#allocation5 + $0x88] sm:$0xff]  ;;  %v4060_v32 = vpack.c.bf16 %v73_v23, %v65_v22 }
  0x3b   :  { %284 = vmatprep.mubr.f32.mxu1 %v8401_v0  ;;  %260 = vmatprep.mubr.f32.mxu0 %v8401_v0  ;;  %8688 = vst [vmem:[#allocation9_spill] sm:$0xff] %v6723_v27  ;;  %v731_v29 = vld [vmem:[#allocation5 + $0xc8] sm:$0xff]  ;;  %v82_v30 = vld [vmem:[#allocation3 + $0xb8] sm:$0xff]  ;;  %v6729_v33 = vpack.c.bf16 %v714_v25, %v706_v24  ;;  %v722_v35 = vld [vmem:[#allocation5 + $0x80] sm:$0xff] }
  0x3c   :  { %4031 = vmatprep.subr.bf16.mxu1 %v4030_v47  ;;  %4047 = vmatprep.subr.bf16.mxu0 %v4046_v48  ;;  %v90_v31 = vld [vmem:[#allocation3 + $0xf8] sm:$0xff]  ;;  %v6733_v34 = vpack.c.bf16 %v731_v29, %v723_v28  ;;  %v730_v36 = vld [vmem:[#allocation5 + $0xc0] sm:$0xff]  ;;  %v739_v37 = vld [vmem:[#allocation5 + $0x108] sm:$0xff] }
  0x3d   :  { %3899 = vmatmul.mubr.msk.f32.gmra.mrb[2].mxu1 %vm165_vm0, %v6682_v53  ;;  %3895 = vmatmul.mubr.msk.f32.gmra.mrb[2].mxu0 %vm165_vm0, %v6687_v54  ;;  %8689 = vst [vmem:[#allocation10_spill] sm:$0xff] %v6729_v33  ;;  %v4062_v38 = vpack.c.bf16 %v90_v31, %v82_v30  ;;  %v747_v41 = vld [vmem:[#allocation5 + $0x148] sm:$0xff]  ;;  %v81_v42 = vld [vmem:[#allocation3 + $0xb0] sm:$0xff]  ;;  %v98_v44 = vld [vmem:[#allocation3 + $0x138] sm:$0xff]  ;;  %v6741_v46 = vpack.c.bf16 %v730_v36, %v722_v35 }
  0x3e   :  { %4033 = vmatpush1.bf16.msra.mxu1 %v4032_v55  ;;  %4049 = vmatpush1.bf16.msra.mxu0 %v4048_v56  ;;  %8690 = vst [vmem:[#allocation11_spill] sm:$0xff] %v6733_v34  ;;  %v89_v43 = vld [vmem:[#allocation3 + $0xf0] sm:$0xff]  ;;  %v106_v45 = vld [vmem:[#allocation3 + $0x178] sm:$0xff]  ;;  %v6745_v47 = vpack.c.bf16 %v747_v41, %v739_v37  ;;  %v738_v49 = vld [vmem:[#allocation5 + $0x100] sm:$0xff] }
  0x3f   :  { %290 = vmatprep.mubr.f32.mxu1 %v8401_v0  ;;  %266 = vmatprep.mubr.f32.mxu0 %v8401_v0  ;;  %8691 = vst [vmem:[#allocation12_spill] sm:$0xff] %v6741_v46  ;;  %v4064_v48 = vpack.c.bf16 %v89_v43, %v81_v42  ;;  %v746_v50 = vld [vmem:[#allocation5 + $0x140] sm:$0xff]  ;;  %v755_v51 = vld [vmem:[#allocation5 + $0x188] sm:$0xff]  ;;  %v4066_v55 = vpack.c.bf16 %v106_v45, %v98_v44  ;;  %v97_v56 = vld [vmem:[#allocation3 + $0x130] sm:$0xff] }
  0x40   :  { %4035 = vmatprep.subr.bf16.mxu1 %v4034_v61  ;;  %4051 = vmatprep.subr.bf16.mxu0 %v4050_v62  ;;  %8692 = vst [vmem:[#allocation13_spill] sm:$0xff] %v6745_v47  ;;  %v763_v52 = vld [vmem:[#allocation5 + $0x1c8] sm:$0xff]  ;;  %v105_v57 = vld [vmem:[#allocation3 + $0x170] sm:$0xff]  ;;  %v114_v58 = vld [vmem:[#allocation3 + $0x1b8] sm:$0xff]  ;;  %v6754_v60 = vpack.c.bf16 %v746_v50, %v738_v49 }
  0x41   :  { %3900 = vmatmul.mubr.msk.f32.gmra.mrb[4].mxu1 %vm165_vm0, %v6698_v4  ;;  %3896 = vmatmul.mubr.msk.f32.gmra.mrb[4].mxu0 %vm165_vm0, %v6703_v5  ;;  %v122_v59 = vld [vmem:[#allocation3 + $0x1f8] sm:$0xff]  ;;  %v6757_v61 = vpack.c.bf16 %v763_v52, %v755_v51  ;;  %v754_v62 = vld [vmem:[#allocation5 + $0x180] sm:$0xff]  ;;  %v771_v1 = vld [vmem:[#allocation5 + $0x208] sm:$0xff]  ;;  %v4068_v2 = vpack.c.bf16 %v105_v57, %v97_v56 }
  0x42   :  { %4037 = vmatpush1.bf16.msra.mxu1 %v4036_v6  ;;  %4053 = vmatpush1.bf16.msra.mxu0 %v4052_v7  ;;  %8693 = vst [vmem:[#allocation14_spill] sm:$0xff] %v6754_v60  ;;  %v762_v63 = vld [vmem:[#allocation5 + $0x1c0] sm:$0xff]  ;;  %v779_v3 = vld [vmem:[#allocation5 + $0x248] sm:$0xff]  ;;  %v4070_v6 = vpack.c.bf16 %v122_v59, %v114_v58  ;;  %v113_v7 = vld [vmem:[#allocation3 + $0x1b0] sm:$0xff] }
  0x43   :  { %296 = vmatprep.mubr.f32.mxu1 %v8401_v0  ;;  %272 = vmatprep.mubr.f32.mxu0 %v8401_v0  ;;  %8694 = vst [vmem:[#allocation15_spill] sm:$0xff] %v6757_v61  ;;  %v121_v8 = vld [vmem:[#allocation3 + $0x1f0] sm:$0xff]  ;;  %v709_v9 = vld [vmem:[#allocation5 + $0x18] sm:$0xff]  ;;  %v6766_v11 = vpack.c.bf16 %v762_v63, %v754_v62  ;;  %v778_v14 = vld [vmem:[#allocation5 + $0x240] sm:$0xff] }
  0x44   :  { %4039 = vmatprep.subr.bf16.mxu1 %v4038_v12  ;;  %4055 = vmatprep.subr.bf16.mxu0 %v4054_v13  ;;  %v717_v10 = vld [vmem:[#allocation5 + $0x58] sm:$0xff]  ;;  %v6769_v12 = vpack.c.bf16 %v779_v3, %v771_v1  ;;  %v770_v13 = vld [vmem:[#allocation5 + $0x200] sm:$0xff]  ;;  %v4072_v15 = vpack.c.bf16 %v121_v8, %v113_v7  ;;  %v787_v16 = vld [vmem:[#allocation5 + $0x288] sm:$0xff] }
  0x45   :  { %3901 = vmatmul.mubr.msk.f32.gmra.mrb[6].mxu1 %vm165_vm0, %v6714_v18  ;;  %3897 = vmatmul.mubr.msk.f32.gmra.mrb[6].mxu0 %vm165_vm0, %v6719_v19  ;;  %8695 = vst [vmem:[#allocation16_spill] sm:$0xff] %v6766_v11  ;;  %v795_v17 = vld [vmem:[#allocation5 + $0x2c8] sm:$0xff]  ;;  %v786_v23 = vld [vmem:[#allocation5 + $0x280] sm:$0xff]  ;;  %v708_v45 = vld [vmem:[#allocation5 + $0x10] sm:$0xff] }
  0x46   :  { %4041 = vmatpush1.bf16.msra.mxu1 %v4040_v20  ;;  %4057 = vmatpush1.bf16.msra.mxu0 %v4056_v21  ;;  %8696 = vst [vmem:[#allocation17_spill] sm:$0xff] %v6769_v12  ;;  %v6771_v20 = vpack.c.bf16 %v717_v10, %v709_v9  ;;  %v6780_v21 = vpack.c.bf16 %v778_v14, %v770_v13  ;;  %v794_v24 = vld [vmem:[#allocation5 + $0x2c0] sm:$0xff]  ;;  %v803_v25 = vld [vmem:[#allocation5 + $0x308] sm:$0xff]  ;;  %v725_v52 = vld [vmem:[#allocation5 + $0x98] sm:$0xff] }
  0x47   :  { %367 = vmatprep.mubr.f32.mxu1 %v8401_v0  ;;  %480 = vmatprep.mubr.f32.mxu0 %v8401_v0  ;;  %v6783_v22 = vpack.c.bf16 %v795_v17, %v787_v16  ;;  %v6793_v28 = vpack.c.bf16 %v794_v24, %v786_v23  ;;  %v802_v30 = vld [vmem:[#allocation5 + $0x300] sm:$0xff]  ;;  %v827_v35 = vld [vmem:[#allocation5 + $0x3c8] sm:$0xff]  ;;  %v724_v62 = vld [vmem:[#allocation5 + $0x90] sm:$0xff] }
  0x48   :  { %4059 = vmatprep.subr.bf16.mxu1 %v4058_v26  ;;  %4075 = vmatprep.subr.bf16.mxu0 %v6723_v27  ;;  %8697 = vst [vmem:[#allocation18_spill] sm:$0xff] %v6771_v20  ;;  %8698 = vst [vmem:[#allocation19_spill] sm:$0xff] %v6780_v21  ;;  %v811_v26 = vld [vmem:[#allocation5 + $0x348] sm:$0xff]  ;;  %v810_v31 = vld [vmem:[#allocation5 + $0x340] sm:$0xff] }
  0x49   :  { %3902 = vmatmul.mubr.msk.f32.vlgmr.msra.gmra.mrb[8].mxu1 %vm165_vm0, %v6673_v40  ;;  %3910 = vmatmul.mubr.msk.f32.vlgmr.msra.gmra.mrb[8].mxu0 %vm165_vm0, %v6673_v40  ;;  %8699 = vst [vmem:[#allocation20_spill] sm:$0xff] %v6783_v22  ;;  %8700 = vst [vmem:[#allocation21_spill] sm:$0xff] %v6793_v28  ;;  %v6796_v29 = vpack.c.bf16 %v811_v26, %v803_v25  ;;  %v6805_v36 = vpack.c.bf16 %v810_v31, %v802_v30  ;;  %v826_v41 = vld [vmem:[#allocation5 + $0x3c0] sm:$0xff]  ;;  %v835_v42 = vld [vmem:[#allocation5 + $0x408] sm:$0xff] }
  0x4a   :  { %4061 = vmatpush1.bf16.msra.mxu1 %v4060_v32  ;;  %4077 = vmatpush1.bf16.msra.mxu0 %v6729_v33  ;;  %v819_v32 = vld [vmem:[#allocation5 + $0x388] sm:$0xff]  ;;  %v834_v50 = vld [vmem:[#allocation5 + $0x400] sm:$0xff]  ;;  %v732_v63 = vld [vmem:[#allocation5 + $0xd0] sm:$0xff] }
  0x4b   :  { %373 = vmatprep.mubr.f32.mxu1 %v8401_v0  ;;  %4079 = vmatprep.subr.bf16.mxu0 %v6733_v34  ;;  %8701 = vst [vmem:[#allocation22_spill] sm:$0xff] %v6796_v29  ;;  %8702 = vst [vmem:[#allocation23_spill] sm:$0xff] %v6805_v36  ;;  %v6808_v37 = vpack.c.bf16 %v827_v35, %v819_v32  ;;  %v843_v43 = vld [vmem:[#allocation5 + $0x448] sm:$0xff]  ;;  %v842_v51 = vld [vmem:[#allocation5 + $0x440] sm:$0xff]  ;;  %v6843_v13 = vpack.c.bf16 %v732_v63, %v724_v62 }
  0x4c   :  { %4063 = vmatprep.subr.bf16.mxu1 %v4062_v38  ;;  %486 = vmatprep.mubr.f32.mxu0 %v8401_v0  ;;  %v818_v38 = vld [vmem:[#allocation5 + $0x380] sm:$0xff]  ;;  %v6820_v49 = vpack.c.bf16 %v843_v43, %v835_v42  ;;  %v851_v56 = vld [vmem:[#allocation5 + $0x488] sm:$0xff]  ;;  %v6831_v59 = vpack.c.bf16 %v842_v51, %v834_v50  ;;  %v741_v7 = vld [vmem:[#allocation5 + $0x118] sm:$0xff] }
  0x4d   :  { %3903 = vmatmul.mubr.msk.f32.gmra.mrb[10].mxu1 %vm165_vm0, %v6687_v54  ;;  %3911 = vmatmul.mubr.msk.f32.gmra.mrb[10].mxu0 %vm165_vm0, %v6687_v54  ;;  %8703 = vst [vmem:[#allocation24_spill] sm:$0xff] %v6808_v37  ;;  %v6817_v44 = vpack.c.bf16 %v826_v41, %v818_v38  ;;  %v859_v57 = vld [vmem:[#allocation5 + $0x4c8] sm:$0xff]  ;;  %v850_v3 = vld [vmem:[#allocation5 + $0x480] sm:$0xff]  ;;  %v749_v8 = vld [vmem:[#allocation5 + $0x158] sm:$0xff] }
  0x4e   :  { %4081 = vmatpush1.bf16.msra.mxu0 %v6741_v46  ;;  %379 = vmatprep.mubr.f32.mxu1 %v8401_v0  ;;  %8705 = vst [vmem:[#allocation26_spill] sm:$0xff] %v6820_v49  ;;  %8707 = vst [vmem:[#allocation28_spill] sm:$0xff] %v6831_v59  ;;  %v867_v9 = vld [vmem:[#allocation5 + $0x508] sm:$0xff]  ;;  %v748_v16 = vld [vmem:[#allocation5 + $0x150] sm:$0xff]  ;;  %v6849_v17 = vpack.c.bf16 %v749_v8, %v741_v7 }
  0x4f   :  { %4083 = vmatprep.subr.bf16.mxu0 %v6745_v47  ;;  %4065 = vmatpush1.bf16.msra.mxu1 %v4064_v48  ;;  %8704 = vst [vmem:[#allocation25_spill] sm:$0xff] %v6817_v44  ;;  %v716_v48 = vld [vmem:[#allocation5 + $0x50] sm:$0xff]  ;;  %v875_v10 = vld [vmem:[#allocation5 + $0x548] sm:$0xff]  ;;  %8710 = vst [vmem:[#allocation31_spill] sm:$0xff] %v6843_v13 }
  0x50   :  { %4067 = vmatprep.subr.bf16.mxu1 %v4066_v55  ;;  %492 = vmatprep.mubr.f32.mxu0 %v8401_v0  ;;  %v733_v55 = vld [vmem:[#allocation5 + $0xd8] sm:$0xff]  ;;  %v6829_v58 = vpack.c.bf16 %v716_v48, %v708_v45  ;;  %8712 = vst [vmem:[#allocation33_spill] sm:$0xff] %v6849_v17  ;;  %v6851_v23 = vpack.c.bf16 %v875_v10, %v867_v9  ;;  %v866_v24 = vld [vmem:[#allocation5 + $0x500] sm:$0xff]  ;;  %v883_v30 = vld [vmem:[#allocation5 + $0x588] sm:$0xff] }
  0x51   :  { %3904 = vmatmul.mubr.msk.f32.gmra.mrb[12].mxu1 %vm165_vm0, %v6703_v5  ;;  %3912 = vmatmul.mubr.msk.f32.gmra.mrb[12].mxu0 %vm165_vm0, %v6703_v5  ;;  %v6834_v1 = vpack.c.bf16 %v733_v55, %v725_v52  ;;  %v757_v25 = vld [vmem:[#allocation5 + $0x198] sm:$0xff]  ;;  %v891_v31 = vld [vmem:[#allocation5 + $0x5c8] sm:$0xff]  ;;  %v756_v38 = vld [vmem:[#allocation5 + $0x190] sm:$0xff] }
  0x52   :  { %4085 = vmatpush1.bf16.msra.mxu0 %v6754_v60  ;;  %385 = vmatprep.mubr.f32.mxu1 %v8401_v0  ;;  %8706 = vst [vmem:[#allocation27_spill] sm:$0xff] %v6829_v58  ;;  %8713 = vst [vmem:[#allocation34_spill] sm:$0xff] %v6851_v23  ;;  %v765_v26 = vld [vmem:[#allocation5 + $0x1d8] sm:$0xff]  ;;  %v764_v41 = vld [vmem:[#allocation5 + $0x1d0] sm:$0xff]  ;;  %v6866_v43 = vpack.c.bf16 %v891_v31, %v883_v30 }
  0x53   :  { %4087 = vmatprep.subr.bf16.mxu0 %v6757_v61  ;;  %4069 = vmatpush1.bf16.msra.mxu1 %v4068_v2  ;;  %8708 = vst [vmem:[#allocation29_spill] sm:$0xff] %v6834_v1  ;;  %v6836_v2 = vpack.c.bf16 %v859_v57, %v851_v56  ;;  %v6864_v42 = vpack.c.bf16 %v765_v26, %v757_v25  ;;  %v882_v45 = vld [vmem:[#allocation5 + $0x580] sm:$0xff]  ;;  %v773_v48 = vld [vmem:[#allocation5 + $0x218] sm:$0xff]  ;;  %v899_v51 = vld [vmem:[#allocation5 + $0x608] sm:$0xff] }
  0x54   :  { %4071 = vmatprep.subr.bf16.mxu1 %v4070_v6  ;;  %498 = vmatprep.mubr.f32.mxu0 %v8401_v0  ;;  %v858_v6 = vld [vmem:[#allocation5 + $0x4c0] sm:$0xff]  ;;  %8717 = vst [vmem:[#allocation38_spill] sm:$0xff] %v6866_v43  ;;  %v781_v50 = vld [vmem:[#allocation5 + $0x258] sm:$0xff]  ;;  %v907_v52 = vld [vmem:[#allocation5 + $0x648] sm:$0xff]  ;;  %v6873_v55 = vpack.c.bf16 %v764_v41, %v756_v38 }
  0x55   :  { %3905 = vmatmul.mubr.msk.f32.gmra.mrb[14].mxu1 %vm165_vm0, %v6719_v19  ;;  %3913 = vmatmul.mubr.msk.f32.gmra.mrb[14].mxu0 %vm165_vm0, %v6719_v19  ;;  %8709 = vst [vmem:[#allocation30_spill] sm:$0xff] %v6836_v2  ;;  %v6845_v14 = vpack.c.bf16 %v858_v6, %v850_v3  ;;  %8716 = vst [vmem:[#allocation37_spill] sm:$0xff] %v6864_v42  ;;  %v772_v57 = vld [vmem:[#allocation5 + $0x210] sm:$0xff]  ;;  %v6879_v63 = vpack.c.bf16 %v781_v50, %v773_v48  ;;  %v898_v6 = vld [vmem:[#allocation5 + $0x600] sm:$0xff] }
  0x56   :  { %4089 = vmatpush1.bf16.msra.mxu0 %v6766_v11  ;;  %391 = vmatprep.mubr.f32.mxu1 %v8401_v0  ;;  %8718 = vst [vmem:[#allocation39_spill] sm:$0xff] %v6873_v55  ;;  %v780_v62 = vld [vmem:[#allocation5 + $0x250] sm:$0xff]  ;;  %v6881_v3 = vpack.c.bf16 %v907_v52, %v899_v51  ;;  %v789_v7 = vld [vmem:[#allocation5 + $0x298] sm:$0xff]  ;;  %v915_v9 = vld [vmem:[#allocation5 + $0x688] sm:$0xff] }
  0x57   :  { %4091 = vmatprep.subr.bf16.mxu0 %v6769_v12  ;;  %4073 = vmatpush1.bf16.msra.mxu1 %v4072_v15  ;;  %8711 = vst [vmem:[#allocation32_spill] sm:$0xff] %v6845_v14  ;;  %v740_v15 = vld [vmem:[#allocation5 + $0x110] sm:$0xff]  ;;  %8720 = vst [vmem:[#allocation41_spill] sm:$0xff] %v6879_v63  ;;  %v797_v8 = vld [vmem:[#allocation5 + $0x2d8] sm:$0xff] }
  0x58   :  { %4139 = vmatprep.subr.bf16.mxu1 %v6771_v20  ;;  %504 = vmatprep.mubr.f32.mxu0 %v8401_v0  ;;  %v6858_v32 = vpack.c.bf16 %v748_v16, %v740_v15  ;;  %8721 = vst [vmem:[#allocation42_spill] sm:$0xff] %v6881_v3  ;;  %v923_v10 = vld [vmem:[#allocation5 + $0x6c8] sm:$0xff]  ;;  %v6888_v15 = vpack.c.bf16 %v780_v62, %v772_v57  ;;  %v914_v30 = vld [vmem:[#allocation5 + $0x680] sm:$0xff]  ;;  %v805_v31 = vld [vmem:[#allocation5 + $0x318] sm:$0xff] }
  0x59   :  { %3906 = vmatmul.mubr.msk.f32.gmra.mrb[16].mxu1 %vm165_vm0, %v6668_v39  ;;  %3914 = vmatmul.mubr.msk.f32.gmra.mrb[16].mxu0 %vm165_vm0, %v6668_v39  ;;  %v6894_v25 = vpack.c.bf16 %v797_v8, %v789_v7  ;;  %v6896_v26 = vpack.c.bf16 %v923_v10, %v915_v9  ;;  %v813_v38 = vld [vmem:[#allocation5 + $0x358] sm:$0xff]  ;;  %v931_v41 = vld [vmem:[#allocation5 + $0x708] sm:$0xff]  ;;  %v804_v50 = vld [vmem:[#allocation5 + $0x310] sm:$0xff] }
  0x5a   :  { %4093 = vmatpush1.bf16.msra.mxu0 %v6780_v21  ;;  %397 = vmatprep.mubr.f32.mxu1 %v8401_v0  ;;  %8714 = vst [vmem:[#allocation35_spill] sm:$0xff] %v6858_v32  ;;  %8722 = vst [vmem:[#allocation43_spill] sm:$0xff] %v6888_v15  ;;  %v812_v51 = vld [vmem:[#allocation5 + $0x350] sm:$0xff]  ;;  %v6909_v52 = vpack.c.bf16 %v813_v38, %v805_v31  ;;  %v930_v62 = vld [vmem:[#allocation5 + $0x700] sm:$0xff] }
  0x5b   :  { %4095 = vmatprep.subr.bf16.mxu0 %v6783_v22  ;;  %510 = vmatprep.mubr.f32.mxu0 %v8401_v0  ;;  %8724 = vst [vmem:[#allocation45_spill] sm:$0xff] %v6894_v25  ;;  %8725 = vst [vmem:[#allocation46_spill] sm:$0xff] %v6896_v26  ;;  %v947_v7 = vld [vmem:[#allocation5 + $0x788] sm:$0xff]  ;;  %v6918_v9 = vpack.c.bf16 %v812_v51, %v804_v50  ;;  %v946_v31 = vld [vmem:[#allocation5 + $0x780] sm:$0xff]  ;;  %v8734_v50 = vmov 0.0  }
  0x5c   :  { %8728 = vst [vmem:[#allocation49_spill] sm:$0xff] %v6909_v52  ;;  %v955_v8 = vld [vmem:[#allocation5 + $0x7c8] sm:$0xff]  ;;  %v837_v38 = vld [vmem:[#allocation5 + $0x418] sm:$0xff] }
  0x5d   :  { %3907 = vmatmul.mubr.msk.f32.gmra.mrb[18].mxu1 %vm165_vm0, %v6682_v53  ;;  %3915 = vmatmul.mubr.msk.f32.gmra.mrb[18].mxu0 %vm165_vm0, %v6682_v53  ;;  %8730 = vst [vmem:[#allocation51_spill] sm:$0xff] %v6918_v9 }
  0x5e   :  { %4097 = vmatpush1.bf16.msra.mxu0 %v6793_v28  ;;  %403 = vmatprep.mubr.f32.mxu1 %v8401_v0 }
  0x5f   :  { %4099 = vmatprep.subr.bf16.mxu0 %v6796_v29  ;;  %516 = vmatprep.mubr.f32.mxu0 %v8401_v0 }
  0x61   :  { %3908 = vmatmul.mubr.msk.f32.gmra.mrb[20].mxu1 %vm165_vm0, %v6698_v4  ;;  %3916 = vmatmul.mubr.msk.f32.gmra.mrb[20].mxu0 %vm165_vm0, %v6698_v4 }
  0x62   :  { %4101 = vmatpush1.bf16.msra.mxu0 %v6805_v36  ;;  %409 = vmatprep.mubr.f32.mxu1 %v8401_v0 }
  0x63   :  { %4103 = vmatprep.subr.bf16.mxu0 %v6808_v37  ;;  %522 = vmatprep.mubr.f32.mxu0 %v8401_v0 }
  0x65   :  { %3909 = vmatmul.mubr.msk.f32.gmra.mrb[22].mxu1 %vm165_vm0, %v6714_v18  ;;  %3917 = vmatmul.mubr.msk.f32.gmra.mrb[22].mxu0 %vm165_vm0, %v6714_v18 }
  0x66   :  { %4105 = vmatpush1.bf16.msra.mxu0 %v6817_v44  ;;  %593 = vmatprep.mubr.f32.mxu1 %v8401_v0 }
  0x67   :  { %4107 = vmatprep.subr.bf16.mxu0 %v6820_v49  ;;  %1037 = vmatprep.mubr.f32.mxu0 %v8401_v0 }
  0x69   :  { %3918 = vmatmul.mubr.msk.f32.vlgmr.msra.gmra.mrb[24].mxu1 %vm165_vm0, %v6673_v40  ;;  %v874_v40 = vld [vmem:[#allocation5 + $0x540] sm:$0xff] }
  0x6a   :  { %4141 = vmatpush1.bf16.msra.mxu1 %v6829_v58  ;;  %4109 = vmatpush1.bf16.msra.mxu0 %v6831_v59  ;;  %v6860_v35 = vpack.c.bf16 %v874_v40, %v866_v24  ;;  %v788_v24 = vld [vmem:[#allocation5 + $0x290] sm:$0xff] }
  0x6b   :  { %4143 = vmatprep.subr.bf16.mxu1 %v6834_v1  ;;  %4111 = vmatprep.subr.bf16.mxu0 %v6836_v2  ;;  %v796_v40 = vld [vmem:[#allocation5 + $0x2d0] sm:$0xff] }
  0x6c   :  { %599 = vmatprep.mubr.f32.mxu1 %v8401_v0  ;;  %8715 = vst [vmem:[#allocation36_spill] sm:$0xff] %v6860_v35 }
  0x6d   :  { %3919 = vmatmul.mubr.msk.f32.gmra.mrb[26].mxu1 %vm165_vm0, %v6687_v54  ;;  %v890_v54 = vld [vmem:[#allocation5 + $0x5c0] sm:$0xff] }
  0x6e   :  { %4145 = vmatpush1.bf16.msra.mxu1 %v6843_v13  ;;  %4113 = vmatpush1.bf16.msra.mxu0 %v6845_v14  ;;  %v6875_v56 = vpack.c.bf16 %v890_v54, %v882_v45  ;;  %v939_v45 = vld [vmem:[#allocation5 + $0x748] sm:$0xff]  ;;  %v6903_v54 = vpack.c.bf16 %v796_v40, %v788_v24  ;;  %v820_v24 = vld [vmem:[#allocation5 + $0x390] sm:$0xff] }
  0x6f   :  { %4147 = vmatprep.subr.bf16.mxu1 %v6849_v17  ;;  %4115 = vmatprep.subr.bf16.mxu0 %v6851_v23  ;;  %v6911_v57 = vpack.c.bf16 %v939_v45, %v931_v41  ;;  %v828_v40 = vld [vmem:[#allocation5 + $0x3d0] sm:$0xff]  ;;  %v845_v41 = vld [vmem:[#allocation5 + $0x458] sm:$0xff]  ;;  %v711_v45 = vld [vmem:[#allocation5 + $0x28] sm:$0xff] }
  0x70   :  { %605 = vmatprep.mubr.f32.mxu1 %v8401_v0  ;;  %8719 = vst [vmem:[#allocation40_spill] sm:$0xff] %v6875_v56  ;;  %8726 = vst [vmem:[#allocation47_spill] sm:$0xff] %v6903_v54  ;;  %v6933_v51 = vpack.c.bf16 %v828_v40, %v820_v24 }
  0x71   :  { %3920 = vmatmul.mubr.msk.f32.gmra.mrb[28].mxu1 %vm165_vm0, %v6703_v5  ;;  %v906_v5 = vld [vmem:[#allocation5 + $0x640] sm:$0xff]  ;;  %8729 = vst [vmem:[#allocation50_spill] sm:$0xff] %v6911_v57 }
  0x72   :  { %4149 = vmatpush1.bf16.msra.mxu1 %v6858_v32  ;;  %4117 = vmatpush1.bf16.msra.mxu0 %v6860_v35  ;;  %v6890_v16 = vpack.c.bf16 %v906_v5, %v898_v6  ;;  %v821_v6 = vld [vmem:[#allocation5 + $0x398] sm:$0xff]  ;;  %8735 = vst [vmem:[#allocation55_spill] sm:$0xff] %v6933_v51 }
  0x73   :  { %4151 = vmatprep.subr.bf16.mxu1 %v6864_v42  ;;  %4119 = vmatprep.subr.bf16.mxu0 %v6866_v43  ;;  %v829_v5 = vld [vmem:[#allocation5 + $0x3d8] sm:$0xff] }
  0x74   :  { %611 = vmatprep.mubr.f32.mxu1 %v8401_v0  ;;  %8723 = vst [vmem:[#allocation44_spill] sm:$0xff] %v6890_v16 }
  0x75   :  { %3921 = vmatmul.mubr.msk.f32.gmra.mrb[30].mxu1 %vm165_vm0, %v6719_v19  ;;  %v922_v19 = vld [vmem:[#allocation5 + $0x6c0] sm:$0xff] }
  0x76   :  { %4153 = vmatpush1.bf16.msra.mxu1 %v6873_v55  ;;  %4121 = vmatpush1.bf16.msra.mxu0 %v6875_v56  ;;  %v6905_v48 = vpack.c.bf16 %v922_v19, %v914_v30  ;;  %v6924_v30 = vpack.c.bf16 %v829_v5, %v821_v6  ;;  %v6926_v19 = vpack.c.bf16 %v955_v8, %v947_v7  ;;  %v844_v6 = vld [vmem:[#allocation5 + $0x450] sm:$0xff]  ;;  %v710_v8 = vld [vmem:[#allocation5 + $0x20] sm:$0xff] }
  0x77   :  { %4155 = vmatprep.subr.bf16.mxu1 %v6879_v63  ;;  %4123 = vmatprep.subr.bf16.mxu0 %v6881_v3  ;;  %v6939_v5 = vpack.c.bf16 %v845_v41, %v837_v38  ;;  %v726_v41 = vld [vmem:[#allocation5 + $0xa0] sm:$0xff] }
  0x78   :  { %617 = vmatprep.mubr.f32.mxu1 %v8401_v0  ;;  %8727 = vst [vmem:[#allocation48_spill] sm:$0xff] %v6905_v48  ;;  %8732 = vst [vmem:[#allocation53_spill] sm:$0xff] %v6924_v30 }
  0x79   :  { %3922 = vmatmul.mubr.msk.f32.gmra.mrb[32].mxu1 %vm165_vm0, %v6668_v39  ;;  %v938_v39 = vld [vmem:[#allocation5 + $0x740] sm:$0xff]  ;;  %8733 = vst [vmem:[#allocation54_spill] sm:$0xff] %v6926_v19  ;;  %8737 = vst [vmem:[#allocation57_spill] sm:$0xff] %v6939_v5 }
  0x7a   :  { %4157 = vmatpush1.bf16.msra.mxu1 %v6888_v15  ;;  %4125 = vmatpush1.bf16.msra.mxu0 %v6890_v16  ;;  %v6920_v10 = vpack.c.bf16 %v938_v39, %v930_v62  ;;  %v836_v39 = vld [vmem:[#allocation5 + $0x410] sm:$0xff] }
  0x7b   :  { %4159 = vmatprep.subr.bf16.mxu1 %v6894_v25  ;;  %4127 = vmatprep.subr.bf16.mxu0 %v6896_v26  ;;  %v6948_v24 = vpack.c.bf16 %v844_v6, %v836_v39 }
  0x7c   :  { %623 = vmatprep.mubr.f32.mxu1 %v8401_v0  ;;  %8731 = vst [vmem:[#allocation52_spill] sm:$0xff] %v6920_v10  ;;  %v719_v0 = vld [vmem:[#allocation5 + $0x68] sm:$0xff] }
  0x7d   :  { %3923 = vmatmul.mubr.msk.f32.gmra.mrb[34].mxu1 %vm165_vm0, %v6682_v53  ;;  %v954_v53 = vld [vmem:[#allocation5 + $0x7c0] sm:$0xff]  ;;  %v6941_v7 = vpack.c.bf16 %v719_v0, %v711_v45  ;;  %8739 = vst [vmem:[#allocation59_spill] sm:$0xff] %v6948_v24  ;;  %v852_v0 = vld [vmem:[#allocation5 + $0x490] sm:$0xff]  ;;  %v869_v45 = vld [vmem:[#allocation5 + $0x518] sm:$0xff] }
  0x7e   :  { %4161 = vmatpush1.bf16.msra.mxu1 %v6903_v54  ;;  %4129 = vmatpush1.bf16.msra.mxu0 %v6905_v48  ;;  %v6935_v62 = vpack.c.bf16 %v954_v53, %v946_v31  ;;  %v860_v31 = vld [vmem:[#allocation5 + $0x4d0] sm:$0xff] }
  0x7f   :  { %4163 = vmatprep.subr.bf16.mxu1 %v6909_v52  ;;  %4131 = vmatprep.subr.bf16.mxu0 %v6911_v57  ;;  %8738 = vst [vmem:[#allocation58_spill] sm:$0xff] %v6941_v7  ;;  %v853_v57 = vld [vmem:[#allocation5 + $0x498] sm:$0xff]  ;;  %v727_v52 = vld [vmem:[#allocation5 + $0xa8] sm:$0xff]  ;;  %v6962_v39 = vpack.c.bf16 %v860_v31, %v852_v0 }
  0x80   :  { %629 = vmatprep.mubr.f32.mxu1 %v8734_v50  ;;  %8736 = vst [vmem:[#allocation56_spill] sm:$0xff] %v6935_v62 }
  0x81   :  { %3924 = vmatmul.mubr.msk.f32.gmra.mrb[36].mxu1 %vm165_vm0, %v6698_v4  ;;  %v718_v4 = vld [vmem:[#allocation5 + $0x60] sm:$0xff]  ;;  %8743 = vst [vmem:[#allocation63_spill] sm:$0xff] %v6962_v39 }
  0x82   :  { %4165 = vmatpush1.bf16.msra.mxu1 %v6918_v9  ;;  %4133 = vmatpush1.bf16.msra.mxu0 %v6920_v10  ;;  %v861_v9 = vld [vmem:[#allocation5 + $0x4d8] sm:$0xff]  ;;  %v735_v10 = vld [vmem:[#allocation5 + $0xe8] sm:$0xff]  ;;  %v6950_v40 = vpack.c.bf16 %v718_v4, %v710_v8  ;;  %v742_v8 = vld [vmem:[#allocation5 + $0x120] sm:$0xff] }
  0x83   :  { %4167 = vmatprep.subr.bf16.mxu1 %v6924_v30  ;;  %4135 = vmatprep.subr.bf16.mxu0 %v6926_v19  ;;  %v6954_v53 = vpack.c.bf16 %v861_v9, %v853_v57  ;;  %v6956_v38 = vpack.c.bf16 %v735_v10, %v727_v52  ;;  %v743_v19 = vld [vmem:[#allocation5 + $0x128] sm:$0xff]  ;;  %v868_v52 = vld [vmem:[#allocation5 + $0x510] sm:$0xff]  ;;  %v750_v4 = vld [vmem:[#allocation5 + $0x160] sm:$0xff] }
  0x84   :  { %635 = vmatprep.mubr.f32.mxu1 %v8734_v50  ;;  %8740 = vst [vmem:[#allocation60_spill] sm:$0xff] %v6950_v40  ;;  %v876_v9 = vld [vmem:[#allocation5 + $0x550] sm:$0xff]  ;;  %v6977_v31 = vpack.c.bf16 %v750_v4, %v742_v8 }
  0x85   :  { %3925 = vmatmul.mubr.msk.f32.gmra.mrb[38].mxu1 %vm165_vm0, %v6714_v18  ;;  %8741 = vst [vmem:[#allocation61_spill] sm:$0xff] %v6954_v53  ;;  %8742 = vst [vmem:[#allocation62_spill] sm:$0xff] %v6956_v38  ;;  %v734_v18 = vld [vmem:[#allocation5 + $0xe0] sm:$0xff]  ;;  %v6975_v0 = vpack.c.bf16 %v876_v9, %v868_v52  ;;  %v900_v8 = vld [vmem:[#allocation5 + $0x610] sm:$0xff] }
  0x86   :  { %4169 = vmatpush1.bf16.msra.mxu1 %v6933_v51  ;;  %4137 = vmatpush1.bf16.msra.mxu0 %v6935_v62  ;;  %v877_v51 = vld [vmem:[#allocation5 + $0x558] sm:$0xff]  ;;  %v751_v62 = vld [vmem:[#allocation5 + $0x168] sm:$0xff]  ;;  %v6964_v57 = vpack.c.bf16 %v734_v18, %v726_v41  ;;  %8748 = vst [vmem:[#allocation68_spill] sm:$0xff] %v6977_v31  ;;  %v892_v41 = vld [vmem:[#allocation5 + $0x5d0] sm:$0xff] }
  0x87   :  { %4171 = vmatprep.subr.bf16.mxu1 %v6939_v5  ;;  %4203 = vmatprep.subr.bf16.mxu0 %v6941_v7  ;;  %v6968_v10 = vpack.c.bf16 %v877_v51, %v869_v45  ;;  %v6970_v6 = vpack.c.bf16 %v751_v62, %v743_v19  ;;  %v885_v7 = vld [vmem:[#allocation5 + $0x598] sm:$0xff]  ;;  %v759_v5 = vld [vmem:[#allocation5 + $0x1a8] sm:$0xff]  ;;  %8747 = vst [vmem:[#allocation67_spill] sm:$0xff] %v6975_v0  ;;  %v884_v51 = vld [vmem:[#allocation5 + $0x590] sm:$0xff] }
  0x88   :  { %1108 = vmatprep.mubr.f32.mxu1 %v8734_v50  ;;  %8744 = vst [vmem:[#allocation64_spill] sm:$0xff] %v6964_v57  ;;  %v758_v18 = vld [vmem:[#allocation5 + $0x1a0] sm:$0xff]  ;;  %v6987_v52 = vpack.c.bf16 %v892_v41, %v884_v51  ;;  %v908_v4 = vld [vmem:[#allocation5 + $0x650] sm:$0xff] }
  0x89   :  { %1038 = vmatmul.mubr.f32.vlgmr.msra.gmra.mrb[0].mxu0 %v8734_v50  ;;  %8745 = vst [vmem:[#allocation65_spill] sm:$0xff] %v6968_v10  ;;  %8746 = vst [vmem:[#allocation66_spill] sm:$0xff] %v6970_v6  ;;  %v766_v45 = vld [vmem:[#allocation5 + $0x1e0] sm:$0xff]  ;;  %v6999_v51 = vpack.c.bf16 %v908_v4, %v900_v8 }
  0x8a   :  { %4173 = vmatpush1.bf16.msra.mxu1 %v6948_v24  ;;  %4205 = vmatpush1.bf16.msra.mxu0 %v6950_v40  ;;  %v893_v24 = vld [vmem:[#allocation5 + $0x5d8] sm:$0xff]  ;;  %v767_v40 = vld [vmem:[#allocation5 + $0x1e8] sm:$0xff]  ;;  %8751 = vst [vmem:[#allocation71_spill] sm:$0xff] %v6987_v52  ;;  %v6989_v9 = vpack.c.bf16 %v766_v45, %v758_v18  ;;  %v916_v18 = vld [vmem:[#allocation5 + $0x690] sm:$0xff] }
  0x8b   :  { %4175 = vmatprep.subr.bf16.mxu1 %v6954_v53  ;;  %4207 = vmatprep.subr.bf16.mxu0 %v6956_v38  ;;  %v6981_v19 = vpack.c.bf16 %v893_v24, %v885_v7  ;;  %v6983_v62 = vpack.c.bf16 %v767_v40, %v759_v5  ;;  %v901_v38 = vld [vmem:[#allocation5 + $0x618] sm:$0xff]  ;;  %v775_v53 = vld [vmem:[#allocation5 + $0x228] sm:$0xff]  ;;  %v774_v24 = vld [vmem:[#allocation5 + $0x220] sm:$0xff]  ;;  %8755 = vst [vmem:[#allocation75_spill] sm:$0xff] %v6999_v51 }
  0x8c   :  { %1179 = vmatprep.mubr.f32.mxu0 %v8734_v50  ;;  %8752 = vst [vmem:[#allocation72_spill] sm:$0xff] %v6989_v9  ;;  %v782_v40 = vld [vmem:[#allocation5 + $0x260] sm:$0xff]  ;;  %v924_v45 = vld [vmem:[#allocation5 + $0x6d0] sm:$0xff] }
  0x8d   :  { %8749 = vst [vmem:[#allocation69_spill] sm:$0xff] %v6981_v19  ;;  %8750 = vst [vmem:[#allocation70_spill] sm:$0xff] %v6983_v62  ;;  %v7001_v41 = vpack.c.bf16 %v782_v40, %v774_v24  ;;  %v7011_v8 = vpack.c.bf16 %v924_v45, %v916_v18  ;;  %v932_v24 = vld [vmem:[#allocation5 + $0x710] sm:$0xff] }
  0x8e   :  { %4177 = vmatpush1.bf16.msra.mxu1 %v6962_v39  ;;  %4209 = vmatpush1.bf16.msra.mxu0 %v6964_v57  ;;  %v909_v39 = vld [vmem:[#allocation5 + $0x658] sm:$0xff]  ;;  %v783_v57 = vld [vmem:[#allocation5 + $0x268] sm:$0xff]  ;;  %v940_v40 = vld [vmem:[#allocation5 + $0x750] sm:$0xff] }
  0x8f   :  { %4179 = vmatprep.subr.bf16.mxu1 %v6968_v10  ;;  %4211 = vmatprep.subr.bf16.mxu0 %v6970_v6  ;;  %v6993_v5 = vpack.c.bf16 %v909_v39, %v901_v38  ;;  %v6995_v7 = vpack.c.bf16 %v783_v57, %v775_v53  ;;  %v917_v6 = vld [vmem:[#allocation5 + $0x698] sm:$0xff]  ;;  %v791_v10 = vld [vmem:[#allocation5 + $0x2a8] sm:$0xff]  ;;  %8756 = vst [vmem:[#allocation76_spill] sm:$0xff] %v7001_v41  ;;  %v790_v39 = vld [vmem:[#allocation5 + $0x2a0] sm:$0xff] }
  0x90   :  { %v798_v57 = vld [vmem:[#allocation5 + $0x2e0] sm:$0xff]  ;;  %8759 = vst [vmem:[#allocation79_spill] sm:$0xff] %v7011_v8  ;;  %v7023_v18 = vpack.c.bf16 %v940_v40, %v932_v24 }
  0x91   :  { %8753 = vst [vmem:[#allocation73_spill] sm:$0xff] %v6993_v5  ;;  %8754 = vst [vmem:[#allocation74_spill] sm:$0xff] %v6995_v7  ;;  %v7013_v4 = vpack.c.bf16 %v798_v57, %v790_v39  ;;  %v948_v39 = vld [vmem:[#allocation5 + $0x790] sm:$0xff] }
  0x92   :  { %4181 = vmatpush1.bf16.msra.mxu1 %v6975_v0  ;;  %4213 = vmatpush1.bf16.msra.mxu0 %v6977_v31  ;;  %v925_v0 = vld [vmem:[#allocation5 + $0x6d8] sm:$0xff]  ;;  %v799_v31 = vld [vmem:[#allocation5 + $0x2e8] sm:$0xff]  ;;  %8763 = vst [vmem:[#allocation83_spill] sm:$0xff] %v7023_v18  ;;  %v956_v57 = vld [vmem:[#allocation5 + $0x7d0] sm:$0xff] }
  0x93   :  { %4183 = vmatprep.subr.bf16.mxu1 %v6981_v19  ;;  %4215 = vmatprep.subr.bf16.mxu0 %v6983_v62  ;;  %v7005_v53 = vpack.c.bf16 %v925_v0, %v917_v6  ;;  %v7007_v38 = vpack.c.bf16 %v799_v31, %v791_v10  ;;  %v933_v62 = vld [vmem:[#allocation5 + $0x718] sm:$0xff]  ;;  %v807_v19 = vld [vmem:[#allocation5 + $0x328] sm:$0xff]  ;;  %8760 = vst [vmem:[#allocation80_spill] sm:$0xff] %v7013_v4  ;;  %v806_v0 = vld [vmem:[#allocation5 + $0x320] sm:$0xff] }
  0x94   :  { %v814_v31 = vld [vmem:[#allocation5 + $0x360] sm:$0xff]  ;;  %v7035_v24 = vpack.c.bf16 %v956_v57, %v948_v39 }
  0x95   :  { %8757 = vst [vmem:[#allocation77_spill] sm:$0xff] %v7005_v53  ;;  %8758 = vst [vmem:[#allocation78_spill] sm:$0xff] %v7007_v38  ;;  %v7025_v45 = vpack.c.bf16 %v814_v31, %v806_v0  ;;  %v712_v0 = vld [vmem:[#allocation5 + $0x30] sm:$0xff] }
  0x96   :  { %4185 = vmatpush1.bf16.msra.mxu1 %v6987_v52  ;;  %4217 = vmatpush1.bf16.msra.mxu0 %v6989_v9  ;;  %v941_v52 = vld [vmem:[#allocation5 + $0x758] sm:$0xff]  ;;  %v815_v9 = vld [vmem:[#allocation5 + $0x368] sm:$0xff]  ;;  %8767 = vst [vmem:[#allocation87_spill] sm:$0xff] %v7035_v24  ;;  %v720_v31 = vld [vmem:[#allocation5 + $0x70] sm:$0xff] }
  0x97   :  { %4187 = vmatprep.subr.bf16.mxu1 %v6993_v5  ;;  %4219 = vmatprep.subr.bf16.mxu0 %v6995_v7  ;;  %v7017_v10 = vpack.c.bf16 %v941_v52, %v933_v62  ;;  %v7019_v6 = vpack.c.bf16 %v815_v9, %v807_v19  ;;  %v949_v7 = vld [vmem:[#allocation5 + $0x798] sm:$0xff]  ;;  %v823_v5 = vld [vmem:[#allocation5 + $0x3a8] sm:$0xff]  ;;  %8764 = vst [vmem:[#allocation84_spill] sm:$0xff] %v7025_v45  ;;  %v822_v52 = vld [vmem:[#allocation5 + $0x3a0] sm:$0xff] }
  0x98   :  { %v830_v9 = vld [vmem:[#allocation5 + $0x3e0] sm:$0xff]  ;;  %v7047_v39 = vpack.c.bf16 %v720_v31, %v712_v0 }
  0x99   :  { %8761 = vst [vmem:[#allocation81_spill] sm:$0xff] %v7017_v10  ;;  %8762 = vst [vmem:[#allocation82_spill] sm:$0xff] %v7019_v6  ;;  %v7037_v40 = vpack.c.bf16 %v830_v9, %v822_v52  ;;  %v728_v52 = vld [vmem:[#allocation5 + $0xb0] sm:$0xff] }
  0x9a   :  { %4189 = vmatpush1.bf16.msra.mxu1 %v6999_v51  ;;  %4221 = vmatpush1.bf16.msra.mxu0 %v7001_v41  ;;  %v957_v51 = vld [vmem:[#allocation5 + $0x7d8] sm:$0xff]  ;;  %v831_v41 = vld [vmem:[#allocation5 + $0x3e8] sm:$0xff]  ;;  %8771 = vst [vmem:[#allocation91_spill] sm:$0xff] %v7047_v39  ;;  %v736_v9 = vld [vmem:[#allocation5 + $0xf0] sm:$0xff] }
  0x9b   :  { %4191 = vmatprep.subr.bf16.mxu1 %v7005_v53  ;;  %4223 = vmatprep.subr.bf16.mxu0 %v7007_v38  ;;  %v7029_v19 = vpack.c.bf16 %v957_v51, %v949_v7  ;;  %v7031_v62 = vpack.c.bf16 %v831_v41, %v823_v5  ;;  %v713_v38 = vld [vmem:[#allocation5 + $0x38] sm:$0xff]  ;;  %v839_v53 = vld [vmem:[#allocation5 + $0x428] sm:$0xff]  ;;  %8768 = vst [vmem:[#allocation88_spill] sm:$0xff] %v7037_v40  ;;  %v838_v51 = vld [vmem:[#allocation5 + $0x420] sm:$0xff] }
  0x9c   :  { %v846_v41 = vld [vmem:[#allocation5 + $0x460] sm:$0xff]  ;;  %v7060_v0 = vpack.c.bf16 %v736_v9, %v728_v52 }
  0x9d   :  { %8765 = vst [vmem:[#allocation85_spill] sm:$0xff] %v7029_v19  ;;  %8766 = vst [vmem:[#allocation86_spill] sm:$0xff] %v7031_v62  ;;  %v7049_v57 = vpack.c.bf16 %v846_v41, %v838_v51  ;;  %v870_v51 = vld [vmem:[#allocation5 + $0x520] sm:$0xff] }
  0x9e   :  { %4193 = vmatpush1.bf16.msra.mxu1 %v7011_v8  ;;  %4225 = vmatpush1.bf16.msra.mxu0 %v7013_v4  ;;  %v721_v8 = vld [vmem:[#allocation5 + $0x78] sm:$0xff]  ;;  %v847_v4 = vld [vmem:[#allocation5 + $0x468] sm:$0xff]  ;;  %8775 = vst [vmem:[#allocation95_spill] sm:$0xff] %v7060_v0  ;;  %v878_v41 = vld [vmem:[#allocation5 + $0x560] sm:$0xff] }
  0x9f   :  { %4195 = vmatprep.subr.bf16.mxu1 %v7017_v10  ;;  %4227 = vmatprep.subr.bf16.mxu0 %v7019_v6  ;;  %v7041_v5 = vpack.c.bf16 %v721_v8, %v713_v38  ;;  %v7043_v7 = vpack.c.bf16 %v847_v4, %v839_v53  ;;  %v729_v6 = vld [vmem:[#allocation5 + $0xb8] sm:$0xff]  ;;  %v855_v10 = vld [vmem:[#allocation5 + $0x4a8] sm:$0xff]  ;;  %8772 = vst [vmem:[#allocation92_spill] sm:$0xff] %v7049_v57  ;;  %v854_v8 = vld [vmem:[#allocation5 + $0x4a0] sm:$0xff] }
  0xa0   :  { %v862_v4 = vld [vmem:[#allocation5 + $0x4e0] sm:$0xff]  ;;  %v7075_v9 = vpack.c.bf16 %v878_v41, %v870_v51  ;;  %v776_v51 = vld [vmem:[#allocation5 + $0x230] sm:$0xff] }
  0xa1   :  { %8769 = vst [vmem:[#allocation89_spill] sm:$0xff] %v7041_v5  ;;  %8770 = vst [vmem:[#allocation90_spill] sm:$0xff] %v7043_v7  ;;  %v7062_v31 = vpack.c.bf16 %v862_v4, %v854_v8  ;;  %v886_v8 = vld [vmem:[#allocation5 + $0x5a0] sm:$0xff]  ;;  %v784_v41 = vld [vmem:[#allocation5 + $0x270] sm:$0xff] }
  0xa2   :  { %4197 = vmatpush1.bf16.msra.mxu1 %v7023_v18  ;;  %4229 = vmatpush1.bf16.msra.mxu0 %v7025_v45  ;;  %v737_v18 = vld [vmem:[#allocation5 + $0xf8] sm:$0xff]  ;;  %v863_v45 = vld [vmem:[#allocation5 + $0x4e8] sm:$0xff]  ;;  %8780 = vst [vmem:[#allocation100_spill] sm:$0xff] %v7075_v9  ;;  %v894_v4 = vld [vmem:[#allocation5 + $0x5e0] sm:$0xff] }
  0xa3   :  { %4199 = vmatprep.subr.bf16.mxu1 %v7029_v19  ;;  %4231 = vmatprep.subr.bf16.mxu0 %v7031_v62  ;;  %v7053_v53 = vpack.c.bf16 %v737_v18, %v729_v6  ;;  %v7055_v38 = vpack.c.bf16 %v863_v45, %v855_v10  ;;  %v745_v62 = vld [vmem:[#allocation5 + $0x138] sm:$0xff]  ;;  %v871_v19 = vld [vmem:[#allocation5 + $0x528] sm:$0xff]  ;;  %8776 = vst [vmem:[#allocation96_spill] sm:$0xff] %v7062_v31  ;;  %v744_v6 = vld [vmem:[#allocation5 + $0x130] sm:$0xff] }
  0xa4   :  { %v752_v18 = vld [vmem:[#allocation5 + $0x170] sm:$0xff] }
  0xa5   :  { %8773 = vst [vmem:[#allocation93_spill] sm:$0xff] %v7053_v53  ;;  %8774 = vst [vmem:[#allocation94_spill] sm:$0xff] %v7055_v38  ;;  %v7073_v52 = vpack.c.bf16 %v752_v18, %v744_v6  ;;  %v7087_v18 = vpack.c.bf16 %v894_v4, %v886_v8  ;;  %v792_v8 = vld [vmem:[#allocation5 + $0x2b0] sm:$0xff] }
  0xa6   :  { %4201 = vmatpush1.bf16.msra.mxu1 %v7035_v24  ;;  %4233 = vmatpush1.bf16.msra.mxu0 %v7037_v40  ;;  %v753_v24 = vld [vmem:[#allocation5 + $0x178] sm:$0xff]  ;;  %v879_v40 = vld [vmem:[#allocation5 + $0x568] sm:$0xff]  ;;  %v800_v4 = vld [vmem:[#allocation5 + $0x2f0] sm:$0xff] }
  0xa7   :  { %4267 = vmatprep.subr.bf16.mxu1 %v7041_v5  ;;  %4235 = vmatprep.subr.bf16.mxu0 %v7043_v7  ;;  %v7066_v10 = vpack.c.bf16 %v753_v24, %v745_v62  ;;  %v7068_v45 = vpack.c.bf16 %v879_v40, %v871_v19  ;;  %v761_v7 = vld [vmem:[#allocation5 + $0x1b8] sm:$0xff]  ;;  %v887_v5 = vld [vmem:[#allocation5 + $0x5a8] sm:$0xff]  ;;  %8779 = vst [vmem:[#allocation99_spill] sm:$0xff] %v7073_v52  ;;  %v760_v62 = vld [vmem:[#allocation5 + $0x1b0] sm:$0xff] }
  0xa8   :  { %v768_v24 = vld [vmem:[#allocation5 + $0x1f0] sm:$0xff]  ;;  %8784 = vst [vmem:[#allocation104_spill] sm:$0xff] %v7087_v18 }
  0xa9   :  { %1109 = vmatmul.mubr.f32.vlgmr.msra.gmra.mrb[8].mxu1 %v8734_v50  ;;  %8777 = vst [vmem:[#allocation97_spill] sm:$0xff] %v7066_v10  ;;  %8778 = vst [vmem:[#allocation98_spill] sm:$0xff] %v7068_v45  ;;  %v7085_v6 = vpack.c.bf16 %v768_v24, %v760_v62  ;;  %v7097_v62 = vpack.c.bf16 %v784_v41, %v776_v51  ;;  %v7109_v51 = vpack.c.bf16 %v800_v4, %v792_v8 }
  0xaa   :  { %4269 = vmatpush1.bf16.msra.mxu1 %v7047_v39  ;;  %4237 = vmatpush1.bf16.msra.mxu0 %v7049_v57  ;;  %v769_v39 = vld [vmem:[#allocation5 + $0x1f8] sm:$0xff]  ;;  %v895_v57 = vld [vmem:[#allocation5 + $0x5e8] sm:$0xff] }
  0xab   :  { %4271 = vmatprep.subr.bf16.mxu1 %v7053_v53  ;;  %4239 = vmatprep.subr.bf16.mxu0 %v7055_v38  ;;  %v7079_v19 = vpack.c.bf16 %v769_v39, %v761_v7  ;;  %v7081_v40 = vpack.c.bf16 %v895_v57, %v887_v5  ;;  %v777_v38 = vld [vmem:[#allocation5 + $0x238] sm:$0xff]  ;;  %v903_v53 = vld [vmem:[#allocation5 + $0x628] sm:$0xff]  ;;  %8783 = vst [vmem:[#allocation103_spill] sm:$0xff] %v7085_v6  ;;  %v902_v39 = vld [vmem:[#allocation5 + $0x620] sm:$0xff] }
  0xac   :  { %1250 = vmatprep.mubr.f32.mxu1 %v8734_v50  ;;  %v910_v57 = vld [vmem:[#allocation5 + $0x660] sm:$0xff]  ;;  %8787 = vst [vmem:[#allocation107_spill] sm:$0xff] %v7097_v62  ;;  %8791 = vst [vmem:[#allocation111_spill] sm:$0xff] %v7109_v51 }
  0xad   :  { %8781 = vst [vmem:[#allocation101_spill] sm:$0xff] %v7079_v19  ;;  %8782 = vst [vmem:[#allocation102_spill] sm:$0xff] %v7081_v40  ;;  %v7099_v24 = vpack.c.bf16 %v910_v57, %v902_v39  ;;  %v808_v39 = vld [vmem:[#allocation5 + $0x330] sm:$0xff] }
  0xae   :  { %4273 = vmatpush1.bf16.msra.mxu1 %v7060_v0  ;;  %4241 = vmatpush1.bf16.msra.mxu0 %v7062_v31  ;;  %v785_v0 = vld [vmem:[#allocation5 + $0x278] sm:$0xff]  ;;  %v911_v31 = vld [vmem:[#allocation5 + $0x668] sm:$0xff]  ;;  %v816_v57 = vld [vmem:[#allocation5 + $0x370] sm:$0xff] }
  0xaf   :  { %4275 = vmatprep.subr.bf16.mxu1 %v7066_v10  ;;  %4243 = vmatprep.subr.bf16.mxu0 %v7068_v45  ;;  %v7091_v5 = vpack.c.bf16 %v785_v0, %v777_v38  ;;  %v7093_v7 = vpack.c.bf16 %v911_v31, %v903_v53  ;;  %v793_v45 = vld [vmem:[#allocation5 + $0x2b8] sm:$0xff]  ;;  %v919_v10 = vld [vmem:[#allocation5 + $0x6a8] sm:$0xff]  ;;  %8788 = vst [vmem:[#allocation108_spill] sm:$0xff] %v7099_v24  ;;  %v918_v0 = vld [vmem:[#allocation5 + $0x6a0] sm:$0xff] }
  0xb0   :  { %v926_v31 = vld [vmem:[#allocation5 + $0x6e0] sm:$0xff]  ;;  %v7121_v8 = vpack.c.bf16 %v816_v57, %v808_v39 }
  0xb1   :  { %8785 = vst [vmem:[#allocation105_spill] sm:$0xff] %v7091_v5  ;;  %8786 = vst [vmem:[#allocation106_spill] sm:$0xff] %v7093_v7  ;;  %v7111_v41 = vpack.c.bf16 %v926_v31, %v918_v0  ;;  %v824_v0 = vld [vmem:[#allocation5 + $0x3b0] sm:$0xff]  ;;  %v958_v31 = vld [vmem:[#allocation5 + $0x7e0] sm:$0xff] }
  0xb2   :  { %4277 = vmatpush1.bf16.msra.mxu1 %v7073_v52  ;;  %4245 = vmatpush1.bf16.msra.mxu0 %v7075_v9  ;;  %v801_v52 = vld [vmem:[#allocation5 + $0x2f8] sm:$0xff]  ;;  %v927_v9 = vld [vmem:[#allocation5 + $0x6e8] sm:$0xff]  ;;  %8795 = vst [vmem:[#allocation115_spill] sm:$0xff] %v7121_v8 }
  0xb3   :  { %4279 = vmatprep.subr.bf16.mxu1 %v7079_v19  ;;  %4247 = vmatprep.subr.bf16.mxu0 %v7081_v40  ;;  %v7103_v53 = vpack.c.bf16 %v801_v52, %v793_v45  ;;  %v7105_v38 = vpack.c.bf16 %v927_v9, %v919_v10  ;;  %v809_v40 = vld [vmem:[#allocation5 + $0x338] sm:$0xff]  ;;  %v935_v19 = vld [vmem:[#allocation5 + $0x728] sm:$0xff]  ;;  %8792 = vst [vmem:[#allocation112_spill] sm:$0xff] %v7111_v41  ;;  %v934_v52 = vld [vmem:[#allocation5 + $0x720] sm:$0xff] }
  0xb4   :  { %v942_v9 = vld [vmem:[#allocation5 + $0x760] sm:$0xff] }
  0xb5   :  { %8789 = vst [vmem:[#allocation109_spill] sm:$0xff] %v7103_v53  ;;  %8790 = vst [vmem:[#allocation110_spill] sm:$0xff] %v7105_v38  ;;  %v7123_v4 = vpack.c.bf16 %v942_v9, %v934_v52  ;;  %v865_v52 = vld [vmem:[#allocation5 + $0x4f8] sm:$0xff] }
  0xb6   :  { %4281 = vmatpush1.bf16.msra.mxu1 %v7085_v6  ;;  %4249 = vmatpush1.bf16.msra.mxu0 %v7087_v18  ;;  %v817_v6 = vld [vmem:[#allocation5 + $0x378] sm:$0xff]  ;;  %v943_v18 = vld [vmem:[#allocation5 + $0x768] sm:$0xff] }
  0xb7   :  { %4283 = vmatprep.subr.bf16.mxu1 %v7091_v5  ;;  %4251 = vmatprep.subr.bf16.mxu0 %v7093_v7  ;;  %v7115_v10 = vpack.c.bf16 %v817_v6, %v809_v40  ;;  %v7117_v45 = vpack.c.bf16 %v943_v18, %v935_v19  ;;  %v825_v7 = vld [vmem:[#allocation5 + $0x3b8] sm:$0xff]  ;;  %v951_v5 = vld [vmem:[#allocation5 + $0x7a8] sm:$0xff]  ;;  %8796 = vst [vmem:[#allocation116_spill] sm:$0xff] %v7123_v4  ;;  %v832_v6 = vld [vmem:[#allocation5 + $0x3f0] sm:$0xff] }
  0xb8   :  { %v950_v18 = vld [vmem:[#allocation5 + $0x7a0] sm:$0xff]  ;;  %v7133_v39 = vpack.c.bf16 %v832_v6, %v824_v0  ;;  %v856_v6 = vld [vmem:[#allocation5 + $0x4b0] sm:$0xff] }
  0xb9   :  { %8793 = vst [vmem:[#allocation113_spill] sm:$0xff] %v7115_v10  ;;  %8794 = vst [vmem:[#allocation114_spill] sm:$0xff] %v7117_v45  ;;  %v7135_v57 = vpack.c.bf16 %v958_v31, %v950_v18  ;;  %v864_v18 = vld [vmem:[#allocation5 + $0x4f0] sm:$0xff] }
  0xba   :  { %4285 = vmatpush1.bf16.msra.mxu1 %v7097_v62  ;;  %4253 = vmatpush1.bf16.msra.mxu0 %v7099_v24  ;;  %v833_v62 = vld [vmem:[#allocation5 + $0x3f8] sm:$0xff]  ;;  %v959_v24 = vld [vmem:[#allocation5 + $0x7e8] sm:$0xff]  ;;  %8799 = vst [vmem:[#allocation119_spill] sm:$0xff] %v7133_v39  ;;  %v7151_v31 = vpack.c.bf16 %v864_v18, %v856_v6  ;;  %v888_v18 = vld [vmem:[#allocation5 + $0x5b0] sm:$0xff] }
  0xbb   :  { %4287 = vmatprep.subr.bf16.mxu1 %v7103_v53  ;;  %4255 = vmatprep.subr.bf16.mxu0 %v7105_v38  ;;  %v7127_v19 = vpack.c.bf16 %v833_v62, %v825_v7  ;;  %v7129_v40 = vpack.c.bf16 %v959_v24, %v951_v5  ;;  %v841_v38 = vld [vmem:[#allocation5 + $0x438] sm:$0xff]  ;;  %8800 = vst [vmem:[#allocation120_spill] sm:$0xff] %v7135_v57  ;;  %v840_v5 = vld [vmem:[#allocation5 + $0x430] sm:$0xff] }
  0xbc   :  { %v848_v62 = vld [vmem:[#allocation5 + $0x470] sm:$0xff]  ;;  %v857_v24 = vld [vmem:[#allocation5 + $0x4b8] sm:$0xff]  ;;  %8804 = vst [vmem:[#allocation124_spill] sm:$0xff] %v7151_v31 }
  0xbd   :  { %8797 = vst [vmem:[#allocation117_spill] sm:$0xff] %v7127_v19  ;;  %8798 = vst [vmem:[#allocation118_spill] sm:$0xff] %v7129_v40  ;;  %v7143_v9 = vpack.c.bf16 %v848_v62, %v840_v5  ;;  %v7146_v0 = vpack.c.bf16 %v865_v52, %v857_v24  ;;  %v872_v62 = vld [vmem:[#allocation5 + $0x530] sm:$0xff]  ;;  %v889_v52 = vld [vmem:[#allocation5 + $0x5b8] sm:$0xff] }
  0xbe   :  { %4289 = vmatpush1.bf16.msra.mxu1 %v7109_v51  ;;  %4257 = vmatpush1.bf16.msra.mxu0 %v7111_v41  ;;  %v849_v51 = vld [vmem:[#allocation5 + $0x478] sm:$0xff]  ;;  %v880_v24 = vld [vmem:[#allocation5 + $0x570] sm:$0xff] }
  0xbf   :  { %4291 = vmatprep.subr.bf16.mxu1 %v7115_v10  ;;  %4259 = vmatprep.subr.bf16.mxu0 %v7117_v45  ;;  %v7139_v7 = vpack.c.bf16 %v849_v51, %v841_v38  ;;  %8802 = vst [vmem:[#allocation122_spill] sm:$0xff] %v7143_v9  ;;  %8803 = vst [vmem:[#allocation123_spill] sm:$0xff] %v7146_v0  ;;  %v873_v38 = vld [vmem:[#allocation5 + $0x538] sm:$0xff] }
  0xc0   :  { %v881_v51 = vld [vmem:[#allocation5 + $0x578] sm:$0xff] }
  0xc1   :  { %8801 = vst [vmem:[#allocation121_spill] sm:$0xff] %v7139_v7  ;;  %v7155_v5 = vpack.c.bf16 %v881_v51, %v873_v38  ;;  %v905_v38 = vld [vmem:[#allocation5 + $0x638] sm:$0xff] }
  0xc2   :  { %4293 = vmatpush1.bf16.msra.mxu1 %v7121_v8  ;;  %4261 = vmatpush1.bf16.msra.mxu0 %v7123_v4  ;;  %v913_v51 = vld [vmem:[#allocation5 + $0x678] sm:$0xff] }
  0xc3   :  { %4295 = vmatprep.subr.bf16.mxu1 %v7127_v19  ;;  %4263 = vmatprep.subr.bf16.mxu0 %v7129_v40  ;;  %8805 = vst [vmem:[#allocation125_spill] sm:$0xff] %v7155_v5 }
  0xc6   :  { %4297 = vmatpush1.bf16.msra.mxu1 %v7133_v39  ;;  %4265 = vmatpush1.bf16.msra.mxu0 %v7135_v57  ;;  %v7159_v57 = vpack.c.bf16 %v880_v24, %v872_v62  ;;  %v7171_v62 = vpack.c.bf16 %v913_v51, %v905_v38  ;;  %v904_v24 = vld [vmem:[#allocation5 + $0x630] sm:$0xff]  ;;  %v937_v38 = vld [vmem:[#allocation5 + $0x738] sm:$0xff] }
  0xc7   :  { %4299 = vmatprep.subr.bf16.mxu1 %v7139_v7  ;;  %4331 = vmatprep.subr.bf16.mxu0 %v6723_v27  ;;  %v897_v27 = vld [vmem:[#allocation5 + $0x5f8] sm:$0xff] }
  0xc8   :  { %8806 = vst [vmem:[#allocation126_spill] sm:$0xff] %v7159_v57  ;;  %v7163_v6 = vpack.c.bf16 %v897_v27, %v889_v52  ;;  %8809 = vst [vmem:[#allocation129_spill] sm:$0xff] %v7171_v62  ;;  %v921_v27 = vld [vmem:[#allocation5 + $0x6b8] sm:$0xff] }
  0xc9   :  { %1180 = vmatmul.mubr.f32.vlgmr.msra.gmra.mrb[8].mxu0 %v8734_v50  ;;  %v929_v52 = vld [vmem:[#allocation5 + $0x6f8] sm:$0xff] }
  0xca   :  { %4301 = vmatpush1.bf16.msra.mxu1 %v7143_v9  ;;  %4333 = vmatpush1.bf16.msra.mxu0 %v6729_v33  ;;  %8807 = vst [vmem:[#allocation127_spill] sm:$0xff] %v7163_v6  ;;  %v896_v33 = vld [vmem:[#allocation5 + $0x5f0] sm:$0xff]  ;;  %v945_v51 = vld [vmem:[#allocation5 + $0x778] sm:$0xff] }
  0xcb   :  { %4303 = vmatprep.subr.bf16.mxu1 %v7146_v0  ;;  %4335 = vmatprep.subr.bf16.mxu0 %v6733_v34  ;;  %v7167_v34 = vpack.c.bf16 %v896_v33, %v888_v18  ;;  %v7179_v33 = vpack.c.bf16 %v929_v52, %v921_v27  ;;  %v920_v18 = vld [vmem:[#allocation5 + $0x6b0] sm:$0xff]  ;;  %v953_v27 = vld [vmem:[#allocation5 + $0x7b8] sm:$0xff] }
  0xcc   :  { %v961_v52 = vld [vmem:[#allocation5 + $0x7f8] sm:$0xff] }
  0xcd   :  { %8808 = vst [vmem:[#allocation128_spill] sm:$0xff] %v7167_v34  ;;  %8811 = vst [vmem:[#allocation131_spill] sm:$0xff] %v7179_v33 }
  0xce   :  { %4305 = vmatpush1.bf16.msra.mxu1 %v7151_v31  ;;  %4337 = vmatpush1.bf16.msra.mxu0 %v6741_v46  ;;  %v912_v46 = vld [vmem:[#allocation5 + $0x670] sm:$0xff] }
  0xcf   :  { %4307 = vmatprep.subr.bf16.mxu1 %v7155_v5  ;;  %4339 = vmatprep.subr.bf16.mxu0 %v6745_v47  ;;  %v7175_v47 = vpack.c.bf16 %v912_v46, %v904_v24  ;;  %v7187_v46 = vpack.c.bf16 %v945_v51, %v937_v38  ;;  %v936_v24 = vld [vmem:[#allocation5 + $0x730] sm:$0xff]  ;;  %v8820_v51 = vld [vmem:[#allocation52_spill] sm:$0xff] }
  0xd1   :  { %8810 = vst [vmem:[#allocation130_spill] sm:$0xff] %v7175_v47  ;;  %8813 = vst [vmem:[#allocation133_spill] sm:$0xff] %v7187_v46 }
  0xd2   :  { %4309 = vmatpush1.bf16.msra.mxu1 %v7159_v57  ;;  %4341 = vmatpush1.bf16.msra.mxu0 %v6754_v60  ;;  %v928_v60 = vld [vmem:[#allocation5 + $0x6f0] sm:$0xff] }
  0xd3   :  { %4311 = vmatprep.subr.bf16.mxu1 %v7163_v6  ;;  %4343 = vmatprep.subr.bf16.mxu0 %v6757_v61  ;;  %v7183_v61 = vpack.c.bf16 %v928_v60, %v920_v18  ;;  %v7195_v60 = vpack.c.bf16 %v961_v52, %v953_v27  ;;  %v952_v18 = vld [vmem:[#allocation5 + $0x7b0] sm:$0xff]  ;;  %v8823_v52 = vld [vmem:[#allocation56_spill] sm:$0xff] }
  0xd4   :  { %v8822_v27 = vld [vmem:[#allocation55_spill] sm:$0xff] }
  0xd5   :  { %8812 = vst [vmem:[#allocation132_spill] sm:$0xff] %v7183_v61  ;;  %8815 = vst [vmem:[#allocation135_spill] sm:$0xff] %v7195_v60 }
  0xd6   :  { %4313 = vmatpush1.bf16.msra.mxu1 %v7167_v34  ;;  %4345 = vmatpush1.bf16.msra.mxu0 %v6766_v11  ;;  %v944_v11 = vld [vmem:[#allocation5 + $0x770] sm:$0xff] }
  0xd7   :  { %4315 = vmatprep.subr.bf16.mxu1 %v7171_v62  ;;  %4347 = vmatprep.subr.bf16.mxu0 %v6769_v12  ;;  %v7191_v12 = vpack.c.bf16 %v944_v11, %v936_v24  ;;  %v8817_v11 = vld [vmem:[#allocation49_spill] sm:$0xff]  ;;  %v8821_v24 = vld [vmem:[#allocation54_spill] sm:$0xff] }
  0xd9   :  { %8814 = vst [vmem:[#allocation134_spill] sm:$0xff] %v7191_v12 }
  0xda   :  { %4317 = vmatpush1.bf16.msra.mxu1 %v7175_v47  ;;  %4349 = vmatpush1.bf16.msra.mxu0 %v6780_v21  ;;  %v960_v21 = vld [vmem:[#allocation5 + $0x7f0] sm:$0xff] }
  0xdb   :  { %4319 = vmatprep.subr.bf16.mxu1 %v7179_v33  ;;  %4351 = vmatprep.subr.bf16.mxu0 %v6783_v22  ;;  %v7199_v38 = vpack.c.bf16 %v960_v21, %v952_v18  ;;  %v8818_v21 = vld [vmem:[#allocation50_spill] sm:$0xff]  ;;  %v8824_v18 = vld [vmem:[#allocation57_spill] sm:$0xff] }
  0xdd   :  { %8816 = vst [vmem:[#allocation136_spill] sm:$0xff] %v7199_v38 }
  0xde   :  { %4321 = vmatpush1.bf16.msra.mxu1 %v7183_v61  ;;  %4353 = vmatpush1.bf16.msra.mxu0 %v6793_v28 }
  0xdf   :  { %4323 = vmatprep.subr.bf16.mxu1 %v7187_v46  ;;  %4355 = vmatprep.subr.bf16.mxu0 %v6796_v29 }
  0xe2   :  { %4325 = vmatpush1.bf16.msra.mxu1 %v7191_v12  ;;  %4357 = vmatpush1.bf16.msra.mxu0 %v6805_v36 }
  0xe3   :  { %4327 = vmatprep.subr.bf16.mxu1 %v7195_v60  ;;  %4359 = vmatprep.subr.bf16.mxu0 %v6808_v37 }
  0xe6   :  { %4329 = vmatpush1.bf16.msra.mxu1 %v7199_v38  ;;  %4361 = vmatpush1.bf16.msra.mxu0 %v6817_v44 }
  0xe7   :  { %4395 = vmatprep.subr.bf16.mxu1 %v6771_v20  ;;  %4363 = vmatprep.subr.bf16.mxu0 %v6820_v49 }
  0xe9   :  { %1251 = vmatmul.mubr.f32.vlgmr.msra.gmra.mrb[24].mxu1 %v8734_v50  ;;  %v8819_v50 = vld [vmem:[#allocation51_spill] sm:$0xff] }
  0xea   :  { %4397 = vmatpush1.bf16.msra.mxu1 %v6829_v58  ;;  %4365 = vmatpush1.bf16.msra.mxu0 %v6831_v59 }
  0xeb   :  { %4399 = vmatprep.subr.bf16.mxu1 %v6834_v1  ;;  %4367 = vmatprep.subr.bf16.mxu0 %v6836_v2 }
  0xee   :  { %4401 = vmatpush1.bf16.msra.mxu1 %v6843_v13  ;;  %4369 = vmatpush1.bf16.msra.mxu0 %v6845_v14  ;;  %v8838_v14 = vld [vmem:[#allocation71_spill] sm:$0xff] }
  0xef   :  { %4403 = vmatprep.subr.bf16.mxu1 %v6849_v17  ;;  %4371 = vmatprep.subr.bf16.mxu0 %v6851_v23 }
  0xf2   :  { %4405 = vmatpush1.bf16.msra.mxu1 %v6858_v32  ;;  %4373 = vmatpush1.bf16.msra.mxu0 %v6860_v35  ;;  %v8835_v35 = vld [vmem:[#allocation69_spill] sm:$0xff] }
  0xf3   :  { %4407 = vmatprep.subr.bf16.mxu1 %v6864_v42  ;;  %4375 = vmatprep.subr.bf16.mxu0 %v6866_v43 }
  0xf6   :  { %4409 = vmatpush1.bf16.msra.mxu1 %v6873_v55  ;;  %4377 = vmatpush1.bf16.msra.mxu0 %v6875_v56  ;;  %v8831_v56 = vld [vmem:[#allocation65_spill] sm:$0xff] }
  0xf7   :  { %4411 = vmatprep.subr.bf16.mxu1 %v6879_v63  ;;  %4379 = vmatprep.subr.bf16.mxu0 %v6881_v3 }
  0xfa   :  { %4413 = vmatpush1.bf16.msra.mxu1 %v6888_v15  ;;  %4381 = vmatpush1.bf16.msra.mxu0 %v6890_v16  ;;  %v8827_v16 = vld [vmem:[#allocation61_spill] sm:$0xff] }
  0xfb   :  { %4415 = vmatprep.subr.bf16.mxu1 %v6894_v25  ;;  %4383 = vmatprep.subr.bf16.mxu0 %v6896_v26  ;;  %v8825_v26 = vld [vmem:[#allocation58_spill] sm:$0xff] }
  0xfe   :  { %4417 = vmatpush1.bf16.msra.mxu1 %v6903_v54  ;;  %4385 = vmatpush1.bf16.msra.mxu0 %v6905_v48  ;;  %v8826_v48 = vld [vmem:[#allocation59_spill] sm:$0xff] }
  0xff   :  { %4419 = vmatprep.subr.bf16.mxu1 %v8817_v11  ;;  %4387 = vmatprep.subr.bf16.mxu0 %v8818_v21 }
 0x102   :  { %4421 = vmatpush1.bf16.msra.mxu1 %v8819_v50  ;;  %4389 = vmatpush1.bf16.msra.mxu0 %v8820_v51  ;;  %v8830_v51 = vld [vmem:[#allocation63_spill] sm:$0xff] }
 0x103   :  { %4423 = vmatprep.subr.bf16.mxu1 %v6924_v30  ;;  %4391 = vmatprep.subr.bf16.mxu0 %v8821_v24 }
 0x106   :  { %4425 = vmatpush1.bf16.msra.mxu1 %v8822_v27  ;;  %4393 = vmatpush1.bf16.msra.mxu0 %v8823_v52  ;;  %v8834_v52 = vld [vmem:[#allocation67_spill] sm:$0xff] }
 0x107   :  { %4427 = vmatprep.subr.bf16.mxu1 %v8824_v18  ;;  %4459 = vmatprep.subr.bf16.mxu0 %v8825_v26 }
 0x10a   :  { %4429 = vmatpush1.bf16.msra.mxu1 %v8826_v48 }
 0x10b   :  { %4431 = vmatprep.subr.bf16.mxu1 %v8827_v16  ;;  %v125_v16 = vlaneseq }
 0x10c   :  { %v7243_v21 = vpop.f32.mrb[0].mxu1 }
 0x10d   :  { %8828 = vst [vmem:[#allocation137_spill] sm:$0xff] %v7243_v21  ;;  %v7245_v3 = vpop.f32.mrb[1].mxu1  ;;  %v8839_v21 = vld [vmem:[#allocation73_spill] sm:$0xff] }
 0x10e   :  { %8829 = vst [vmem:[#allocation138_spill] sm:$0xff] %v7245_v3  ;;  %4433 = vmatpush1.bf16.msra.mxu1 %v8830_v51 }
 0x10f   :  { %4435 = vmatprep.subr.bf16.mxu1 %v8831_v56  ;;  %v8842_v56 = vld [vmem:[#allocation75_spill] sm:$0xff] }
 0x110   :  { %v7249_v24 = vpop.f32.mrb[2].mxu1 }
 0x111   :  { %8832 = vst [vmem:[#allocation139_spill] sm:$0xff] %v7249_v24  ;;  %v7251_v43 = vpop.f32.mrb[3].mxu1  ;;  %v8843_v24 = vld [vmem:[#allocation77_spill] sm:$0xff] }
 0x112   :  { %8833 = vst [vmem:[#allocation140_spill] sm:$0xff] %v7251_v43  ;;  %4437 = vmatpush1.bf16.msra.mxu1 %v8834_v52  ;;  %v8844_v43 = vld [vmem:[#allocation79_spill] sm:$0xff]  ;;  %v8845_v52 = vld [vmem:[#allocation81_spill] sm:$0xff] }
 0x113   :  { %4439 = vmatprep.subr.bf16.mxu1 %v8835_v35  ;;  %v8846_v35 = vld [vmem:[#allocation83_spill] sm:$0xff] }
 0x114   :  { %v7255_v26 = vpop.f32.mrb[4].mxu1 }
 0x115   :  { %8836 = vst [vmem:[#allocation141_spill] sm:$0xff] %v7255_v26  ;;  %v7257_v23 = vpop.f32.mrb[5].mxu1  ;;  %v8847_v26 = vld [vmem:[#allocation85_spill] sm:$0xff] }
 0x116   :  { %8837 = vst [vmem:[#allocation142_spill] sm:$0xff] %v7257_v23  ;;  %4441 = vmatpush1.bf16.msra.mxu1 %v8838_v14  ;;  %v8848_v23 = vld [vmem:[#allocation87_spill] sm:$0xff]  ;;  %v8849_v14 = vld [vmem:[#allocation89_spill] sm:$0xff] }
 0x117   :  { %4443 = vmatprep.subr.bf16.mxu1 %v8839_v21 }
 0x118   :  { %v7261_v3 = vpop.f32.mrb[6].mxu1 }
 0x119   :  { %8840 = vst [vmem:[#allocation143_spill] sm:$0xff] %v7261_v3  ;;  %v7263_v51 = vpop.f32.mrb[7].mxu1 }
 0x11a   :  { %8841 = vst [vmem:[#allocation144_spill] sm:$0xff] %v7263_v51  ;;  %4445 = vmatpush1.bf16.msra.mxu1 %v8842_v56  ;;  %v126_v51 = vshrl.u32 %v125_v16, 7 }
 0x11b   :  { %4447 = vmatprep.subr.bf16.mxu1 %v8843_v24 }
 0x11c   :  { %v127_v2 = vsub.s32 0, %v126_v51  ;;  %v135_v56 = vsub.s32 2, %v126_v51  ;;  %v139_v24 = vsub.s32 3, %v126_v51  ;;  %v147_v36 = vsub.s32 5, %v126_v51 }
 0x11e   :  { %4449 = vmatpush1.bf16.msra.mxu1 %v8844_v43  ;;  %v123_v43 = vld [vmem:[%s8397_s3] sm:$0xff] }
 0x11f   :  { %4451 = vmatprep.subr.bf16.mxu1 %v8845_v52  ;;  %v131_v52 = vsub.s32 1, %v126_v51  ;;  %v7276_v59 = vrot.slane %v123_v43, %v127_v2 }
 0x121   :  { %8850 = vst [vmem:[#allocation145_spill] sm:$0xff] %v7276_v59 }
 0x122   :  { %4453 = vmatpush1.bf16.msra.mxu1 %v8846_v35 }
 0x123   :  { %4455 = vmatprep.subr.bf16.mxu1 %v8847_v26  ;;  %v7278_v26 = vrot.slane %v123_v43, %v135_v56 }
 0x126   :  { %4457 = vmatpush1.bf16.msra.mxu1 %v8848_v23  ;;  %v7280_v23 = vrot.slane %v123_v43, %v131_v52 }
 0x127   :  { %4523 = vmatprep.subr.bf16.mxu1 %v8849_v14  ;;  %v7282_v14 = vrot.slane %v123_v43, %v139_v24  ;;  %v143_v24 = vsub.s32 4, %v126_v51 }
 0x128   :  { %8851 = vst [vmem:[#allocation146_spill] sm:$0xff] %v7280_v23 }
 0x129   :  { %8852 = vst [vmem:[#allocation147_spill] sm:$0xff] %v7282_v14 }
 0x15c   :  { %v1039_v21 = vpop.f32.mrb[0].mxu0 }
 0x15d   :  { %v1041_v3 = vpop.f32.mrb[1].mxu0  ;;  %v6162_v16 = vadd.f32 %v1039_v21, %v7276_v59 }
 0x15e   :  { %v6163_v18 = vadd.f32 %v1041_v3, %v7280_v23 }
 0x15f   :  { %v3926_v44 = vmul.f32 -1.442695, %v6162_v16  ;;  %v7290_v16 = vrot.slane %v123_v43, %v147_v36 }
 0x160   :  { %v3927_v30 = vmul.f32 -1.442695, %v6163_v18 }
 0x161   :  { %6295 = vpow2.f32 %v3926_v44  ;;  %8854 = vst [vmem:[#allocation149_spill] sm:$0xff] %v7290_v16 }
 0x162   :  { %6297 = vpow2.f32 %v3927_v30 }
 0x16b   :  { %v6296_v2 = vpop.eup %6295 }
 0x16c   :  { %v6298_v56 = vpop.eup %6297  ;;  %v1271_v59 = vadd.f32 1.0, %v6296_v2 }
 0x16d   :  { %v1272_v3 = vadd.f32 1.0, %v6298_v56 }
 0x17c   :  { %v1110_v48 = vpop.f32.mrb[8].mxu1 }
 0x17d   :  { %v1112_v35 = vpop.f32.mrb[9].mxu1  ;;  %v6186_v49 = vadd.f32 %v1110_v48, %v7278_v26  ;;  %v7288_v48 = vrot.slane %v123_v43, %v143_v24 }
 0x17e   :  { %v6187_v27 = vadd.f32 %v1112_v35, %v7282_v14 }
 0x17f   :  { %v3928_v37 = vmul.f32 -1.442695, %v6186_v49  ;;  %8853 = vst [vmem:[#allocation148_spill] sm:$0xff] %v7288_v48 }
 0x180   :  { %v3929_v50 = vmul.f32 -1.442695, %v6187_v27 }
 0x181   :  { %6299 = vpow2.f32 %v3928_v37 }
 0x182   :  { %6301 = vpow2.f32 %v3929_v50 }
 0x183   :  { %6303 = vrcp.f32 %v1271_v59 }
 0x184   :  { %6305 = vrcp.f32 %v1272_v3 }
 0x18b   :  { %v6300_v52 = vpop.eup %6299 }
 0x18c   :  { %v6302_v21 = vpop.eup %6301  ;;  %v1283_v23 = vadd.f32 1.0, %v6300_v52 }
 0x18d   :  { %v1284_v35 = vadd.f32 1.0, %v6302_v21  ;;  %v6304_v50 = vpop.eup %6303 }
 0x18e   :  { %6307 = vrcp.f32 %v1283_v23  ;;  %v6306_v27 = vpop.eup %6305 }
 0x18f   :  { %6309 = vrcp.f32 %v1284_v35  ;;  %v155_v35 = vsub.s32 7, %v126_v51 }
 0x198   :  { %v6308_v18 = vpop.eup %6307 }
 0x199   :  { %v6310_v2 = vpop.eup %6309  ;;  %v1303_v36 = vmul.f32 0.0, %v6308_v18 }
 0x19a   :  { %v1304_v59 = vmul.f32 0.0, %v6310_v2 }
 0x19c   :  { %v1181_v44 = vpop.f32.mrb[8].mxu0 }
 0x19d   :  { %v6202_v37 = vadd.f32 %v1181_v44, %v7288_v48  ;;  %v1183_v49 = vpop.f32.mrb[9].mxu0  ;;  %v151_v44 = vsub.s32 6, %v126_v51 }
 0x19e   :  { %v6203_v30 = vadd.f32 %v1183_v49, %v7290_v16 }
 0x19f   :  { %6311 = vtanh.f32 %v6202_v37  ;;  %v7298_v48 = vrot.slane %v123_v43, %v151_v44  ;;  %v7300_v37 = vrot.slane %v123_v43, %v155_v35  ;;  %v8858_v44 = vld [vmem:[#allocation62_spill] sm:$0xff]  ;;  %v8859_v35 = vld [vmem:[#allocation93_spill] sm:$0xff] }
 0x1a0   :  { %6313 = vtanh.f32 %v6203_v30 }
 0x1a1   :  { %8855 = vst [vmem:[#allocation150_spill] sm:$0xff] %v7298_v48 }
 0x1a9   :  { %v6312_v56 = vpop.eup %6311 }
 0x1aa   :  { %v6314_v24 = vpop.eup %6313  ;;  %v1305_v52 = vmul.f32 %v6312_v56, %v6304_v50 }
 0x1ab   :  { %v1306_v21 = vmul.f32 %v6314_v24, %v6306_v27 }
 0x1ac   :  { %v7294_v3 = vadd.f32 %v1305_v52, %v1303_v36 }
 0x1ad   :  { %v7296_v23 = vadd.f32 %v1306_v21, %v1304_v59  ;;  %v8857_v21 = vld [vmem:[#allocation91_spill] sm:$0xff] }
 0x1bc   :  { %v1252_v49 = vpop.f32.mrb[24].mxu1 }
 0x1bd   :  { %v6218_v30 = vadd.f32 %v1252_v49, %v7298_v48  ;;  %v1254_v16 = vpop.f32.mrb[25].mxu1  ;;  %v8860_v49 = vld [vmem:[#allocation64_spill] sm:$0xff] }
 0x1be   :  { %v6219_v14 = vadd.f32 %v1254_v16, %v7300_v37 }
 0x1bf   :  { %v3930_v18 = vmul.f32 -1.442695, %v6218_v30  ;;  %v8861_v30 = vld [vmem:[#allocation95_spill] sm:$0xff] }
 0x1c0   :  { %v3931_v50 = vmul.f32 -1.442695, %v6219_v14  ;;  %v8856_v14 = vld [vmem:[#allocation60_spill] sm:$0xff] }
 0x1c1   :  { %6315 = vpow2.f32 %v3930_v18  ;;  %v8862_v18 = vld [vmem:[#allocation66_spill] sm:$0xff] }
 0x1c2   :  { %6317 = vpow2.f32 %v3931_v50  ;;  %v8863_v50 = vld [vmem:[#allocation97_spill] sm:$0xff] }
 0x1c3   :  { %6319 = vtanh.f32 %v7296_v23 }
 0x1cb   :  { %v6316_v27 = vpop.eup %6315 }
 0x1cc   :  { %v6318_v2 = vpop.eup %6317  ;;  %v1297_v56 = vadd.f32 1.0, %v6316_v27  ;;  %v8864_v27 = vld [vmem:[#allocation68_spill] sm:$0xff] }
 0x1cd   :  { %v1298_v51 = vadd.f32 1.0, %v6318_v2  ;;  %v6320_v43 = vpop.eup %6319  ;;  %v8865_v2 = vld [vmem:[#allocation99_spill] sm:$0xff] }
 0x1ce   :  { %6321 = vrcp.f32 %v1297_v56  ;;  %v8866_v56 = vld [vmem:[#allocation70_spill] sm:$0xff] }
 0x1cf   :  { %6323 = vrcp.f32 %v1298_v51  ;;  %v8867_v51 = vld [vmem:[#allocation101_spill] sm:$0xff] }
 0x1d0   :  { %6325 = vtanh.f32 %v7294_v3 }
 0x1d8   :  { %v6322_v24 = vpop.eup %6321 }
 0x1d9   :  { %v6324_v36 = vpop.eup %6323 }
 0x1da   :  { %v6326_v52 = vpop.eup %6325  ;;  %v1312_v59 = vmul.f32 %v6324_v36, %v6320_v43  ;;  %v8868_v43 = vld [vmem:[#allocation72_spill] sm:$0xff]  ;;  %v8870_v36 = vld [vmem:[#allocation74_spill] sm:$0xff] }
 0x1db   :  { %v7306_v16 = vmul.f32 %v6326_v52, %v6322_v24  ;;  %v8869_v24 = vld [vmem:[#allocation103_spill] sm:$0xff]  ;;  %v8871_v52 = vld [vmem:[#allocation105_spill] sm:$0xff] }
 0x1dc   :  { %1388 = vmatprep.mubr.f32.mxu0 %v1312_v59  ;;  %1459 = vmatprep.mubr.f32.mxu1 %v1312_v59 }
 0x1dd   :  { %1389 = vmatmul.mubr.f32.vlgmr.msra.gmra.mrb[2].mxu0 %v7306_v16  ;;  %1460 = vmatmul.mubr.f32.vlgmr.msra.gmra.mrb[10].mxu1 %v7306_v16 }
 0x1de   :  { %4461 = vmatpush1.bf16.msra.mxu0 %v8856_v14  ;;  %4525 = vmatpush1.bf16.msra.mxu1 %v8857_v21 }
 0x1df   :  { %1530 = vmatprep.mubr.f32.mxu0 %v1312_v59  ;;  %1601 = vmatprep.mubr.f32.mxu1 %v1312_v59  ;;  %v8872_v59 = vld [vmem:[#allocation76_spill] sm:$0xff] }
 0x1e0   :  { %4463 = vmatprep.subr.bf16.mxu0 %v8858_v44  ;;  %4527 = vmatprep.subr.bf16.mxu1 %v8859_v35 }
 0x1e2   :  { %4465 = vmatpush1.bf16.msra.mxu0 %v8860_v49  ;;  %4529 = vmatpush1.bf16.msra.mxu1 %v8861_v30 }
 0x1e3   :  { %4467 = vmatprep.subr.bf16.mxu0 %v8862_v18  ;;  %4531 = vmatprep.subr.bf16.mxu1 %v8863_v50  ;;  %v8873_v18 = vld [vmem:[#allocation107_spill] sm:$0xff]  ;;  %v8874_v50 = vld [vmem:[#allocation78_spill] sm:$0xff] }
 0x1e6   :  { %4469 = vmatpush1.bf16.msra.mxu0 %v8864_v27  ;;  %4533 = vmatpush1.bf16.msra.mxu1 %v8865_v2  ;;  %v8875_v2 = vld [vmem:[#allocation80_spill] sm:$0xff] }
 0x1e7   :  { %4471 = vmatprep.subr.bf16.mxu0 %v8866_v56  ;;  %4535 = vmatprep.subr.bf16.mxu1 %v8867_v51  ;;  %v8876_v56 = vld [vmem:[#allocation111_spill] sm:$0xff]  ;;  %v8877_v51 = vld [vmem:[#allocation82_spill] sm:$0xff] }
 0x1ea   :  { %4473 = vmatpush1.bf16.msra.mxu0 %v8868_v43  ;;  %4537 = vmatpush1.bf16.msra.mxu1 %v8869_v24  ;;  %v8878_v24 = vld [vmem:[#allocation84_spill] sm:$0xff] }
 0x1eb   :  { %4475 = vmatprep.subr.bf16.mxu0 %v8870_v36  ;;  %4539 = vmatprep.subr.bf16.mxu1 %v8871_v52  ;;  %v8879_v52 = vld [vmem:[#allocation86_spill] sm:$0xff] }
 0x1ee   :  { %4477 = vmatpush1.bf16.msra.mxu0 %v8872_v59  ;;  %4541 = vmatpush1.bf16.msra.mxu1 %v8873_v18  ;;  %v8880_v18 = vld [vmem:[#allocation88_spill] sm:$0xff] }
 0x1ef   :  { %4479 = vmatprep.subr.bf16.mxu0 %v8874_v50  ;;  %4543 = vmatprep.subr.bf16.mxu1 %v7103_v53  ;;  %v8881_v53 = vld [vmem:[#allocation90_spill] sm:$0xff] }
 0x1f2   :  { %4481 = vmatpush1.bf16.msra.mxu0 %v8875_v2  ;;  %4545 = vmatpush1.bf16.msra.mxu1 %v8876_v56  ;;  %v8882_v56 = vld [vmem:[#allocation92_spill] sm:$0xff] }
 0x1f3   :  { %4483 = vmatprep.subr.bf16.mxu0 %v8877_v51  ;;  %4547 = vmatprep.subr.bf16.mxu1 %v7115_v10  ;;  %v8883_v10 = vld [vmem:[#allocation94_spill] sm:$0xff] }
 0x1f6   :  { %4485 = vmatpush1.bf16.msra.mxu0 %v8878_v24  ;;  %4549 = vmatpush1.bf16.msra.mxu1 %v7121_v8  ;;  %v8884_v8 = vld [vmem:[#allocation96_spill] sm:$0xff] }
 0x1f7   :  { %4487 = vmatprep.subr.bf16.mxu0 %v8879_v52  ;;  %4551 = vmatprep.subr.bf16.mxu1 %v7127_v19  ;;  %v8885_v19 = vld [vmem:[#allocation98_spill] sm:$0xff] }
 0x1fa   :  { %4489 = vmatpush1.bf16.msra.mxu0 %v8880_v18  ;;  %4553 = vmatpush1.bf16.msra.mxu1 %v7133_v39  ;;  %v8886_v39 = vld [vmem:[#allocation100_spill] sm:$0xff] }
 0x1fb   :  { %4491 = vmatprep.subr.bf16.mxu0 %v8881_v53  ;;  %4555 = vmatprep.subr.bf16.mxu1 %v7139_v7  ;;  %v8887_v7 = vld [vmem:[#allocation102_spill] sm:$0xff] }
 0x1fe   :  { %4493 = vmatpush1.bf16.msra.mxu0 %v8882_v56  ;;  %4557 = vmatpush1.bf16.msra.mxu1 %v7143_v9  ;;  %v8888_v9 = vld [vmem:[#allocation104_spill] sm:$0xff] }
 0x1ff   :  { %4495 = vmatprep.subr.bf16.mxu0 %v8883_v10  ;;  %4559 = vmatprep.subr.bf16.mxu1 %v7146_v0  ;;  %v8889_v0 = vld [vmem:[#allocation106_spill] sm:$0xff] }
 0x202   :  { %4497 = vmatpush1.bf16.msra.mxu0 %v8884_v8  ;;  %4561 = vmatpush1.bf16.msra.mxu1 %v7151_v31  ;;  %v8890_v31 = vld [vmem:[#allocation108_spill] sm:$0xff] }
 0x203   :  { %4499 = vmatprep.subr.bf16.mxu0 %v8885_v19  ;;  %4563 = vmatprep.subr.bf16.mxu1 %v7155_v5  ;;  %v8891_v5 = vld [vmem:[#allocation110_spill] sm:$0xff] }
 0x206   :  { %4501 = vmatpush1.bf16.msra.mxu0 %v8886_v39  ;;  %4565 = vmatpush1.bf16.msra.mxu1 %v7159_v57 }
 0x207   :  { %4503 = vmatprep.subr.bf16.mxu0 %v8887_v7  ;;  %4567 = vmatprep.subr.bf16.mxu1 %v7163_v6 }
 0x20a   :  { %4505 = vmatpush1.bf16.msra.mxu0 %v8888_v9  ;;  %4569 = vmatpush1.bf16.msra.mxu1 %v7167_v34 }
 0x20b   :  { %4507 = vmatprep.subr.bf16.mxu0 %v8889_v0  ;;  %4571 = vmatprep.subr.bf16.mxu1 %v7171_v62 }
 0x20e   :  { %4509 = vmatpush1.bf16.msra.mxu0 %v8890_v31  ;;  %4573 = vmatpush1.bf16.msra.mxu1 %v7175_v47  ;;  %v8892_v47 = vld [vmem:[#allocation120_spill] sm:$0xff] }
 0x20f   :  { %4511 = vmatprep.subr.bf16.mxu0 %v8891_v5  ;;  %4575 = vmatprep.subr.bf16.mxu1 %v7179_v33  ;;  %v8893_v33 = vld [vmem:[#allocation9_spill] sm:$0xff] }
 0x212   :  { %4513 = vmatpush1.bf16.msra.mxu0 %v7111_v41  ;;  %4577 = vmatpush1.bf16.msra.mxu1 %v7183_v61 }
 0x213   :  { %4515 = vmatprep.subr.bf16.mxu0 %v7117_v45  ;;  %4579 = vmatprep.subr.bf16.mxu1 %v7187_v46  ;;  %v8894_v46 = vld [vmem:[#allocation10_spill] sm:$0xff] }
 0x216   :  { %4517 = vmatpush1.bf16.msra.mxu0 %v7123_v4  ;;  %4581 = vmatpush1.bf16.msra.mxu1 %v7191_v12  ;;  %v8895_v12 = vld [vmem:[#allocation11_spill] sm:$0xff] }
 0x217   :  { %4519 = vmatprep.subr.bf16.mxu0 %v7129_v40  ;;  %4583 = vmatprep.subr.bf16.mxu1 %v7195_v60  ;;  %v8896_v60 = vld [vmem:[#allocation12_spill] sm:$0xff] }
 0x21a   :  { %4521 = vmatpush1.bf16.msra.mxu0 %v8892_v47  ;;  %4585 = vmatpush1.bf16.msra.mxu1 %v7199_v38  ;;  %v8897_v38 = vld [vmem:[#allocation13_spill] sm:$0xff] }
 0x21b   :  { %4587 = vmatprep.subr.bf16.mxu0 %v8893_v33  ;;  %4651 = vmatprep.subr.bf16.mxu1 %v6771_v20  ;;  %v8898_v20 = vld [vmem:[#allocation14_spill] sm:$0xff] }
 0x21d   :  { %1531 = vmatmul.mubr.f32.vlgmr.msra.gmra.mrb[10].mxu0 %v7306_v16  ;;  %1602 = vmatmul.mubr.f32.vlgmr.msra.gmra.mrb[26].mxu1 %v7306_v16  ;;  %v8899_v16 = vld [vmem:[#allocation15_spill] sm:$0xff] }
 0x21e   :  { %4589 = vmatpush1.bf16.msra.mxu0 %v8894_v46  ;;  %4653 = vmatpush1.bf16.msra.mxu1 %v6829_v58  ;;  %v8900_v58 = vld [vmem:[#allocation16_spill] sm:$0xff] }
 0x21f   :  { %4591 = vmatprep.subr.bf16.mxu0 %v8895_v12  ;;  %4655 = vmatprep.subr.bf16.mxu1 %v6834_v1  ;;  %v8901_v1 = vld [vmem:[#allocation17_spill] sm:$0xff] }
 0x222   :  { %4593 = vmatpush1.bf16.msra.mxu0 %v8896_v60  ;;  %4657 = vmatpush1.bf16.msra.mxu1 %v6843_v13  ;;  %v8902_v13 = vld [vmem:[#allocation19_spill] sm:$0xff] }
 0x223   :  { %4595 = vmatprep.subr.bf16.mxu0 %v8897_v38  ;;  %4659 = vmatprep.subr.bf16.mxu1 %v6849_v17 }
 0x226   :  { %4597 = vmatpush1.bf16.msra.mxu0 %v8898_v20  ;;  %4661 = vmatpush1.bf16.msra.mxu1 %v6858_v32  ;;  %v8945_v32 = vld [vmem:[#allocation147_spill] sm:$0xff] }
 0x227   :  { %4599 = vmatprep.subr.bf16.mxu0 %v8899_v16  ;;  %4663 = vmatprep.subr.bf16.mxu1 %v6864_v42  ;;  %v8943_v42 = vld [vmem:[#allocation145_spill] sm:$0xff]  ;;  %v8944_v16 = vld [vmem:[#allocation146_spill] sm:$0xff] }
 0x22a   :  { %4601 = vmatpush1.bf16.msra.mxu0 %v8900_v58  ;;  %4665 = vmatpush1.bf16.msra.mxu1 %v6873_v55  ;;  %v8903_v55 = vld [vmem:[#allocation23_spill] sm:$0xff] }
 0x22b   :  { %4603 = vmatprep.subr.bf16.mxu0 %v8901_v1  ;;  %4667 = vmatprep.subr.bf16.mxu1 %v6879_v63  ;;  %v8904_v1 = vld [vmem:[#allocation51_spill] sm:$0xff]  ;;  %v8905_v63 = vld [vmem:[#allocation24_spill] sm:$0xff] }
 0x22e   :  { %4605 = vmatpush1.bf16.msra.mxu0 %v8902_v13  ;;  %4669 = vmatpush1.bf16.msra.mxu1 %v6888_v15  ;;  %v8906_v13 = vld [vmem:[#allocation53_spill] sm:$0xff] }
 0x22f   :  { %4607 = vmatprep.subr.bf16.mxu0 %v6783_v22  ;;  %4671 = vmatprep.subr.bf16.mxu1 %v6894_v25  ;;  %v8907_v15 = vld [vmem:[#allocation25_spill] sm:$0xff]  ;;  %v8908_v22 = vld [vmem:[#allocation55_spill] sm:$0xff]  ;;  %v8909_v25 = vld [vmem:[#allocation26_spill] sm:$0xff] }
 0x232   :  { %4609 = vmatpush1.bf16.msra.mxu0 %v6793_v28  ;;  %4673 = vmatpush1.bf16.msra.mxu1 %v6903_v54  ;;  %v8910_v28 = vld [vmem:[#allocation57_spill] sm:$0xff]  ;;  %v8911_v54 = vld [vmem:[#allocation28_spill] sm:$0xff] }
 0x233   :  { %4611 = vmatprep.subr.bf16.mxu0 %v6796_v29  ;;  %4675 = vmatprep.subr.bf16.mxu1 %v8817_v11  ;;  %v8912_v29 = vld [vmem:[#allocation59_spill] sm:$0xff]  ;;  %v8913_v11 = vld [vmem:[#allocation30_spill] sm:$0xff] }
 0x236   :  { %4613 = vmatpush1.bf16.msra.mxu0 %v8903_v55  ;;  %4677 = vmatpush1.bf16.msra.mxu1 %v8904_v1  ;;  %v8914_v55 = vld [vmem:[#allocation61_spill] sm:$0xff]  ;;  %v8915_v1 = vld [vmem:[#allocation32_spill] sm:$0xff] }
 0x237   :  { %4615 = vmatprep.subr.bf16.mxu0 %v8905_v63  ;;  %4679 = vmatprep.subr.bf16.mxu1 %v8906_v13  ;;  %v8916_v63 = vld [vmem:[#allocation63_spill] sm:$0xff]  ;;  %v8917_v13 = vld [vmem:[#allocation34_spill] sm:$0xff] }
 0x23a   :  { %4617 = vmatpush1.bf16.msra.mxu0 %v8907_v15  ;;  %4681 = vmatpush1.bf16.msra.mxu1 %v8908_v22  ;;  %v8918_v15 = vld [vmem:[#allocation65_spill] sm:$0xff]  ;;  %v8919_v22 = vld [vmem:[#allocation36_spill] sm:$0xff] }
 0x23b   :  { %4619 = vmatprep.subr.bf16.mxu0 %v8909_v25  ;;  %4683 = vmatprep.subr.bf16.mxu1 %v8910_v28  ;;  %v8920_v25 = vld [vmem:[#allocation67_spill] sm:$0xff]  ;;  %v8921_v28 = vld [vmem:[#allocation38_spill] sm:$0xff] }
 0x23e   :  { %4621 = vmatpush1.bf16.msra.mxu0 %v8911_v54  ;;  %4685 = vmatpush1.bf16.msra.mxu1 %v8912_v29  ;;  %v8922_v54 = vld [vmem:[#allocation69_spill] sm:$0xff]  ;;  %v8923_v29 = vld [vmem:[#allocation40_spill] sm:$0xff] }
 0x23f   :  { %4623 = vmatprep.subr.bf16.mxu0 %v8913_v11  ;;  %4687 = vmatprep.subr.bf16.mxu1 %v8914_v55  ;;  %v8924_v11 = vld [vmem:[#allocation71_spill] sm:$0xff]  ;;  %v8925_v55 = vld [vmem:[#allocation42_spill] sm:$0xff] }
 0x242   :  { %4625 = vmatpush1.bf16.msra.mxu0 %v8915_v1  ;;  %4689 = vmatpush1.bf16.msra.mxu1 %v8916_v63  ;;  %v8926_v1 = vld [vmem:[#allocation73_spill] sm:$0xff]  ;;  %v8927_v63 = vld [vmem:[#allocation44_spill] sm:$0xff] }
 0x243   :  { %4627 = vmatprep.subr.bf16.mxu0 %v8917_v13  ;;  %4691 = vmatprep.subr.bf16.mxu1 %v8918_v15  ;;  %v8928_v13 = vld [vmem:[#allocation75_spill] sm:$0xff]  ;;  %v8929_v15 = vld [vmem:[#allocation46_spill] sm:$0xff] }
 0x246   :  { %4629 = vmatpush1.bf16.msra.mxu0 %v8919_v22  ;;  %4693 = vmatpush1.bf16.msra.mxu1 %v8920_v25  ;;  %v8930_v22 = vld [vmem:[#allocation77_spill] sm:$0xff]  ;;  %v8931_v25 = vld [vmem:[#allocation48_spill] sm:$0xff] }
 0x247   :  { %4631 = vmatprep.subr.bf16.mxu0 %v8921_v28  ;;  %4695 = vmatprep.subr.bf16.mxu1 %v8922_v54  ;;  %v8932_v28 = vld [vmem:[#allocation79_spill] sm:$0xff]  ;;  %v8933_v54 = vld [vmem:[#allocation50_spill] sm:$0xff] }
 0x24a   :  { %4633 = vmatpush1.bf16.msra.mxu0 %v8923_v29  ;;  %4697 = vmatpush1.bf16.msra.mxu1 %v8924_v11  ;;  %v8934_v29 = vld [vmem:[#allocation81_spill] sm:$0xff]  ;;  %v8935_v11 = vld [vmem:[#allocation52_spill] sm:$0xff] }
 0x24b   :  { %4635 = vmatprep.subr.bf16.mxu0 %v8925_v55  ;;  %4699 = vmatprep.subr.bf16.mxu1 %v8926_v1  ;;  %v8936_v55 = vld [vmem:[#allocation83_spill] sm:$0xff]  ;;  %v8937_v1 = vld [vmem:[#allocation54_spill] sm:$0xff] }
 0x24e   :  { %4637 = vmatpush1.bf16.msra.mxu0 %v8927_v63  ;;  %4701 = vmatpush1.bf16.msra.mxu1 %v8928_v13  ;;  %v8938_v63 = vld [vmem:[#allocation85_spill] sm:$0xff]  ;;  %v8939_v13 = vld [vmem:[#allocation56_spill] sm:$0xff] }
 0x24f   :  { %4639 = vmatprep.subr.bf16.mxu0 %v8929_v15  ;;  %4703 = vmatprep.subr.bf16.mxu1 %v8930_v22  ;;  %v8940_v15 = vld [vmem:[#allocation87_spill] sm:$0xff]  ;;  %v8941_v22 = vld [vmem:[#allocation58_spill] sm:$0xff] }
 0x252   :  { %4641 = vmatpush1.bf16.msra.mxu0 %v8931_v25  ;;  %4705 = vmatpush1.bf16.msra.mxu1 %v8932_v28  ;;  %v8942_v25 = vld [vmem:[#allocation89_spill] sm:$0xff] }
 0x253   :  { %4643 = vmatprep.subr.bf16.mxu0 %v8933_v54  ;;  %4707 = vmatprep.subr.bf16.mxu1 %v8934_v29 }
 0x256   :  { %4645 = vmatpush1.bf16.msra.mxu0 %v8935_v11  ;;  %4709 = vmatpush1.bf16.msra.mxu1 %v8936_v55 }
 0x257   :  { %4647 = vmatprep.subr.bf16.mxu0 %v8937_v1  ;;  %4711 = vmatprep.subr.bf16.mxu1 %v8938_v63 }
 0x25a   :  { %4649 = vmatpush1.bf16.msra.mxu0 %v8939_v13  ;;  %4713 = vmatpush1.bf16.msra.mxu1 %v8940_v15 }
 0x25b   :  { %4715 = vmatprep.subr.bf16.mxu0 %v8941_v22  ;;  %4779 = vmatprep.subr.bf16.mxu1 %v8942_v25 }
 0x2b0   :  { %v1390_v28 = vpop.f32.mrb[2].mxu0  ;;  %v1461_v54 = vpop.f32.mrb[10].mxu1 }
 0x2b1   :  { %v1392_v58 = vpop.f32.mrb[3].mxu0  ;;  %v1463_v29 = vpop.f32.mrb[11].mxu1  ;;  %v6164_v11 = vadd.f32 %v1390_v28, %v8943_v42  ;;  %v6188_v55 = vadd.f32 %v1461_v54, %v7278_v26 }
 0x2b2   :  { %v6165_v1 = vadd.f32 %v1392_v58, %v8944_v16  ;;  %v6189_v63 = vadd.f32 %v1463_v29, %v8945_v32 }
 0x2b3   :  { %v3932_v20 = vmul.f32 -1.442695, %v6164_v11  ;;  %v3934_v13 = vmul.f32 -1.442695, %v6188_v55  ;;  %v8946_v55 = vld [vmem:[#allocation148_spill] sm:$0xff] }
 0x2b4   :  { %v3933_v17 = vmul.f32 -1.442695, %v6165_v1  ;;  %v3935_v15 = vmul.f32 -1.442695, %v6189_v63  ;;  %v8947_v63 = vld [vmem:[#allocation149_spill] sm:$0xff] }
 0x2b5   :  { %6327 = vpow2.f32 %v3932_v20 }
 0x2b6   :  { %6329 = vpow2.f32 %v3934_v13 }
 0x2b7   :  { %6331 = vpow2.f32 %v3933_v17 }
 0x2b8   :  { %6333 = vpow2.f32 %v3935_v15 }
 0x2bf   :  { %v6328_v25 = vpop.eup %6327 }
 0x2c0   :  { %v6330_v22 = vpop.eup %6329  ;;  %v1622_v12 = vadd.f32 1.0, %v6328_v25 }
 0x2c1   :  { %v6332_v38 = vpop.eup %6331  ;;  %v1634_v28 = vadd.f32 1.0, %v6330_v22 }
 0x2c2   :  { %v6334_v60 = vpop.eup %6333  ;;  %v1623_v42 = vadd.f32 1.0, %v6332_v38  ;;  %6335 = vrcp.f32 %v1622_v12 }
 0x2c3   :  { %v1635_v54 = vadd.f32 1.0, %v6334_v60  ;;  %6337 = vrcp.f32 %v1634_v28 }
 0x2c4   :  { %6339 = vrcp.f32 %v1623_v42 }
 0x2c5   :  { %6341 = vrcp.f32 %v1635_v54 }
 0x2cc   :  { %v6336_v12 = vpop.eup %6335 }
 0x2cd   :  { %v6338_v60 = vpop.eup %6337 }
 0x2ce   :  { %v6340_v42 = vpop.eup %6339 }
 0x2cf   :  { %v6342_v38 = vpop.eup %6341 }
 0x2f0   :  { %v1532_v58 = vpop.f32.mrb[10].mxu0  ;;  %v1603_v29 = vpop.f32.mrb[26].mxu1 }
 0x2f1   :  { %v6204_v1 = vadd.f32 %v1532_v58, %v8946_v55  ;;  %v6220_v20 = vadd.f32 %v1603_v29, %v7298_v48  ;;  %v1534_v13 = vpop.f32.mrb[11].mxu0  ;;  %v1605_v17 = vpop.f32.mrb[27].mxu1  ;;  %v1654_v29 = vmul.f32 %v6338_v60, %v7294_v3 }
 0x2f2   :  { %v6205_v15 = vadd.f32 %v1534_v13, %v8947_v63  ;;  %v6221_v11 = vadd.f32 %v1605_v17, %v7300_v37  ;;  %v1655_v13 = vmul.f32 %v6342_v38, %v7296_v23  ;;  %v8951_v38 = vld [vmem:[#allocation70_spill] sm:$0xff] }
 0x2f3   :  { %6343 = vtanh.f32 %v6204_v1  ;;  %v3936_v22 = vmul.f32 -1.442695, %v6220_v20 }
 0x2f4   :  { %6345 = vtanh.f32 %v6205_v15  ;;  %v3937_v25 = vmul.f32 -1.442695, %v6221_v11 }
 0x2f5   :  { %6347 = vpow2.f32 %v3936_v22 }
 0x2f6   :  { %6349 = vpow2.f32 %v3937_v25 }
 0x2fd   :  { %v6344_v28 = vpop.eup %6343 }
 0x2fe   :  { %v6346_v58 = vpop.eup %6345  ;;  %v1656_v48 = vmul.f32 %v6344_v28, %v6336_v12  ;;  %v8952_v28 = vld [vmem:[#allocation101_spill] sm:$0xff] }
 0x2ff   :  { %v6348_v54 = vpop.eup %6347  ;;  %v1657_v63 = vmul.f32 %v6346_v58, %v6340_v42  ;;  %v8950_v42 = vld [vmem:[#allocation99_spill] sm:$0xff] }
 0x300   :  { %v6350_v17 = vpop.eup %6349  ;;  %v7450_v1 = vadd.f32 %v1656_v48, %v1654_v29  ;;  %v1648_v20 = vadd.f32 1.0, %v6348_v54  ;;  %v8948_v48 = vld [vmem:[#allocation66_spill] sm:$0xff]  ;;  %v8953_v58 = vld [vmem:[#allocation103_spill] sm:$0xff]  ;;  %v8954_v29 = vld [vmem:[#allocation105_spill] sm:$0xff] }
 0x301   :  { %v7452_v15 = vadd.f32 %v1657_v63, %v1655_v13  ;;  %v1649_v11 = vadd.f32 1.0, %v6350_v17  ;;  %v8949_v63 = vld [vmem:[#allocation97_spill] sm:$0xff]  ;;  %v8955_v54 = vld [vmem:[#allocation107_spill] sm:$0xff] }
 0x302   :  { %6351 = vtanh.f32 %v7450_v1  ;;  %v8956_v13 = vld [vmem:[#allocation109_spill] sm:$0xff]  ;;  %v8957_v17 = vld [vmem:[#allocation111_spill] sm:$0xff] }
 0x303   :  { %6353 = vrcp.f32 %v1648_v20  ;;  %v8958_v20 = vld [vmem:[#allocation113_spill] sm:$0xff] }
 0x304   :  { %6355 = vtanh.f32 %v7452_v15 }
 0x305   :  { %6357 = vrcp.f32 %v1649_v11  ;;  %v8959_v11 = vld [vmem:[#allocation115_spill] sm:$0xff] }
 0x30c   :  { %v6352_v22 = vpop.eup %6351 }
 0x30d   :  { %v6354_v3 = vpop.eup %6353 }
 0x30e   :  { %v6356_v25 = vpop.eup %6355  ;;  %v7456_v23 = vmul.f32 %v6354_v3, %v6352_v22  ;;  %v8960_v22 = vld [vmem:[#allocation117_spill] sm:$0xff]  ;;  %v8961_v3 = vld [vmem:[#allocation119_spill] sm:$0xff] }
 0x30f   :  { %v6358_v12 = vpop.eup %6357 }
 0x310   :  { %v1663_v60 = vmul.f32 %v6358_v12, %v6356_v25  ;;  %v8962_v25 = vld [vmem:[#allocation121_spill] sm:$0xff]  ;;  %v8963_v12 = vld [vmem:[#allocation122_spill] sm:$0xff] }
 0x312   :  { %1739 = vmatprep.mubr.f32.mxu0 %v1663_v60  ;;  %1810 = vmatprep.mubr.f32.mxu1 %v1663_v60 }
 0x313   :  { %1740 = vmatmul.mubr.f32.vlgmr.msra.gmra.mrb[4].mxu0 %v7456_v23  ;;  %1811 = vmatmul.mubr.f32.vlgmr.msra.gmra.mrb[12].mxu1 %v7456_v23 }
 0x314   :  { %4717 = vmatpush1.bf16.msra.mxu0 %v8856_v14  ;;  %4781 = vmatpush1.bf16.msra.mxu1 %v8857_v21 }
 0x315   :  { %1881 = vmatprep.mubr.f32.mxu0 %v1663_v60  ;;  %1952 = vmatprep.mubr.f32.mxu1 %v1663_v60  ;;  %v8964_v60 = vld [vmem:[#allocation123_spill] sm:$0xff] }
 0x316   :  { %4719 = vmatprep.subr.bf16.mxu0 %v8858_v44  ;;  %4783 = vmatprep.subr.bf16.mxu1 %v8859_v35 }
 0x318   :  { %4721 = vmatpush1.bf16.msra.mxu0 %v8860_v49  ;;  %4785 = vmatpush1.bf16.msra.mxu1 %v8861_v30 }
 0x319   :  { %4723 = vmatprep.subr.bf16.mxu0 %v8948_v48  ;;  %4787 = vmatprep.subr.bf16.mxu1 %v8949_v63 }
 0x31c   :  { %4725 = vmatpush1.bf16.msra.mxu0 %v8864_v27  ;;  %4789 = vmatpush1.bf16.msra.mxu1 %v8950_v42 }
 0x31d   :  { %4727 = vmatprep.subr.bf16.mxu0 %v8951_v38  ;;  %4791 = vmatprep.subr.bf16.mxu1 %v8952_v28 }
 0x320   :  { %4729 = vmatpush1.bf16.msra.mxu0 %v8868_v43  ;;  %4793 = vmatpush1.bf16.msra.mxu1 %v8953_v58 }
 0x321   :  { %4731 = vmatprep.subr.bf16.mxu0 %v8870_v36  ;;  %4795 = vmatprep.subr.bf16.mxu1 %v8954_v29 }
 0x324   :  { %4733 = vmatpush1.bf16.msra.mxu0 %v8872_v59  ;;  %4797 = vmatpush1.bf16.msra.mxu1 %v8955_v54 }
 0x325   :  { %4735 = vmatprep.subr.bf16.mxu0 %v8874_v50  ;;  %4799 = vmatprep.subr.bf16.mxu1 %v8956_v13 }
 0x328   :  { %4737 = vmatpush1.bf16.msra.mxu0 %v8875_v2  ;;  %4801 = vmatpush1.bf16.msra.mxu1 %v8957_v17 }
 0x329   :  { %4739 = vmatprep.subr.bf16.mxu0 %v8877_v51  ;;  %4803 = vmatprep.subr.bf16.mxu1 %v8958_v20 }
 0x32c   :  { %4741 = vmatpush1.bf16.msra.mxu0 %v8878_v24  ;;  %4805 = vmatpush1.bf16.msra.mxu1 %v8959_v11 }
 0x32d   :  { %4743 = vmatprep.subr.bf16.mxu0 %v8879_v52  ;;  %4807 = vmatprep.subr.bf16.mxu1 %v8960_v22  ;;  %v8965_v52 = vld [vmem:[#allocation124_spill] sm:$0xff] }
 0x330   :  { %4745 = vmatpush1.bf16.msra.mxu0 %v8880_v18  ;;  %4809 = vmatpush1.bf16.msra.mxu1 %v8961_v3  ;;  %v8966_v18 = vld [vmem:[#allocation125_spill] sm:$0xff] }
 0x331   :  { %4747 = vmatprep.subr.bf16.mxu0 %v8881_v53  ;;  %4811 = vmatprep.subr.bf16.mxu1 %v8962_v25 }
 0x334   :  { %4749 = vmatpush1.bf16.msra.mxu0 %v8882_v56  ;;  %4813 = vmatpush1.bf16.msra.mxu1 %v8963_v12 }
 0x335   :  { %4751 = vmatprep.subr.bf16.mxu0 %v8883_v10  ;;  %4815 = vmatprep.subr.bf16.mxu1 %v8964_v60 }
 0x338   :  { %4753 = vmatpush1.bf16.msra.mxu0 %v8884_v8  ;;  %4817 = vmatpush1.bf16.msra.mxu1 %v8965_v52 }
 0x339   :  { %4755 = vmatprep.subr.bf16.mxu0 %v8885_v19  ;;  %4819 = vmatprep.subr.bf16.mxu1 %v8966_v18  ;;  %v8967_v19 = vld [vmem:[#allocation130_spill] sm:$0xff] }
 0x33c   :  { %4757 = vmatpush1.bf16.msra.mxu0 %v8886_v39  ;;  %4821 = vmatpush1.bf16.msra.mxu1 %v7159_v57  ;;  %v8968_v39 = vld [vmem:[#allocation131_spill] sm:$0xff] }
 0x33d   :  { %4759 = vmatprep.subr.bf16.mxu0 %v8887_v7  ;;  %4823 = vmatprep.subr.bf16.mxu1 %v7163_v6 }
 0x340   :  { %4761 = vmatpush1.bf16.msra.mxu0 %v8888_v9  ;;  %4825 = vmatpush1.bf16.msra.mxu1 %v7167_v34  ;;  %v8969_v9 = vld [vmem:[#allocation133_spill] sm:$0xff] }
 0x341   :  { %4763 = vmatprep.subr.bf16.mxu0 %v8889_v0  ;;  %4827 = vmatprep.subr.bf16.mxu1 %v7171_v62  ;;  %v8970_v0 = vld [vmem:[#allocation134_spill] sm:$0xff] }
 0x344   :  { %4765 = vmatpush1.bf16.msra.mxu0 %v8890_v31  ;;  %4829 = vmatpush1.bf16.msra.mxu1 %v8967_v19  ;;  %v8971_v31 = vld [vmem:[#allocation135_spill] sm:$0xff] }
 0x345   :  { %4767 = vmatprep.subr.bf16.mxu0 %v8891_v5  ;;  %4831 = vmatprep.subr.bf16.mxu1 %v8968_v39  ;;  %v8972_v5 = vld [vmem:[#allocation136_spill] sm:$0xff] }
 0x348   :  { %4769 = vmatpush1.bf16.msra.mxu0 %v7111_v41  ;;  %4833 = vmatpush1.bf16.msra.mxu1 %v7183_v61  ;;  %v8973_v41 = vld [vmem:[#allocation18_spill] sm:$0xff]  ;;  %v9037_v61 = vld [vmem:[#allocation145_spill] sm:$0xff] }
 0x349   :  { %4771 = vmatprep.subr.bf16.mxu0 %v7117_v45  ;;  %4835 = vmatprep.subr.bf16.mxu1 %v8969_v9  ;;  %v8982_v9 = vld [vmem:[#allocation35_spill] sm:$0xff] }
 0x34c   :  { %4773 = vmatpush1.bf16.msra.mxu0 %v7123_v4  ;;  %4837 = vmatpush1.bf16.msra.mxu1 %v8970_v0  ;;  %v8974_v4 = vld [vmem:[#allocation27_spill] sm:$0xff] }
 0x34d   :  { %4775 = vmatprep.subr.bf16.mxu0 %v7129_v40  ;;  %4839 = vmatprep.subr.bf16.mxu1 %v8971_v31  ;;  %v8975_v0 = vld [vmem:[#allocation11_spill] sm:$0xff]  ;;  %v8976_v40 = vld [vmem:[#allocation29_spill] sm:$0xff]  ;;  %v8977_v31 = vld [vmem:[#allocation12_spill] sm:$0xff] }
 0x350   :  { %4777 = vmatpush1.bf16.msra.mxu0 %v8892_v47  ;;  %4841 = vmatpush1.bf16.msra.mxu1 %v8972_v5  ;;  %v8978_v47 = vld [vmem:[#allocation31_spill] sm:$0xff]  ;;  %v8979_v5 = vld [vmem:[#allocation13_spill] sm:$0xff] }
 0x351   :  { %4843 = vmatprep.subr.bf16.mxu0 %v8893_v33  ;;  %4907 = vmatprep.subr.bf16.mxu1 %v8973_v41  ;;  %v8980_v33 = vld [vmem:[#allocation33_spill] sm:$0xff]  ;;  %v8981_v41 = vld [vmem:[#allocation14_spill] sm:$0xff] }
 0x353   :  { %1882 = vmatmul.mubr.f32.vlgmr.msra.gmra.mrb[12].mxu0 %v7456_v23  ;;  %1953 = vmatmul.mubr.f32.vlgmr.msra.gmra.mrb[28].mxu1 %v7456_v23  ;;  %v8983_v23 = vld [vmem:[#allocation15_spill] sm:$0xff] }
 0x354   :  { %4845 = vmatpush1.bf16.msra.mxu0 %v8894_v46  ;;  %4909 = vmatpush1.bf16.msra.mxu1 %v8974_v4  ;;  %v8984_v46 = vld [vmem:[#allocation37_spill] sm:$0xff]  ;;  %v8985_v4 = vld [vmem:[#allocation16_spill] sm:$0xff] }
 0x355   :  { %4847 = vmatprep.subr.bf16.mxu0 %v8975_v0  ;;  %4911 = vmatprep.subr.bf16.mxu1 %v8976_v40  ;;  %v8986_v0 = vld [vmem:[#allocation39_spill] sm:$0xff]  ;;  %v8987_v40 = vld [vmem:[#allocation17_spill] sm:$0xff] }
 0x358   :  { %4849 = vmatpush1.bf16.msra.mxu0 %v8977_v31  ;;  %4913 = vmatpush1.bf16.msra.mxu1 %v8978_v47  ;;  %v8988_v31 = vld [vmem:[#allocation41_spill] sm:$0xff]  ;;  %v8989_v47 = vld [vmem:[#allocation19_spill] sm:$0xff] }
 0x359   :  { %4851 = vmatprep.subr.bf16.mxu0 %v8979_v5  ;;  %4915 = vmatprep.subr.bf16.mxu1 %v8980_v33  ;;  %v8990_v5 = vld [vmem:[#allocation43_spill] sm:$0xff]  ;;  %v8991_v33 = vld [vmem:[#allocation20_spill] sm:$0xff] }
 0x35c   :  { %4853 = vmatpush1.bf16.msra.mxu0 %v8981_v41  ;;  %4917 = vmatpush1.bf16.msra.mxu1 %v8982_v9  ;;  %v8992_v41 = vld [vmem:[#allocation45_spill] sm:$0xff] }
 0x35d   :  { %4855 = vmatprep.subr.bf16.mxu0 %v8983_v23  ;;  %4919 = vmatprep.subr.bf16.mxu1 %v8984_v46  ;;  %v8993_v9 = vld [vmem:[#allocation21_spill] sm:$0xff]  ;;  %v8994_v23 = vld [vmem:[#allocation47_spill] sm:$0xff]  ;;  %v8995_v46 = vld [vmem:[#allocation22_spill] sm:$0xff] }
 0x360   :  { %4857 = vmatpush1.bf16.msra.mxu0 %v8985_v4  ;;  %4921 = vmatpush1.bf16.msra.mxu1 %v8986_v0  ;;  %v8996_v4 = vld [vmem:[#allocation49_spill] sm:$0xff]  ;;  %v8997_v0 = vld [vmem:[#allocation23_spill] sm:$0xff] }
 0x361   :  { %4859 = vmatprep.subr.bf16.mxu0 %v8987_v40  ;;  %4923 = vmatprep.subr.bf16.mxu1 %v8988_v31  ;;  %v8998_v40 = vld [vmem:[#allocation51_spill] sm:$0xff]  ;;  %v8999_v31 = vld [vmem:[#allocation24_spill] sm:$0xff] }
 0x364   :  { %4861 = vmatpush1.bf16.msra.mxu0 %v8989_v47  ;;  %4925 = vmatpush1.bf16.msra.mxu1 %v8990_v5  ;;  %v9000_v47 = vld [vmem:[#allocation53_spill] sm:$0xff] }
 0x365   :  { %4863 = vmatprep.subr.bf16.mxu0 %v8991_v33  ;;  %4927 = vmatprep.subr.bf16.mxu1 %v8992_v41  ;;  %v9001_v5 = vld [vmem:[#allocation25_spill] sm:$0xff]  ;;  %v9002_v33 = vld [vmem:[#allocation55_spill] sm:$0xff]  ;;  %v9003_v41 = vld [vmem:[#allocation26_spill] sm:$0xff] }
 0x368   :  { %4865 = vmatpush1.bf16.msra.mxu0 %v8993_v9  ;;  %4929 = vmatpush1.bf16.msra.mxu1 %v8994_v23  ;;  %v9004_v9 = vld [vmem:[#allocation57_spill] sm:$0xff]  ;;  %v9005_v23 = vld [vmem:[#allocation28_spill] sm:$0xff] }
 0x369   :  { %4867 = vmatprep.subr.bf16.mxu0 %v8995_v46  ;;  %4931 = vmatprep.subr.bf16.mxu1 %v8996_v4  ;;  %v9006_v46 = vld [vmem:[#allocation59_spill] sm:$0xff]  ;;  %v9007_v4 = vld [vmem:[#allocation30_spill] sm:$0xff] }
 0x36c   :  { %4869 = vmatpush1.bf16.msra.mxu0 %v8997_v0  ;;  %4933 = vmatpush1.bf16.msra.mxu1 %v8998_v40  ;;  %v9008_v0 = vld [vmem:[#allocation61_spill] sm:$0xff]  ;;  %v9009_v40 = vld [vmem:[#allocation32_spill] sm:$0xff] }
 0x36d   :  { %4871 = vmatprep.subr.bf16.mxu0 %v8999_v31  ;;  %4935 = vmatprep.subr.bf16.mxu1 %v9000_v47  ;;  %v9010_v31 = vld [vmem:[#allocation63_spill] sm:$0xff]  ;;  %v9011_v47 = vld [vmem:[#allocation34_spill] sm:$0xff] }
 0x370   :  { %4873 = vmatpush1.bf16.msra.mxu0 %v9001_v5  ;;  %4937 = vmatpush1.bf16.msra.mxu1 %v9002_v33  ;;  %v9012_v5 = vld [vmem:[#allocation65_spill] sm:$0xff]  ;;  %v9013_v33 = vld [vmem:[#allocation36_spill] sm:$0xff] }
 0x371   :  { %4875 = vmatprep.subr.bf16.mxu0 %v9003_v41  ;;  %4939 = vmatprep.subr.bf16.mxu1 %v9004_v9  ;;  %v9014_v41 = vld [vmem:[#allocation67_spill] sm:$0xff]  ;;  %v9015_v9 = vld [vmem:[#allocation38_spill] sm:$0xff] }
 0x374   :  { %4877 = vmatpush1.bf16.msra.mxu0 %v9005_v23  ;;  %4941 = vmatpush1.bf16.msra.mxu1 %v9006_v46  ;;  %v9016_v23 = vld [vmem:[#allocation69_spill] sm:$0xff]  ;;  %v9017_v46 = vld [vmem:[#allocation40_spill] sm:$0xff] }
 0x375   :  { %4879 = vmatprep.subr.bf16.mxu0 %v9007_v4  ;;  %4943 = vmatprep.subr.bf16.mxu1 %v9008_v0  ;;  %v9018_v4 = vld [vmem:[#allocation71_spill] sm:$0xff]  ;;  %v9019_v0 = vld [vmem:[#allocation42_spill] sm:$0xff] }
 0x378   :  { %4881 = vmatpush1.bf16.msra.mxu0 %v9009_v40  ;;  %4945 = vmatpush1.bf16.msra.mxu1 %v9010_v31  ;;  %v9020_v40 = vld [vmem:[#allocation73_spill] sm:$0xff]  ;;  %v9021_v31 = vld [vmem:[#allocation44_spill] sm:$0xff] }
 0x379   :  { %4883 = vmatprep.subr.bf16.mxu0 %v9011_v47  ;;  %4947 = vmatprep.subr.bf16.mxu1 %v9012_v5  ;;  %v9022_v47 = vld [vmem:[#allocation75_spill] sm:$0xff]  ;;  %v9023_v5 = vld [vmem:[#allocation46_spill] sm:$0xff] }
 0x37c   :  { %4885 = vmatpush1.bf16.msra.mxu0 %v9013_v33  ;;  %4949 = vmatpush1.bf16.msra.mxu1 %v9014_v41  ;;  %v9024_v33 = vld [vmem:[#allocation77_spill] sm:$0xff]  ;;  %v9025_v41 = vld [vmem:[#allocation48_spill] sm:$0xff] }
 0x37d   :  { %4887 = vmatprep.subr.bf16.mxu0 %v9015_v9  ;;  %4951 = vmatprep.subr.bf16.mxu1 %v9016_v23  ;;  %v9026_v9 = vld [vmem:[#allocation79_spill] sm:$0xff]  ;;  %v9027_v23 = vld [vmem:[#allocation50_spill] sm:$0xff] }
 0x380   :  { %4889 = vmatpush1.bf16.msra.mxu0 %v9017_v46  ;;  %4953 = vmatpush1.bf16.msra.mxu1 %v9018_v4  ;;  %v9028_v46 = vld [vmem:[#allocation81_spill] sm:$0xff]  ;;  %v9029_v4 = vld [vmem:[#allocation52_spill] sm:$0xff] }
 0x381   :  { %4891 = vmatprep.subr.bf16.mxu0 %v9019_v0  ;;  %4955 = vmatprep.subr.bf16.mxu1 %v9020_v40  ;;  %v9030_v0 = vld [vmem:[#allocation83_spill] sm:$0xff]  ;;  %v9031_v40 = vld [vmem:[#allocation54_spill] sm:$0xff] }
 0x384   :  { %4893 = vmatpush1.bf16.msra.mxu0 %v9021_v31  ;;  %4957 = vmatpush1.bf16.msra.mxu1 %v9022_v47  ;;  %v9032_v31 = vld [vmem:[#allocation85_spill] sm:$0xff]  ;;  %v9033_v47 = vld [vmem:[#allocation56_spill] sm:$0xff] }
 0x385   :  { %4895 = vmatprep.subr.bf16.mxu0 %v9023_v5  ;;  %4959 = vmatprep.subr.bf16.mxu1 %v9024_v33  ;;  %v9034_v5 = vld [vmem:[#allocation87_spill] sm:$0xff]  ;;  %v9035_v33 = vld [vmem:[#allocation58_spill] sm:$0xff] }
 0x388   :  { %4897 = vmatpush1.bf16.msra.mxu0 %v9025_v41  ;;  %4961 = vmatpush1.bf16.msra.mxu1 %v9026_v9  ;;  %v9036_v41 = vld [vmem:[#allocation89_spill] sm:$0xff] }
 0x389   :  { %4899 = vmatprep.subr.bf16.mxu0 %v9027_v23  ;;  %4963 = vmatprep.subr.bf16.mxu1 %v9028_v46 }
 0x38c   :  { %4901 = vmatpush1.bf16.msra.mxu0 %v9029_v4  ;;  %4965 = vmatpush1.bf16.msra.mxu1 %v9030_v0 }
 0x38d   :  { %4903 = vmatprep.subr.bf16.mxu0 %v9031_v40  ;;  %4967 = vmatprep.subr.bf16.mxu1 %v9032_v31 }
 0x390   :  { %4905 = vmatpush1.bf16.msra.mxu0 %v9033_v47  ;;  %4969 = vmatpush1.bf16.msra.mxu1 %v9034_v5 }
 0x391   :  { %4971 = vmatprep.subr.bf16.mxu0 %v9035_v33  ;;  %5035 = vmatprep.subr.bf16.mxu1 %v9036_v41 }
 0x3e6   :  { %v1741_v9 = vpop.f32.mrb[4].mxu0  ;;  %v1812_v23 = vpop.f32.mrb[12].mxu1 }
 0x3e7   :  { %v1743_v45 = vpop.f32.mrb[5].mxu0  ;;  %v1814_v46 = vpop.f32.mrb[13].mxu1  ;;  %v6166_v4 = vadd.f32 %v1741_v9, %v9037_v61  ;;  %v6190_v0 = vadd.f32 %v1812_v23, %v7278_v26 }
 0x3e8   :  { %v6167_v40 = vadd.f32 %v1743_v45, %v8944_v16  ;;  %v6191_v31 = vadd.f32 %v1814_v46, %v8945_v32 }
 0x3e9   :  { %v3938_v39 = vmul.f32 -1.442695, %v6166_v4  ;;  %v3940_v47 = vmul.f32 -1.442695, %v6190_v0  ;;  %v9039_v0 = vld [vmem:[#allocation149_spill] sm:$0xff] }
 0x3ea   :  { %v3939_v19 = vmul.f32 -1.442695, %v6167_v40  ;;  %v3941_v5 = vmul.f32 -1.442695, %v6191_v31  ;;  %v9038_v40 = vld [vmem:[#allocation150_spill] sm:$0xff] }
 0x3eb   :  { %6359 = vpow2.f32 %v3938_v39 }
 0x3ec   :  { %6361 = vpow2.f32 %v3940_v47 }
 0x3ed   :  { %6363 = vpow2.f32 %v3939_v19 }
 0x3ee   :  { %6365 = vpow2.f32 %v3941_v5 }
 0x3f5   :  { %v6360_v41 = vpop.eup %6359 }
 0x3f6   :  { %v6362_v33 = vpop.eup %6361  ;;  %v1973_v6 = vadd.f32 1.0, %v6360_v41 }
 0x3f7   :  { %v6364_v62 = vpop.eup %6363  ;;  %v1985_v9 = vadd.f32 1.0, %v6362_v33 }
 0x3f8   :  { %v6366_v34 = vpop.eup %6365  ;;  %v1974_v61 = vadd.f32 1.0, %v6364_v62  ;;  %6367 = vrcp.f32 %v1973_v6 }
 0x3f9   :  { %v1986_v23 = vadd.f32 1.0, %v6366_v34  ;;  %6369 = vrcp.f32 %v1985_v9 }
 0x3fa   :  { %6371 = vrcp.f32 %v1974_v61 }
 0x3fb   :  { %6373 = vrcp.f32 %v1986_v23 }
 0x402   :  { %v6368_v6 = vpop.eup %6367 }
 0x403   :  { %v6370_v62 = vpop.eup %6369 }
 0x404   :  { %v6372_v61 = vpop.eup %6371 }
 0x405   :  { %v6374_v33 = vpop.eup %6373 }
 0x426   :  { %v1883_v45 = vpop.f32.mrb[12].mxu0  ;;  %v1954_v46 = vpop.f32.mrb[28].mxu1 }
 0x427   :  { %v6206_v4 = vadd.f32 %v1883_v45, %v8946_v55  ;;  %v6222_v39 = vadd.f32 %v1954_v46, %v9038_v40  ;;  %v1885_v47 = vpop.f32.mrb[13].mxu0  ;;  %v1956_v19 = vpop.f32.mrb[29].mxu1  ;;  %v2005_v46 = vmul.f32 %v6370_v62, %v7450_v1 }
 0x428   :  { %v6207_v31 = vadd.f32 %v1885_v47, %v9039_v0  ;;  %v6223_v5 = vadd.f32 %v1956_v19, %v7300_v37  ;;  %v2006_v47 = vmul.f32 %v6374_v33, %v7452_v15  ;;  %v9043_v33 = vld [vmem:[#allocation100_spill] sm:$0xff] }
 0x429   :  { %6375 = vtanh.f32 %v6206_v4  ;;  %v3942_v41 = vmul.f32 -1.442695, %v6222_v39 }
 0x42a   :  { %6377 = vtanh.f32 %v6207_v31  ;;  %v3943_v34 = vmul.f32 -1.442695, %v6223_v5 }
 0x42b   :  { %6379 = vpow2.f32 %v3942_v41 }
 0x42c   :  { %6381 = vpow2.f32 %v3943_v34 }
 0x433   :  { %v6376_v9 = vpop.eup %6375 }
 0x434   :  { %v6378_v45 = vpop.eup %6377  ;;  %v2007_v40 = vmul.f32 %v6376_v9, %v6368_v6  ;;  %v9044_v9 = vld [vmem:[#allocation127_spill] sm:$0xff] }
 0x435   :  { %v6380_v23 = vpop.eup %6379  ;;  %v2008_v0 = vmul.f32 %v6378_v45, %v6372_v61  ;;  %v9042_v61 = vld [vmem:[#allocation98_spill] sm:$0xff]  ;;  %v9045_v45 = vld [vmem:[#allocation104_spill] sm:$0xff] }
 0x436   :  { %v6382_v19 = vpop.eup %6381  ;;  %v7600_v4 = vadd.f32 %v2007_v40, %v2005_v46  ;;  %v1999_v39 = vadd.f32 1.0, %v6380_v23  ;;  %v9040_v40 = vld [vmem:[#allocation86_spill] sm:$0xff]  ;;  %v9046_v46 = vld [vmem:[#allocation128_spill] sm:$0xff] }
 0x437   :  { %v7602_v31 = vadd.f32 %v2008_v0, %v2006_v47  ;;  %v2000_v5 = vadd.f32 1.0, %v6382_v19  ;;  %v9041_v0 = vld [vmem:[#allocation88_spill] sm:$0xff]  ;;  %v9047_v23 = vld [vmem:[#allocation106_spill] sm:$0xff]  ;;  %v9048_v47 = vld [vmem:[#allocation129_spill] sm:$0xff] }
 0x438   :  { %6383 = vtanh.f32 %v7600_v4  ;;  %v9049_v19 = vld [vmem:[#allocation108_spill] sm:$0xff] }
 0x439   :  { %6385 = vrcp.f32 %v1999_v39  ;;  %v9050_v39 = vld [vmem:[#allocation130_spill] sm:$0xff] }
 0x43a   :  { %6387 = vtanh.f32 %v7602_v31 }
 0x43b   :  { %6389 = vrcp.f32 %v2000_v5  ;;  %v9051_v5 = vld [vmem:[#allocation110_spill] sm:$0xff] }
 0x442   :  { %v6384_v41 = vpop.eup %6383 }
 0x443   :  { %v6386_v1 = vpop.eup %6385 }
 0x444   :  { %v6388_v34 = vpop.eup %6387  ;;  %v7606_v15 = vmul.f32 %v6386_v1, %v6384_v41  ;;  %v9052_v41 = vld [vmem:[#allocation131_spill] sm:$0xff]  ;;  %v9053_v1 = vld [vmem:[#allocation112_spill] sm:$0xff] }
 0x445   :  { %v6390_v6 = vpop.eup %6389 }
 0x446   :  { %v2014_v62 = vmul.f32 %v6390_v6, %v6388_v34  ;;  %v9054_v34 = vld [vmem:[#allocation132_spill] sm:$0xff]  ;;  %v9055_v6 = vld [vmem:[#allocation114_spill] sm:$0xff] }
 0x448   :  { %2090 = vmatprep.mubr.f32.mxu0 %v2014_v62  ;;  %2161 = vmatprep.mubr.f32.mxu1 %v2014_v62 }
 0x449   :  { %2091 = vmatmul.mubr.f32.vlgmr.msra.gmra.mrb[6].mxu0 %v7606_v15  ;;  %2162 = vmatmul.mubr.f32.vlgmr.msra.gmra.mrb[14].mxu1 %v7606_v15 }
 0x44a   :  { %4973 = vmatpush1.bf16.msra.mxu0 %v8856_v14  ;;  %5037 = vmatpush1.bf16.msra.mxu1 %v8857_v21 }
 0x44b   :  { %2232 = vmatprep.mubr.f32.mxu0 %v2014_v62  ;;  %2303 = vmatprep.mubr.f32.mxu1 %v2014_v62  ;;  %v9056_v62 = vld [vmem:[#allocation133_spill] sm:$0xff] }
 0x44c   :  { %4975 = vmatprep.subr.bf16.mxu0 %v8858_v44  ;;  %5039 = vmatprep.subr.bf16.mxu1 %v8859_v35 }
 0x44e   :  { %4977 = vmatpush1.bf16.msra.mxu0 %v8860_v49  ;;  %5041 = vmatpush1.bf16.msra.mxu1 %v8861_v30 }
 0x44f   :  { %4979 = vmatprep.subr.bf16.mxu0 %v8948_v48  ;;  %5043 = vmatprep.subr.bf16.mxu1 %v8949_v63 }
 0x452   :  { %4981 = vmatpush1.bf16.msra.mxu0 %v8864_v27  ;;  %5045 = vmatpush1.bf16.msra.mxu1 %v8950_v42 }
 0x453   :  { %4983 = vmatprep.subr.bf16.mxu0 %v8951_v38  ;;  %5047 = vmatprep.subr.bf16.mxu1 %v8952_v28 }
 0x456   :  { %4985 = vmatpush1.bf16.msra.mxu0 %v8868_v43  ;;  %5049 = vmatpush1.bf16.msra.mxu1 %v8953_v58 }
 0x457   :  { %4987 = vmatprep.subr.bf16.mxu0 %v8870_v36  ;;  %5051 = vmatprep.subr.bf16.mxu1 %v8954_v29 }
 0x45a   :  { %4989 = vmatpush1.bf16.msra.mxu0 %v8872_v59  ;;  %5053 = vmatpush1.bf16.msra.mxu1 %v8955_v54 }
 0x45b   :  { %4991 = vmatprep.subr.bf16.mxu0 %v8874_v50  ;;  %5055 = vmatprep.subr.bf16.mxu1 %v8956_v13 }
 0x45e   :  { %4993 = vmatpush1.bf16.msra.mxu0 %v8875_v2  ;;  %5057 = vmatpush1.bf16.msra.mxu1 %v8957_v17 }
 0x45f   :  { %4995 = vmatprep.subr.bf16.mxu0 %v8877_v51  ;;  %5059 = vmatprep.subr.bf16.mxu1 %v8958_v20 }
 0x462   :  { %4997 = vmatpush1.bf16.msra.mxu0 %v8878_v24  ;;  %5061 = vmatpush1.bf16.msra.mxu1 %v8959_v11 }
 0x463   :  { %4999 = vmatprep.subr.bf16.mxu0 %v9040_v40  ;;  %5063 = vmatprep.subr.bf16.mxu1 %v8960_v22 }
 0x466   :  { %5001 = vmatpush1.bf16.msra.mxu0 %v9041_v0  ;;  %5065 = vmatpush1.bf16.msra.mxu1 %v8961_v3 }
 0x467   :  { %5003 = vmatprep.subr.bf16.mxu0 %v8881_v53  ;;  %5067 = vmatprep.subr.bf16.mxu1 %v8962_v25 }
 0x46a   :  { %5005 = vmatpush1.bf16.msra.mxu0 %v8882_v56  ;;  %5069 = vmatpush1.bf16.msra.mxu1 %v8963_v12 }
 0x46b   :  { %5007 = vmatprep.subr.bf16.mxu0 %v8883_v10  ;;  %5071 = vmatprep.subr.bf16.mxu1 %v8964_v60 }
 0x46e   :  { %5009 = vmatpush1.bf16.msra.mxu0 %v8884_v8  ;;  %5073 = vmatpush1.bf16.msra.mxu1 %v8965_v52 }
 0x46f   :  { %5011 = vmatprep.subr.bf16.mxu0 %v9042_v61  ;;  %5075 = vmatprep.subr.bf16.mxu1 %v8966_v18 }
 0x472   :  { %5013 = vmatpush1.bf16.msra.mxu0 %v9043_v33  ;;  %5077 = vmatpush1.bf16.msra.mxu1 %v7159_v57 }
 0x473   :  { %5015 = vmatprep.subr.bf16.mxu0 %v8887_v7  ;;  %5079 = vmatprep.subr.bf16.mxu1 %v9044_v9 }
 0x476   :  { %5017 = vmatpush1.bf16.msra.mxu0 %v9045_v45  ;;  %5081 = vmatpush1.bf16.msra.mxu1 %v9046_v46  ;;  %v9057_v46 = vld [vmem:[#allocation116_spill] sm:$0xff]  ;;  %v9129_v45 = vld [vmem:[#allocation145_spill] sm:$0xff] }
 0x477   :  { %5019 = vmatprep.subr.bf16.mxu0 %v9047_v23  ;;  %5083 = vmatprep.subr.bf16.mxu1 %v9048_v47  ;;  %v9058_v23 = vld [vmem:[#allocation134_spill] sm:$0xff] }
 0x478   :  { %v9059_v47 = vld [vmem:[#allocation118_spill] sm:$0xff] }
 0x47a   :  { %5021 = vmatpush1.bf16.msra.mxu0 %v9049_v19  ;;  %5085 = vmatpush1.bf16.msra.mxu1 %v9050_v39  ;;  %v9060_v19 = vld [vmem:[#allocation135_spill] sm:$0xff]  ;;  %v9061_v39 = vld [vmem:[#allocation120_spill] sm:$0xff] }
 0x47b   :  { %5023 = vmatprep.subr.bf16.mxu0 %v9051_v5  ;;  %5087 = vmatprep.subr.bf16.mxu1 %v9052_v41  ;;  %v9062_v5 = vld [vmem:[#allocation136_spill] sm:$0xff]  ;;  %v9063_v41 = vld [vmem:[#allocation9_spill] sm:$0xff] }
 0x47e   :  { %5025 = vmatpush1.bf16.msra.mxu0 %v9053_v1  ;;  %5089 = vmatpush1.bf16.msra.mxu1 %v9054_v34  ;;  %v9064_v1 = vld [vmem:[#allocation18_spill] sm:$0xff] }
 0x47f   :  { %5027 = vmatprep.subr.bf16.mxu0 %v9055_v6  ;;  %5091 = vmatprep.subr.bf16.mxu1 %v9056_v62  ;;  %v9065_v62 = vld [vmem:[#allocation10_spill] sm:$0xff]  ;;  %v9074_v6 = vld [vmem:[#allocation35_spill] sm:$0xff] }
 0x482   :  { %5029 = vmatpush1.bf16.msra.mxu0 %v9057_v46  ;;  %5093 = vmatpush1.bf16.msra.mxu1 %v9058_v23  ;;  %v9066_v46 = vld [vmem:[#allocation27_spill] sm:$0xff] }
 0x483   :  { %5031 = vmatprep.subr.bf16.mxu0 %v9059_v47  ;;  %5095 = vmatprep.subr.bf16.mxu1 %v9060_v19  ;;  %v9067_v23 = vld [vmem:[#allocation11_spill] sm:$0xff]  ;;  %v9068_v47 = vld [vmem:[#allocation29_spill] sm:$0xff]  ;;  %v9069_v19 = vld [vmem:[#allocation12_spill] sm:$0xff] }
 0x486   :  { %5033 = vmatpush1.bf16.msra.mxu0 %v9061_v39  ;;  %5097 = vmatpush1.bf16.msra.mxu1 %v9062_v5  ;;  %v9070_v39 = vld [vmem:[#allocation31_spill] sm:$0xff]  ;;  %v9071_v5 = vld [vmem:[#allocation13_spill] sm:$0xff] }
 0x487   :  { %5099 = vmatprep.subr.bf16.mxu0 %v9063_v41  ;;  %5163 = vmatprep.subr.bf16.mxu1 %v9064_v1  ;;  %v9072_v41 = vld [vmem:[#allocation33_spill] sm:$0xff]  ;;  %v9073_v1 = vld [vmem:[#allocation14_spill] sm:$0xff] }
 0x489   :  { %2233 = vmatmul.mubr.f32.vlgmr.msra.gmra.mrb[14].mxu0 %v7606_v15  ;;  %2304 = vmatmul.mubr.f32.vlgmr.msra.gmra.mrb[30].mxu1 %v7606_v15  ;;  %v9075_v15 = vld [vmem:[#allocation15_spill] sm:$0xff] }
 0x48a   :  { %5101 = vmatpush1.bf16.msra.mxu0 %v9065_v62  ;;  %5165 = vmatpush1.bf16.msra.mxu1 %v9066_v46  ;;  %v9076_v62 = vld [vmem:[#allocation37_spill] sm:$0xff]  ;;  %v9077_v46 = vld [vmem:[#allocation16_spill] sm:$0xff] }
 0x48b   :  { %5103 = vmatprep.subr.bf16.mxu0 %v9067_v23  ;;  %5167 = vmatprep.subr.bf16.mxu1 %v9068_v47  ;;  %v9078_v23 = vld [vmem:[#allocation39_spill] sm:$0xff]  ;;  %v9079_v47 = vld [vmem:[#allocation17_spill] sm:$0xff] }
 0x48e   :  { %5105 = vmatpush1.bf16.msra.mxu0 %v9069_v19  ;;  %5169 = vmatpush1.bf16.msra.mxu1 %v9070_v39  ;;  %v9080_v19 = vld [vmem:[#allocation41_spill] sm:$0xff]  ;;  %v9081_v39 = vld [vmem:[#allocation19_spill] sm:$0xff] }
 0x48f   :  { %5107 = vmatprep.subr.bf16.mxu0 %v9071_v5  ;;  %5171 = vmatprep.subr.bf16.mxu1 %v9072_v41  ;;  %v9082_v5 = vld [vmem:[#allocation43_spill] sm:$0xff]  ;;  %v9083_v41 = vld [vmem:[#allocation20_spill] sm:$0xff] }
 0x492   :  { %5109 = vmatpush1.bf16.msra.mxu0 %v9073_v1  ;;  %5173 = vmatpush1.bf16.msra.mxu1 %v9074_v6  ;;  %v9084_v1 = vld [vmem:[#allocation45_spill] sm:$0xff] }
 0x493   :  { %5111 = vmatprep.subr.bf16.mxu0 %v9075_v15  ;;  %5175 = vmatprep.subr.bf16.mxu1 %v9076_v62  ;;  %v9085_v6 = vld [vmem:[#allocation21_spill] sm:$0xff]  ;;  %v9086_v15 = vld [vmem:[#allocation47_spill] sm:$0xff]  ;;  %v9087_v62 = vld [vmem:[#allocation22_spill] sm:$0xff] }
 0x496   :  { %5113 = vmatpush1.bf16.msra.mxu0 %v9077_v46  ;;  %5177 = vmatpush1.bf16.msra.mxu1 %v9078_v23  ;;  %v9088_v46 = vld [vmem:[#allocation49_spill] sm:$0xff]  ;;  %v9089_v23 = vld [vmem:[#allocation23_spill] sm:$0xff] }
 0x497   :  { %5115 = vmatprep.subr.bf16.mxu0 %v9079_v47  ;;  %5179 = vmatprep.subr.bf16.mxu1 %v9080_v19  ;;  %v9090_v47 = vld [vmem:[#allocation51_spill] sm:$0xff]  ;;  %v9091_v19 = vld [vmem:[#allocation24_spill] sm:$0xff] }
 0x49a   :  { %5117 = vmatpush1.bf16.msra.mxu0 %v9081_v39  ;;  %5181 = vmatpush1.bf16.msra.mxu1 %v9082_v5  ;;  %v9092_v39 = vld [vmem:[#allocation53_spill] sm:$0xff] }
 0x49b   :  { %5119 = vmatprep.subr.bf16.mxu0 %v9083_v41  ;;  %5183 = vmatprep.subr.bf16.mxu1 %v9084_v1  ;;  %v9093_v5 = vld [vmem:[#allocation25_spill] sm:$0xff]  ;;  %v9094_v41 = vld [vmem:[#allocation55_spill] sm:$0xff]  ;;  %v9095_v1 = vld [vmem:[#allocation26_spill] sm:$0xff] }
 0x49e   :  { %5121 = vmatpush1.bf16.msra.mxu0 %v9085_v6  ;;  %5185 = vmatpush1.bf16.msra.mxu1 %v9086_v15  ;;  %v9096_v6 = vld [vmem:[#allocation57_spill] sm:$0xff]  ;;  %v9097_v15 = vld [vmem:[#allocation28_spill] sm:$0xff] }
 0x49f   :  { %5123 = vmatprep.subr.bf16.mxu0 %v9087_v62  ;;  %5187 = vmatprep.subr.bf16.mxu1 %v9088_v46  ;;  %v9098_v62 = vld [vmem:[#allocation59_spill] sm:$0xff]  ;;  %v9099_v46 = vld [vmem:[#allocation30_spill] sm:$0xff] }
 0x4a2   :  { %5125 = vmatpush1.bf16.msra.mxu0 %v9089_v23  ;;  %5189 = vmatpush1.bf16.msra.mxu1 %v9090_v47  ;;  %v9100_v23 = vld [vmem:[#allocation61_spill] sm:$0xff]  ;;  %v9101_v47 = vld [vmem:[#allocation32_spill] sm:$0xff] }
 0x4a3   :  { %5127 = vmatprep.subr.bf16.mxu0 %v9091_v19  ;;  %5191 = vmatprep.subr.bf16.mxu1 %v9092_v39  ;;  %v9102_v19 = vld [vmem:[#allocation63_spill] sm:$0xff]  ;;  %v9103_v39 = vld [vmem:[#allocation34_spill] sm:$0xff] }
 0x4a6   :  { %5129 = vmatpush1.bf16.msra.mxu0 %v9093_v5  ;;  %5193 = vmatpush1.bf16.msra.mxu1 %v9094_v41  ;;  %v9104_v5 = vld [vmem:[#allocation65_spill] sm:$0xff]  ;;  %v9105_v41 = vld [vmem:[#allocation36_spill] sm:$0xff] }
 0x4a7   :  { %5131 = vmatprep.subr.bf16.mxu0 %v9095_v1  ;;  %5195 = vmatprep.subr.bf16.mxu1 %v9096_v6  ;;  %v9106_v1 = vld [vmem:[#allocation67_spill] sm:$0xff]  ;;  %v9107_v6 = vld [vmem:[#allocation38_spill] sm:$0xff] }
 0x4aa   :  { %5133 = vmatpush1.bf16.msra.mxu0 %v9097_v15  ;;  %5197 = vmatpush1.bf16.msra.mxu1 %v9098_v62  ;;  %v9108_v15 = vld [vmem:[#allocation69_spill] sm:$0xff]  ;;  %v9109_v62 = vld [vmem:[#allocation40_spill] sm:$0xff] }
 0x4ab   :  { %5135 = vmatprep.subr.bf16.mxu0 %v9099_v46  ;;  %5199 = vmatprep.subr.bf16.mxu1 %v9100_v23  ;;  %v9110_v46 = vld [vmem:[#allocation71_spill] sm:$0xff]  ;;  %v9111_v23 = vld [vmem:[#allocation42_spill] sm:$0xff] }
 0x4ae   :  { %5137 = vmatpush1.bf16.msra.mxu0 %v9101_v47  ;;  %5201 = vmatpush1.bf16.msra.mxu1 %v9102_v19  ;;  %v9112_v47 = vld [vmem:[#allocation73_spill] sm:$0xff]  ;;  %v9113_v19 = vld [vmem:[#allocation44_spill] sm:$0xff] }
 0x4af   :  { %5139 = vmatprep.subr.bf16.mxu0 %v9103_v39  ;;  %5203 = vmatprep.subr.bf16.mxu1 %v9104_v5  ;;  %v9114_v39 = vld [vmem:[#allocation75_spill] sm:$0xff]  ;;  %v9115_v5 = vld [vmem:[#allocation46_spill] sm:$0xff] }
 0x4b2   :  { %5141 = vmatpush1.bf16.msra.mxu0 %v9105_v41  ;;  %5205 = vmatpush1.bf16.msra.mxu1 %v9106_v1  ;;  %v9116_v41 = vld [vmem:[#allocation77_spill] sm:$0xff]  ;;  %v9117_v1 = vld [vmem:[#allocation48_spill] sm:$0xff] }
 0x4b3   :  { %5143 = vmatprep.subr.bf16.mxu0 %v9107_v6  ;;  %5207 = vmatprep.subr.bf16.mxu1 %v9108_v15  ;;  %v9118_v6 = vld [vmem:[#allocation79_spill] sm:$0xff]  ;;  %v9119_v15 = vld [vmem:[#allocation50_spill] sm:$0xff] }
 0x4b6   :  { %5145 = vmatpush1.bf16.msra.mxu0 %v9109_v62  ;;  %5209 = vmatpush1.bf16.msra.mxu1 %v9110_v46  ;;  %v9120_v62 = vld [vmem:[#allocation81_spill] sm:$0xff]  ;;  %v9121_v46 = vld [vmem:[#allocation52_spill] sm:$0xff] }
 0x4b7   :  { %5147 = vmatprep.subr.bf16.mxu0 %v9111_v23  ;;  %5211 = vmatprep.subr.bf16.mxu1 %v9112_v47  ;;  %v9122_v23 = vld [vmem:[#allocation83_spill] sm:$0xff]  ;;  %v9123_v47 = vld [vmem:[#allocation54_spill] sm:$0xff] }
 0x4ba   :  { %5149 = vmatpush1.bf16.msra.mxu0 %v9113_v19  ;;  %5213 = vmatpush1.bf16.msra.mxu1 %v9114_v39  ;;  %v9124_v19 = vld [vmem:[#allocation85_spill] sm:$0xff]  ;;  %v9125_v39 = vld [vmem:[#allocation56_spill] sm:$0xff] }
 0x4bb   :  { %5151 = vmatprep.subr.bf16.mxu0 %v9115_v5  ;;  %5215 = vmatprep.subr.bf16.mxu1 %v9116_v41  ;;  %v9126_v5 = vld [vmem:[#allocation87_spill] sm:$0xff]  ;;  %v9127_v41 = vld [vmem:[#allocation58_spill] sm:$0xff] }
 0x4be   :  { %5153 = vmatpush1.bf16.msra.mxu0 %v9117_v1  ;;  %5217 = vmatpush1.bf16.msra.mxu1 %v9118_v6  ;;  %v9128_v1 = vld [vmem:[#allocation89_spill] sm:$0xff] }
 0x4bf   :  { %5155 = vmatprep.subr.bf16.mxu0 %v9119_v15  ;;  %5219 = vmatprep.subr.bf16.mxu1 %v9120_v62 }
 0x4c2   :  { %5157 = vmatpush1.bf16.msra.mxu0 %v9121_v46  ;;  %5221 = vmatpush1.bf16.msra.mxu1 %v9122_v23 }
 0x4c3   :  { %5159 = vmatprep.subr.bf16.mxu0 %v9123_v47  ;;  %5223 = vmatprep.subr.bf16.mxu1 %v9124_v19 }
 0x4c6   :  { %5161 = vmatpush1.bf16.msra.mxu0 %v9125_v39  ;;  %5225 = vmatpush1.bf16.msra.mxu1 %v9126_v5 }
 0x4c7   :  { %5227 = vmatprep.subr.bf16.mxu0 %v9127_v41  ;;  %5291 = vmatprep.subr.bf16.mxu1 %v9128_v1 }
 0x51c   :  { %v2092_v6 = vpop.f32.mrb[6].mxu0  ;;  %v2163_v15 = vpop.f32.mrb[14].mxu1 }
 0x51d   :  { %v2094_v34 = vpop.f32.mrb[7].mxu0  ;;  %v2165_v62 = vpop.f32.mrb[15].mxu1  ;;  %v6168_v46 = vadd.f32 %v2092_v6, %v9129_v45  ;;  %v6192_v23 = vadd.f32 %v2163_v15, %v7278_v26 }
 0x51e   :  { %v6169_v47 = vadd.f32 %v2094_v34, %v8944_v16  ;;  %v6193_v19 = vadd.f32 %v2165_v62, %v8945_v32 }
 0x51f   :  { %v3944_v9 = vmul.f32 -1.442695, %v6168_v46  ;;  %v3946_v39 = vmul.f32 -1.442695, %v6192_v23  ;;  %v9130_v23 = vld [vmem:[#allocation150_spill] sm:$0xff] }
 0x520   :  { %v3945_v7 = vmul.f32 -1.442695, %v6169_v47  ;;  %v3947_v5 = vmul.f32 -1.442695, %v6193_v19  ;;  %v9131_v19 = vld [vmem:[#allocation149_spill] sm:$0xff] }
 0x521   :  { %6391 = vpow2.f32 %v3944_v9 }
 0x522   :  { %6393 = vpow2.f32 %v3946_v39 }
 0x523   :  { %6395 = vpow2.f32 %v3945_v7 }
 0x524   :  { %6397 = vpow2.f32 %v3947_v5 }
 0x52b   :  { %v6392_v1 = vpop.eup %6391 }
 0x52c   :  { %v6394_v41 = vpop.eup %6393  ;;  %v2324_v18 = vadd.f32 1.0, %v6392_v1 }
 0x52d   :  { %v6396_v57 = vpop.eup %6395  ;;  %v2336_v6 = vadd.f32 1.0, %v6394_v41 }
 0x52e   :  { %v6398_v33 = vpop.eup %6397  ;;  %v2325_v45 = vadd.f32 1.0, %v6396_v57  ;;  %6399 = vrcp.f32 %v2324_v18 }
 0x52f   :  { %v2337_v15 = vadd.f32 1.0, %v6398_v33  ;;  %6401 = vrcp.f32 %v2336_v6 }
 0x530   :  { %6403 = vrcp.f32 %v2325_v45 }
 0x531   :  { %6405 = vrcp.f32 %v2337_v15 }
 0x538   :  { %v6400_v18 = vpop.eup %6399 }
 0x539   :  { %v6402_v33 = vpop.eup %6401 }
 0x53a   :  { %v6404_v45 = vpop.eup %6403 }
 0x53b   :  { %v6406_v1 = vpop.eup %6405 }
 0x55c   :  { %v2234_v34 = vpop.f32.mrb[14].mxu0  ;;  %v2305_v62 = vpop.f32.mrb[30].mxu1 }
 0x55d   :  { %v6208_v46 = vadd.f32 %v2234_v34, %v8946_v55  ;;  %v6224_v9 = vadd.f32 %v2305_v62, %v9130_v23  ;;  %v2236_v47 = vpop.f32.mrb[15].mxu0  ;;  %v2307_v7 = vpop.f32.mrb[31].mxu1  ;;  %v2356_v62 = vmul.f32 %v6402_v33, %v7600_v4 }
 0x55e   :  { %v6209_v39 = vadd.f32 %v2236_v47, %v9131_v19  ;;  %v6225_v5 = vadd.f32 %v2307_v7, %v7300_v37  ;;  %v2357_v47 = vmul.f32 %v6406_v1, %v7602_v31  ;;  %v9135_v1 = vld [vmem:[#allocation102_spill] sm:$0xff] }
 0x55f   :  { %6407 = vtanh.f32 %v6208_v46  ;;  %v3948_v41 = vmul.f32 -1.442695, %v6224_v9 }
 0x560   :  { %6409 = vtanh.f32 %v6209_v39  ;;  %v3949_v57 = vmul.f32 -1.442695, %v6225_v5 }
 0x561   :  { %6411 = vpow2.f32 %v3948_v41 }
 0x562   :  { %6413 = vpow2.f32 %v3949_v57 }
 0x569   :  { %v6408_v6 = vpop.eup %6407 }
 0x56a   :  { %v6410_v34 = vpop.eup %6409  ;;  %v2358_v23 = vmul.f32 %v6408_v6, %v6400_v18  ;;  %v9136_v6 = vld [vmem:[#allocation127_spill] sm:$0xff] }
 0x56b   :  { %v6412_v15 = vpop.eup %6411  ;;  %v2359_v19 = vmul.f32 %v6410_v34, %v6404_v45  ;;  %v9134_v45 = vld [vmem:[#allocation126_spill] sm:$0xff]  ;;  %v9137_v34 = vld [vmem:[#allocation104_spill] sm:$0xff] }
 0x56c   :  { %v6414_v7 = vpop.eup %6413  ;;  %v7750_v46 = vadd.f32 %v2358_v23, %v2356_v62  ;;  %v2350_v9 = vadd.f32 1.0, %v6412_v15  ;;  %v9132_v23 = vld [vmem:[#allocation125_spill] sm:$0xff]  ;;  %v9138_v62 = vld [vmem:[#allocation128_spill] sm:$0xff]  ;;  %v9139_v15 = vld [vmem:[#allocation106_spill] sm:$0xff] }
 0x56d   :  { %v7752_v39 = vadd.f32 %v2359_v19, %v2357_v47  ;;  %v2351_v5 = vadd.f32 1.0, %v6414_v7  ;;  %v9133_v19 = vld [vmem:[#allocation100_spill] sm:$0xff]  ;;  %v9140_v47 = vld [vmem:[#allocation129_spill] sm:$0xff] }
 0x56e   :  { %6415 = vtanh.f32 %v7750_v46  ;;  %v9141_v7 = vld [vmem:[#allocation108_spill] sm:$0xff] }
 0x56f   :  { %6417 = vrcp.f32 %v2350_v9  ;;  %v9142_v9 = vld [vmem:[#allocation130_spill] sm:$0xff] }
 0x570   :  { %6419 = vtanh.f32 %v7752_v39 }
 0x571   :  { %6421 = vrcp.f32 %v2351_v5  ;;  %v9143_v5 = vld [vmem:[#allocation110_spill] sm:$0xff] }
 0x578   :  { %v6416_v41 = vpop.eup %6415 }
 0x579   :  { %v6418_v4 = vpop.eup %6417 }
 0x57a   :  { %v6420_v57 = vpop.eup %6419  ;;  %v7756_v31 = vmul.f32 %v6418_v4, %v6416_v41  ;;  %v9144_v41 = vld [vmem:[#allocation131_spill] sm:$0xff]  ;;  %v9145_v4 = vld [vmem:[#allocation112_spill] sm:$0xff] }
 0x57b   :  { %v6422_v18 = vpop.eup %6421 }
 0x57c   :  { %v2365_v33 = vmul.f32 %v6422_v18, %v6420_v57  ;;  %v9146_v57 = vld [vmem:[#allocation132_spill] sm:$0xff]  ;;  %v9147_v18 = vld [vmem:[#allocation114_spill] sm:$0xff] }
 0x57e   :  { %2441 = vmatprep.mubr.f32.mxu0 %v2365_v33  ;;  %2512 = vmatprep.mubr.f32.mxu1 %v2365_v33 }
 0x57f   :  { %2442 = vmatmul.mubr.f32.vlgmr.msra.gmra.mrb[24].mxu0 %v7756_v31  ;;  %2513 = vmatmul.mubr.f32.vlgmr.msra.gmra.mrb[16].mxu1 %v7756_v31 }
 0x580   :  { %5229 = vmatpush1.bf16.msra.mxu0 %v8856_v14  ;;  %5293 = vmatpush1.bf16.msra.mxu1 %v8857_v21 }
 0x581   :  { %2583 = vmatprep.mubr.f32.mxu0 %v2365_v33  ;;  %2654 = vmatprep.mubr.f32.mxu1 %v2365_v33  ;;  %v9148_v33 = vld [vmem:[#allocation133_spill] sm:$0xff] }
 0x582   :  { %5231 = vmatprep.subr.bf16.mxu0 %v8858_v44  ;;  %5295 = vmatprep.subr.bf16.mxu1 %v8859_v35 }
 0x584   :  { %5233 = vmatpush1.bf16.msra.mxu0 %v8860_v49  ;;  %5297 = vmatpush1.bf16.msra.mxu1 %v8861_v30 }
 0x585   :  { %5235 = vmatprep.subr.bf16.mxu0 %v8948_v48  ;;  %5299 = vmatprep.subr.bf16.mxu1 %v8949_v63 }
 0x588   :  { %5237 = vmatpush1.bf16.msra.mxu0 %v8864_v27  ;;  %5301 = vmatpush1.bf16.msra.mxu1 %v8950_v42 }
 0x589   :  { %5239 = vmatprep.subr.bf16.mxu0 %v8951_v38  ;;  %5303 = vmatprep.subr.bf16.mxu1 %v8952_v28 }
 0x58c   :  { %5241 = vmatpush1.bf16.msra.mxu0 %v8868_v43  ;;  %5305 = vmatpush1.bf16.msra.mxu1 %v8953_v58 }
 0x58d   :  { %5243 = vmatprep.subr.bf16.mxu0 %v8870_v36  ;;  %5307 = vmatprep.subr.bf16.mxu1 %v8954_v29 }
 0x590   :  { %5245 = vmatpush1.bf16.msra.mxu0 %v8872_v59  ;;  %5309 = vmatpush1.bf16.msra.mxu1 %v8955_v54 }
 0x591   :  { %5247 = vmatprep.subr.bf16.mxu0 %v8874_v50  ;;  %5311 = vmatprep.subr.bf16.mxu1 %v8956_v13 }
 0x594   :  { %5249 = vmatpush1.bf16.msra.mxu0 %v8875_v2  ;;  %5313 = vmatpush1.bf16.msra.mxu1 %v8957_v17 }
 0x595   :  { %5251 = vmatprep.subr.bf16.mxu0 %v8877_v51  ;;  %5315 = vmatprep.subr.bf16.mxu1 %v8958_v20 }
 0x598   :  { %5253 = vmatpush1.bf16.msra.mxu0 %v8878_v24  ;;  %5317 = vmatpush1.bf16.msra.mxu1 %v8959_v11 }
 0x599   :  { %5255 = vmatprep.subr.bf16.mxu0 %v9040_v40  ;;  %5319 = vmatprep.subr.bf16.mxu1 %v8960_v22 }
 0x59c   :  { %5257 = vmatpush1.bf16.msra.mxu0 %v9041_v0  ;;  %5321 = vmatpush1.bf16.msra.mxu1 %v8961_v3 }
 0x59d   :  { %5259 = vmatprep.subr.bf16.mxu0 %v8881_v53  ;;  %5323 = vmatprep.subr.bf16.mxu1 %v8962_v25 }
 0x5a0   :  { %5261 = vmatpush1.bf16.msra.mxu0 %v8882_v56  ;;  %5325 = vmatpush1.bf16.msra.mxu1 %v8963_v12 }
 0x5a1   :  { %5263 = vmatprep.subr.bf16.mxu0 %v8883_v10  ;;  %5327 = vmatprep.subr.bf16.mxu1 %v8964_v60 }
 0x5a4   :  { %5265 = vmatpush1.bf16.msra.mxu0 %v8884_v8  ;;  %5329 = vmatpush1.bf16.msra.mxu1 %v8965_v52 }
 0x5a5   :  { %5267 = vmatprep.subr.bf16.mxu0 %v9042_v61  ;;  %5331 = vmatprep.subr.bf16.mxu1 %v9132_v23 }
 0x5a8   :  { %5269 = vmatpush1.bf16.msra.mxu0 %v9133_v19  ;;  %5333 = vmatpush1.bf16.msra.mxu1 %v9134_v45 }
 0x5a9   :  { %5271 = vmatprep.subr.bf16.mxu0 %v9135_v1  ;;  %5335 = vmatprep.subr.bf16.mxu1 %v9136_v6 }
 0x5ac   :  { %5273 = vmatpush1.bf16.msra.mxu0 %v9137_v34  ;;  %5337 = vmatpush1.bf16.msra.mxu1 %v9138_v62  ;;  %v9149_v62 = vld [vmem:[#allocation116_spill] sm:$0xff] }
 0x5ad   :  { %5275 = vmatprep.subr.bf16.mxu0 %v9139_v15  ;;  %5339 = vmatprep.subr.bf16.mxu1 %v9140_v47  ;;  %v9150_v15 = vld [vmem:[#allocation134_spill] sm:$0xff] }
 0x5ae   :  { %v9151_v47 = vld [vmem:[#allocation118_spill] sm:$0xff] }
 0x5b0   :  { %5277 = vmatpush1.bf16.msra.mxu0 %v9141_v7  ;;  %5341 = vmatpush1.bf16.msra.mxu1 %v9142_v9  ;;  %v9152_v7 = vld [vmem:[#allocation135_spill] sm:$0xff]  ;;  %v9153_v9 = vld [vmem:[#allocation120_spill] sm:$0xff] }
 0x5b1   :  { %5279 = vmatprep.subr.bf16.mxu0 %v9143_v5  ;;  %5343 = vmatprep.subr.bf16.mxu1 %v9144_v41  ;;  %v9154_v5 = vld [vmem:[#allocation136_spill] sm:$0xff]  ;;  %v9155_v41 = vld [vmem:[#allocation9_spill] sm:$0xff] }
 0x5b4   :  { %5281 = vmatpush1.bf16.msra.mxu0 %v9145_v4  ;;  %5345 = vmatpush1.bf16.msra.mxu1 %v9146_v57  ;;  %v9156_v4 = vld [vmem:[#allocation18_spill] sm:$0xff] }
 0x5b5   :  { %5283 = vmatprep.subr.bf16.mxu0 %v9147_v18  ;;  %5347 = vmatprep.subr.bf16.mxu1 %v9148_v33  ;;  %v9157_v33 = vld [vmem:[#allocation10_spill] sm:$0xff]  ;;  %v9166_v18 = vld [vmem:[#allocation35_spill] sm:$0xff] }
 0x5b8   :  { %5285 = vmatpush1.bf16.msra.mxu0 %v9149_v62  ;;  %5349 = vmatpush1.bf16.msra.mxu1 %v9150_v15  ;;  %v9158_v62 = vld [vmem:[#allocation27_spill] sm:$0xff] }
 0x5b9   :  { %5287 = vmatprep.subr.bf16.mxu0 %v9151_v47  ;;  %5351 = vmatprep.subr.bf16.mxu1 %v9152_v7  ;;  %v9159_v15 = vld [vmem:[#allocation11_spill] sm:$0xff]  ;;  %v9160_v47 = vld [vmem:[#allocation29_spill] sm:$0xff]  ;;  %v9161_v7 = vld [vmem:[#allocation12_spill] sm:$0xff] }
 0x5bc   :  { %5289 = vmatpush1.bf16.msra.mxu0 %v9153_v9  ;;  %5353 = vmatpush1.bf16.msra.mxu1 %v9154_v5  ;;  %v9162_v9 = vld [vmem:[#allocation31_spill] sm:$0xff]  ;;  %v9163_v5 = vld [vmem:[#allocation13_spill] sm:$0xff] }
 0x5bd   :  { %5355 = vmatprep.subr.bf16.mxu0 %v9155_v41  ;;  %5419 = vmatprep.subr.bf16.mxu1 %v9156_v4  ;;  %v9164_v41 = vld [vmem:[#allocation33_spill] sm:$0xff]  ;;  %v9165_v4 = vld [vmem:[#allocation14_spill] sm:$0xff] }
 0x5bf   :  { %2584 = vmatmul.mubr.f32.vlgmr.msra.gmra.mrb[16].mxu0 %v7756_v31  ;;  %2655 = vmatmul.mubr.f32.vlgmr.msra.gmra.mrb[32].mxu1 %v7756_v31  ;;  %v9167_v31 = vld [vmem:[#allocation15_spill] sm:$0xff] }
 0x5c0   :  { %5357 = vmatpush1.bf16.msra.mxu0 %v9157_v33  ;;  %5421 = vmatpush1.bf16.msra.mxu1 %v9158_v62  ;;  %v9168_v33 = vld [vmem:[#allocation37_spill] sm:$0xff]  ;;  %v9169_v62 = vld [vmem:[#allocation16_spill] sm:$0xff] }
 0x5c1   :  { %5359 = vmatprep.subr.bf16.mxu0 %v9159_v15  ;;  %5423 = vmatprep.subr.bf16.mxu1 %v9160_v47  ;;  %v9170_v15 = vld [vmem:[#allocation39_spill] sm:$0xff]  ;;  %v9171_v47 = vld [vmem:[#allocation17_spill] sm:$0xff] }
 0x5c4   :  { %5361 = vmatpush1.bf16.msra.mxu0 %v9161_v7  ;;  %5425 = vmatpush1.bf16.msra.mxu1 %v9162_v9  ;;  %v9172_v7 = vld [vmem:[#allocation41_spill] sm:$0xff]  ;;  %v9173_v9 = vld [vmem:[#allocation19_spill] sm:$0xff] }
 0x5c5   :  { %5363 = vmatprep.subr.bf16.mxu0 %v9163_v5  ;;  %5427 = vmatprep.subr.bf16.mxu1 %v9164_v41  ;;  %v9174_v5 = vld [vmem:[#allocation43_spill] sm:$0xff]  ;;  %v9175_v41 = vld [vmem:[#allocation20_spill] sm:$0xff] }
 0x5c8   :  { %5365 = vmatpush1.bf16.msra.mxu0 %v9165_v4  ;;  %5429 = vmatpush1.bf16.msra.mxu1 %v9166_v18  ;;  %v9176_v4 = vld [vmem:[#allocation45_spill] sm:$0xff] }
 0x5c9   :  { %5367 = vmatprep.subr.bf16.mxu0 %v9167_v31  ;;  %5431 = vmatprep.subr.bf16.mxu1 %v9168_v33  ;;  %v9177_v18 = vld [vmem:[#allocation21_spill] sm:$0xff]  ;;  %v9178_v31 = vld [vmem:[#allocation47_spill] sm:$0xff]  ;;  %v9179_v33 = vld [vmem:[#allocation22_spill] sm:$0xff] }
 0x5cc   :  { %5369 = vmatpush1.bf16.msra.mxu0 %v9169_v62  ;;  %5433 = vmatpush1.bf16.msra.mxu1 %v9170_v15  ;;  %v9180_v62 = vld [vmem:[#allocation49_spill] sm:$0xff]  ;;  %v9181_v15 = vld [vmem:[#allocation23_spill] sm:$0xff] }
 0x5cd   :  { %5371 = vmatprep.subr.bf16.mxu0 %v9171_v47  ;;  %5435 = vmatprep.subr.bf16.mxu1 %v9172_v7  ;;  %v9182_v47 = vld [vmem:[#allocation51_spill] sm:$0xff]  ;;  %v9183_v7 = vld [vmem:[#allocation24_spill] sm:$0xff] }
 0x5d0   :  { %5373 = vmatpush1.bf16.msra.mxu0 %v9173_v9  ;;  %5437 = vmatpush1.bf16.msra.mxu1 %v9174_v5  ;;  %v9184_v9 = vld [vmem:[#allocation53_spill] sm:$0xff] }
 0x5d1   :  { %5375 = vmatprep.subr.bf16.mxu0 %v9175_v41  ;;  %5439 = vmatprep.subr.bf16.mxu1 %v9176_v4  ;;  %v9185_v5 = vld [vmem:[#allocation25_spill] sm:$0xff]  ;;  %v9186_v41 = vld [vmem:[#allocation55_spill] sm:$0xff]  ;;  %v9187_v4 = vld [vmem:[#allocation26_spill] sm:$0xff] }
 0x5d4   :  { %5377 = vmatpush1.bf16.msra.mxu0 %v9177_v18  ;;  %5441 = vmatpush1.bf16.msra.mxu1 %v9178_v31  ;;  %v9188_v18 = vld [vmem:[#allocation57_spill] sm:$0xff]  ;;  %v9189_v31 = vld [vmem:[#allocation28_spill] sm:$0xff] }
 0x5d5   :  { %5379 = vmatprep.subr.bf16.mxu0 %v9179_v33  ;;  %5443 = vmatprep.subr.bf16.mxu1 %v9180_v62  ;;  %v9190_v33 = vld [vmem:[#allocation59_spill] sm:$0xff]  ;;  %v9191_v62 = vld [vmem:[#allocation30_spill] sm:$0xff] }
 0x5d8   :  { %5381 = vmatpush1.bf16.msra.mxu0 %v9181_v15  ;;  %5445 = vmatpush1.bf16.msra.mxu1 %v9182_v47  ;;  %v9192_v15 = vld [vmem:[#allocation61_spill] sm:$0xff]  ;;  %v9193_v47 = vld [vmem:[#allocation32_spill] sm:$0xff] }
 0x5d9   :  { %5383 = vmatprep.subr.bf16.mxu0 %v9183_v7  ;;  %5447 = vmatprep.subr.bf16.mxu1 %v9184_v9  ;;  %v9194_v7 = vld [vmem:[#allocation63_spill] sm:$0xff]  ;;  %v9195_v9 = vld [vmem:[#allocation34_spill] sm:$0xff] }
 0x5dc   :  { %5385 = vmatpush1.bf16.msra.mxu0 %v9185_v5  ;;  %5449 = vmatpush1.bf16.msra.mxu1 %v9186_v41  ;;  %v9196_v5 = vld [vmem:[#allocation65_spill] sm:$0xff]  ;;  %v9197_v41 = vld [vmem:[#allocation36_spill] sm:$0xff] }
 0x5dd   :  { %5387 = vmatprep.subr.bf16.mxu0 %v9187_v4  ;;  %5451 = vmatprep.subr.bf16.mxu1 %v9188_v18  ;;  %v9198_v4 = vld [vmem:[#allocation67_spill] sm:$0xff]  ;;  %v9199_v18 = vld [vmem:[#allocation38_spill] sm:$0xff] }
 0x5e0   :  { %5389 = vmatpush1.bf16.msra.mxu0 %v9189_v31  ;;  %5453 = vmatpush1.bf16.msra.mxu1 %v9190_v33  ;;  %v9200_v31 = vld [vmem:[#allocation69_spill] sm:$0xff]  ;;  %v9201_v33 = vld [vmem:[#allocation40_spill] sm:$0xff] }
 0x5e1   :  { %5391 = vmatprep.subr.bf16.mxu0 %v9191_v62  ;;  %5455 = vmatprep.subr.bf16.mxu1 %v9192_v15  ;;  %v9202_v62 = vld [vmem:[#allocation71_spill] sm:$0xff]  ;;  %v9203_v15 = vld [vmem:[#allocation42_spill] sm:$0xff] }
 0x5e4   :  { %5393 = vmatpush1.bf16.msra.mxu0 %v9193_v47  ;;  %5457 = vmatpush1.bf16.msra.mxu1 %v9194_v7  ;;  %v9204_v47 = vld [vmem:[#allocation73_spill] sm:$0xff]  ;;  %v9205_v7 = vld [vmem:[#allocation44_spill] sm:$0xff] }
 0x5e5   :  { %5395 = vmatprep.subr.bf16.mxu0 %v9195_v9  ;;  %5459 = vmatprep.subr.bf16.mxu1 %v9196_v5  ;;  %v9206_v9 = vld [vmem:[#allocation75_spill] sm:$0xff]  ;;  %v9207_v5 = vld [vmem:[#allocation46_spill] sm:$0xff] }
 0x5e8   :  { %5397 = vmatpush1.bf16.msra.mxu0 %v9197_v41  ;;  %5461 = vmatpush1.bf16.msra.mxu1 %v9198_v4  ;;  %v9208_v41 = vld [vmem:[#allocation77_spill] sm:$0xff]  ;;  %v9209_v4 = vld [vmem:[#allocation48_spill] sm:$0xff] }
 0x5e9   :  { %5399 = vmatprep.subr.bf16.mxu0 %v9199_v18  ;;  %5463 = vmatprep.subr.bf16.mxu1 %v9200_v31  ;;  %v9210_v18 = vld [vmem:[#allocation79_spill] sm:$0xff]  ;;  %v9211_v31 = vld [vmem:[#allocation50_spill] sm:$0xff] }
 0x5ec   :  { %5401 = vmatpush1.bf16.msra.mxu0 %v9201_v33  ;;  %5465 = vmatpush1.bf16.msra.mxu1 %v9202_v62  ;;  %v9212_v33 = vld [vmem:[#allocation81_spill] sm:$0xff]  ;;  %v9213_v62 = vld [vmem:[#allocation52_spill] sm:$0xff] }
 0x5ed   :  { %5403 = vmatprep.subr.bf16.mxu0 %v9203_v15  ;;  %5467 = vmatprep.subr.bf16.mxu1 %v9204_v47  ;;  %v9214_v15 = vld [vmem:[#allocation83_spill] sm:$0xff]  ;;  %v9215_v47 = vld [vmem:[#allocation54_spill] sm:$0xff] }
 0x5f0   :  { %5405 = vmatpush1.bf16.msra.mxu0 %v9205_v7  ;;  %5469 = vmatpush1.bf16.msra.mxu1 %v9206_v9  ;;  %v9216_v7 = vld [vmem:[#allocation85_spill] sm:$0xff]  ;;  %v9217_v9 = vld [vmem:[#allocation56_spill] sm:$0xff] }
 0x5f1   :  { %5407 = vmatprep.subr.bf16.mxu0 %v9207_v5  ;;  %5471 = vmatprep.subr.bf16.mxu1 %v9208_v41  ;;  %v9218_v5 = vld [vmem:[#allocation87_spill] sm:$0xff]  ;;  %v9219_v41 = vld [vmem:[#allocation58_spill] sm:$0xff] }
 0x5f4   :  { %5409 = vmatpush1.bf16.msra.mxu0 %v9209_v4  ;;  %5473 = vmatpush1.bf16.msra.mxu1 %v9210_v18  ;;  %v9220_v4 = vld [vmem:[#allocation89_spill] sm:$0xff] }
 0x5f5   :  { %5411 = vmatprep.subr.bf16.mxu0 %v9211_v31  ;;  %5475 = vmatprep.subr.bf16.mxu1 %v9212_v33  ;;  %v9221_v18 = vld [vmem:[#allocation145_spill] sm:$0xff]  ;;  %v9223_v33 = vld [vmem:[#allocation138_spill] sm:$0xff] }
 0x5f6   :  { %v9222_v31 = vld [vmem:[#allocation137_spill] sm:$0xff] }
 0x5f7   :  { %v281_v57 = vadd.f32 %v9222_v31, %v9221_v18 }
 0x5f8   :  { %5413 = vmatpush1.bf16.msra.mxu0 %v9213_v62  ;;  %5477 = vmatpush1.bf16.msra.mxu1 %v9214_v15  ;;  %v283_v62 = vadd.f32 %v9223_v33, %v8944_v16 }
 0x5f9   :  { %5415 = vmatprep.subr.bf16.mxu0 %v9215_v47  ;;  %5479 = vmatprep.subr.bf16.mxu1 %v9216_v7 }
 0x5fc   :  { %5417 = vmatpush1.bf16.msra.mxu0 %v9217_v9  ;;  %5481 = vmatpush1.bf16.msra.mxu1 %v9218_v5 }
 0x5fd   :  { %5483 = vmatprep.subr.bf16.mxu0 %v9219_v41  ;;  %5547 = vmatprep.subr.bf16.mxu1 %v9220_v4 }
 0x652   :  { %v2443_v34 = vpop.f32.mrb[24].mxu0  ;;  %v2514_v15 = vpop.f32.mrb[16].mxu1 }
 0x653   :  { %v2661_v6 = vadd.f32 %v2443_v34, %v281_v57  ;;  %v2445_v47 = vpop.f32.mrb[25].mxu0  ;;  %v2516_v1 = vpop.f32.mrb[17].mxu1  ;;  %v6194_v9 = vadd.f32 %v2514_v15, %v7278_v26 }
 0x654   :  { %v2662_v7 = vadd.f32 %v2445_v47, %v283_v62  ;;  %v6195_v5 = vadd.f32 %v2516_v1, %v8945_v32  ;;  %v9224_v47 = vld [vmem:[#allocation150_spill] sm:$0xff] }
 0x655   :  { %v3950_v45 = vmul.f32 -1.442695, %v2661_v6  ;;  %v3952_v41 = vmul.f32 -1.442695, %v6194_v9  ;;  %v9225_v9 = vld [vmem:[#allocation149_spill] sm:$0xff] }
 0x656   :  { %v3951_v19 = vmul.f32 -1.442695, %v2662_v7  ;;  %v3953_v4 = vmul.f32 -1.442695, %v6195_v5 }
 0x657   :  { %6423 = vpow2.f32 %v3950_v45 }
 0x658   :  { %6425 = vpow2.f32 %v3952_v41 }
 0x659   :  { %6427 = vpow2.f32 %v3951_v19 }
 0x65a   :  { %6429 = vpow2.f32 %v3953_v4 }
 0x661   :  { %v6424_v31 = vpop.eup %6423 }
 0x662   :  { %v6426_v33 = vpop.eup %6425  ;;  %v2675_v34 = vadd.f32 1.0, %v6424_v31 }
 0x663   :  { %v6428_v16 = vpop.eup %6427  ;;  %v2687_v57 = vadd.f32 1.0, %v6426_v33 }
 0x664   :  { %v6430_v18 = vpop.eup %6429  ;;  %v2676_v23 = vadd.f32 1.0, %v6428_v16  ;;  %6431 = vrcp.f32 %v2675_v34 }
 0x665   :  { %v2688_v62 = vadd.f32 1.0, %v6430_v18  ;;  %6433 = vrcp.f32 %v2687_v57 }
 0x666   :  { %6435 = vrcp.f32 %v2676_v23 }
 0x667   :  { %6437 = vrcp.f32 %v2688_v62 }
 0x66e   :  { %v6432_v18 = vpop.eup %6431 }
 0x66f   :  { %v6434_v31 = vpop.eup %6433 }
 0x670   :  { %v6436_v23 = vpop.eup %6435 }
 0x671   :  { %v6438_v33 = vpop.eup %6437 }
 0x692   :  { %v2585_v15 = vpop.f32.mrb[16].mxu0  ;;  %v2656_v1 = vpop.f32.mrb[32].mxu1 }
 0x693   :  { %v6210_v6 = vadd.f32 %v2585_v15, %v8946_v55  ;;  %v6226_v45 = vadd.f32 %v2656_v1, %v9224_v47  ;;  %v2587_v7 = vpop.f32.mrb[17].mxu0  ;;  %v2658_v19 = vpop.f32.mrb[33].mxu1  ;;  %v2707_v15 = vmul.f32 %v6434_v31, %v7750_v46 }
 0x694   :  { %v6211_v5 = vadd.f32 %v2587_v7, %v9225_v9  ;;  %v6227_v41 = vadd.f32 %v2658_v19, %v7300_v37  ;;  %v2708_v7 = vmul.f32 %v6438_v33, %v7752_v39  ;;  %v9228_v33 = vld [vmem:[#allocation126_spill] sm:$0xff] }
 0x695   :  { %6439 = vtanh.f32 %v6210_v6  ;;  %v3954_v4 = vmul.f32 -1.442695, %v6226_v45 }
 0x696   :  { %6441 = vtanh.f32 %v6211_v5  ;;  %v3955_v16 = vmul.f32 -1.442695, %v6227_v41 }
 0x697   :  { %6443 = vpow2.f32 %v3954_v4 }
 0x698   :  { %6445 = vpow2.f32 %v3955_v16 }
 0x69f   :  { %v6440_v34 = vpop.eup %6439 }
 0x6a0   :  { %v6442_v57 = vpop.eup %6441  ;;  %v2709_v1 = vmul.f32 %v6440_v34, %v6432_v18  ;;  %v9229_v34 = vld [vmem:[#allocation102_spill] sm:$0xff] }
 0x6a1   :  { %v6444_v62 = vpop.eup %6443  ;;  %v2710_v9 = vmul.f32 %v6442_v57, %v6436_v23  ;;  %v9227_v23 = vld [vmem:[#allocation100_spill] sm:$0xff]  ;;  %v9230_v57 = vld [vmem:[#allocation127_spill] sm:$0xff] }
 0x6a2   :  { %v6446_v19 = vpop.eup %6445  ;;  %v7902_v6 = vadd.f32 %v2709_v1, %v2707_v15  ;;  %v2701_v45 = vadd.f32 1.0, %v6444_v62  ;;  %v9231_v15 = vld [vmem:[#allocation104_spill] sm:$0xff]  ;;  %v9233_v62 = vld [vmem:[#allocation106_spill] sm:$0xff] }
 0x6a3   :  { %v7904_v5 = vadd.f32 %v2710_v9, %v2708_v7  ;;  %v2702_v41 = vadd.f32 1.0, %v6446_v19  ;;  %v9226_v9 = vld [vmem:[#allocation125_spill] sm:$0xff]  ;;  %v9232_v1 = vld [vmem:[#allocation128_spill] sm:$0xff] }
 0x6a4   :  { %6447 = vtanh.f32 %v7902_v6  ;;  %v9234_v7 = vld [vmem:[#allocation129_spill] sm:$0xff]  ;;  %v9235_v19 = vld [vmem:[#allocation108_spill] sm:$0xff] }
 0x6a5   :  { %6449 = vrcp.f32 %v2701_v45  ;;  %v9236_v45 = vld [vmem:[#allocation130_spill] sm:$0xff] }
 0x6a6   :  { %6451 = vtanh.f32 %v7904_v5 }
 0x6a7   :  { %6453 = vrcp.f32 %v2702_v41  ;;  %v9237_v41 = vld [vmem:[#allocation110_spill] sm:$0xff] }
 0x6ae   :  { %v6448_v4 = vpop.eup %6447 }
 0x6af   :  { %v6450_v46 = vpop.eup %6449 }
 0x6b0   :  { %v6452_v16 = vpop.eup %6451  ;;  %v7908_v39 = vmul.f32 %v6450_v46, %v6448_v4  ;;  %v9238_v4 = vld [vmem:[#allocation131_spill] sm:$0xff]  ;;  %v9239_v46 = vld [vmem:[#allocation112_spill] sm:$0xff] }
 0x6b1   :  { %v6454_v18 = vpop.eup %6453 }
 0x6b2   :  { %v2716_v31 = vmul.f32 %v6454_v18, %v6452_v16  ;;  %v9240_v16 = vld [vmem:[#allocation132_spill] sm:$0xff]  ;;  %v9241_v18 = vld [vmem:[#allocation114_spill] sm:$0xff] }
 0x6b4   :  { %2792 = vmatprep.mubr.f32.mxu0 %v2716_v31  ;;  %2863 = vmatprep.mubr.f32.mxu1 %v2716_v31 }
 0x6b5   :  { %2793 = vmatmul.mubr.f32.vlgmr.msra.gmra.mrb[26].mxu0 %v7908_v39  ;;  %2864 = vmatmul.mubr.f32.vlgmr.msra.gmra.mrb[18].mxu1 %v7908_v39 }
 0x6b6   :  { %5485 = vmatpush1.bf16.msra.mxu0 %v8856_v14  ;;  %5549 = vmatpush1.bf16.msra.mxu1 %v8857_v21 }
 0x6b7   :  { %2934 = vmatprep.mubr.f32.mxu0 %v2716_v31  ;;  %3005 = vmatprep.mubr.f32.mxu1 %v2716_v31  ;;  %v9242_v31 = vld [vmem:[#allocation133_spill] sm:$0xff] }
 0x6b8   :  { %5487 = vmatprep.subr.bf16.mxu0 %v8858_v44  ;;  %5551 = vmatprep.subr.bf16.mxu1 %v8859_v35 }
 0x6ba   :  { %5489 = vmatpush1.bf16.msra.mxu0 %v8860_v49  ;;  %5553 = vmatpush1.bf16.msra.mxu1 %v8861_v30 }
 0x6bb   :  { %5491 = vmatprep.subr.bf16.mxu0 %v8948_v48  ;;  %5555 = vmatprep.subr.bf16.mxu1 %v8949_v63 }
 0x6be   :  { %5493 = vmatpush1.bf16.msra.mxu0 %v8864_v27  ;;  %5557 = vmatpush1.bf16.msra.mxu1 %v8950_v42 }
 0x6bf   :  { %5495 = vmatprep.subr.bf16.mxu0 %v8951_v38  ;;  %5559 = vmatprep.subr.bf16.mxu1 %v8952_v28 }
 0x6c2   :  { %5497 = vmatpush1.bf16.msra.mxu0 %v8868_v43  ;;  %5561 = vmatpush1.bf16.msra.mxu1 %v8953_v58 }
 0x6c3   :  { %5499 = vmatprep.subr.bf16.mxu0 %v8870_v36  ;;  %5563 = vmatprep.subr.bf16.mxu1 %v8954_v29 }
 0x6c6   :  { %5501 = vmatpush1.bf16.msra.mxu0 %v8872_v59  ;;  %5565 = vmatpush1.bf16.msra.mxu1 %v8955_v54 }
 0x6c7   :  { %5503 = vmatprep.subr.bf16.mxu0 %v8874_v50  ;;  %5567 = vmatprep.subr.bf16.mxu1 %v8956_v13 }
 0x6ca   :  { %5505 = vmatpush1.bf16.msra.mxu0 %v8875_v2  ;;  %5569 = vmatpush1.bf16.msra.mxu1 %v8957_v17 }
 0x6cb   :  { %5507 = vmatprep.subr.bf16.mxu0 %v8877_v51  ;;  %5571 = vmatprep.subr.bf16.mxu1 %v8958_v20 }
 0x6ce   :  { %5509 = vmatpush1.bf16.msra.mxu0 %v8878_v24  ;;  %5573 = vmatpush1.bf16.msra.mxu1 %v8959_v11 }
 0x6cf   :  { %5511 = vmatprep.subr.bf16.mxu0 %v9040_v40  ;;  %5575 = vmatprep.subr.bf16.mxu1 %v8960_v22 }
 0x6d2   :  { %5513 = vmatpush1.bf16.msra.mxu0 %v9041_v0  ;;  %5577 = vmatpush1.bf16.msra.mxu1 %v8961_v3 }
 0x6d3   :  { %5515 = vmatprep.subr.bf16.mxu0 %v8881_v53  ;;  %5579 = vmatprep.subr.bf16.mxu1 %v8962_v25 }
 0x6d6   :  { %5517 = vmatpush1.bf16.msra.mxu0 %v8882_v56  ;;  %5581 = vmatpush1.bf16.msra.mxu1 %v8963_v12 }
 0x6d7   :  { %5519 = vmatprep.subr.bf16.mxu0 %v8883_v10  ;;  %5583 = vmatprep.subr.bf16.mxu1 %v8964_v60 }
 0x6da   :  { %5521 = vmatpush1.bf16.msra.mxu0 %v8884_v8  ;;  %5585 = vmatpush1.bf16.msra.mxu1 %v8965_v52 }
 0x6db   :  { %5523 = vmatprep.subr.bf16.mxu0 %v9042_v61  ;;  %5587 = vmatprep.subr.bf16.mxu1 %v9226_v9 }
 0x6de   :  { %5525 = vmatpush1.bf16.msra.mxu0 %v9227_v23  ;;  %5589 = vmatpush1.bf16.msra.mxu1 %v9228_v33 }
 0x6df   :  { %5527 = vmatprep.subr.bf16.mxu0 %v9229_v34  ;;  %5591 = vmatprep.subr.bf16.mxu1 %v9230_v57 }
 0x6e2   :  { %5529 = vmatpush1.bf16.msra.mxu0 %v9231_v15  ;;  %5593 = vmatpush1.bf16.msra.mxu1 %v9232_v1  ;;  %v9243_v1 = vld [vmem:[#allocation116_spill] sm:$0xff] }
 0x6e3   :  { %5531 = vmatprep.subr.bf16.mxu0 %v9233_v62  ;;  %5595 = vmatprep.subr.bf16.mxu1 %v9234_v7  ;;  %v9244_v62 = vld [vmem:[#allocation134_spill] sm:$0xff]  ;;  %v9318_v15 = vld [vmem:[#allocation140_spill] sm:$0xff] }
 0x6e4   :  { %v9245_v7 = vld [vmem:[#allocation118_spill] sm:$0xff] }
 0x6e6   :  { %5533 = vmatpush1.bf16.msra.mxu0 %v9235_v19  ;;  %5597 = vmatpush1.bf16.msra.mxu1 %v9236_v45  ;;  %v9246_v19 = vld [vmem:[#allocation135_spill] sm:$0xff]  ;;  %v9247_v45 = vld [vmem:[#allocation120_spill] sm:$0xff] }
 0x6e7   :  { %5535 = vmatprep.subr.bf16.mxu0 %v9237_v41  ;;  %5599 = vmatprep.subr.bf16.mxu1 %v9238_v4  ;;  %v9248_v41 = vld [vmem:[#allocation136_spill] sm:$0xff]  ;;  %v9249_v4 = vld [vmem:[#allocation9_spill] sm:$0xff] }
 0x6ea   :  { %5537 = vmatpush1.bf16.msra.mxu0 %v9239_v46  ;;  %5601 = vmatpush1.bf16.msra.mxu1 %v9240_v16  ;;  %v9250_v46 = vld [vmem:[#allocation18_spill] sm:$0xff] }
 0x6eb   :  { %5539 = vmatprep.subr.bf16.mxu0 %v9241_v18  ;;  %5603 = vmatprep.subr.bf16.mxu1 %v9242_v31  ;;  %v9251_v31 = vld [vmem:[#allocation10_spill] sm:$0xff]  ;;  %v9260_v18 = vld [vmem:[#allocation35_spill] sm:$0xff] }
 0x6ee   :  { %5541 = vmatpush1.bf16.msra.mxu0 %v9243_v1  ;;  %5605 = vmatpush1.bf16.msra.mxu1 %v9244_v62  ;;  %v9252_v1 = vld [vmem:[#allocation27_spill] sm:$0xff] }
 0x6ef   :  { %5543 = vmatprep.subr.bf16.mxu0 %v9245_v7  ;;  %5607 = vmatprep.subr.bf16.mxu1 %v9246_v19  ;;  %v9253_v62 = vld [vmem:[#allocation11_spill] sm:$0xff]  ;;  %v9254_v7 = vld [vmem:[#allocation29_spill] sm:$0xff]  ;;  %v9255_v19 = vld [vmem:[#allocation12_spill] sm:$0xff] }
 0x6f2   :  { %5545 = vmatpush1.bf16.msra.mxu0 %v9247_v45  ;;  %5609 = vmatpush1.bf16.msra.mxu1 %v9248_v41  ;;  %v9256_v45 = vld [vmem:[#allocation31_spill] sm:$0xff]  ;;  %v9257_v41 = vld [vmem:[#allocation13_spill] sm:$0xff] }
 0x6f3   :  { %5611 = vmatprep.subr.bf16.mxu0 %v9249_v4  ;;  %5675 = vmatprep.subr.bf16.mxu1 %v9250_v46  ;;  %v9258_v4 = vld [vmem:[#allocation33_spill] sm:$0xff]  ;;  %v9259_v46 = vld [vmem:[#allocation14_spill] sm:$0xff] }
 0x6f5   :  { %2935 = vmatmul.mubr.f32.vlgmr.msra.gmra.mrb[18].mxu0 %v7908_v39  ;;  %3006 = vmatmul.mubr.f32.vlgmr.msra.gmra.mrb[34].mxu1 %v7908_v39  ;;  %v9261_v39 = vld [vmem:[#allocation15_spill] sm:$0xff] }
 0x6f6   :  { %5613 = vmatpush1.bf16.msra.mxu0 %v9251_v31  ;;  %5677 = vmatpush1.bf16.msra.mxu1 %v9252_v1  ;;  %v9262_v31 = vld [vmem:[#allocation37_spill] sm:$0xff]  ;;  %v9263_v1 = vld [vmem:[#allocation16_spill] sm:$0xff] }
 0x6f7   :  { %5615 = vmatprep.subr.bf16.mxu0 %v9253_v62  ;;  %5679 = vmatprep.subr.bf16.mxu1 %v9254_v7  ;;  %v9264_v62 = vld [vmem:[#allocation39_spill] sm:$0xff]  ;;  %v9265_v7 = vld [vmem:[#allocation17_spill] sm:$0xff] }
 0x6fa   :  { %5617 = vmatpush1.bf16.msra.mxu0 %v9255_v19  ;;  %5681 = vmatpush1.bf16.msra.mxu1 %v9256_v45  ;;  %v9266_v19 = vld [vmem:[#allocation41_spill] sm:$0xff]  ;;  %v9267_v45 = vld [vmem:[#allocation19_spill] sm:$0xff] }
 0x6fb   :  { %5619 = vmatprep.subr.bf16.mxu0 %v9257_v41  ;;  %5683 = vmatprep.subr.bf16.mxu1 %v9258_v4  ;;  %v9268_v41 = vld [vmem:[#allocation43_spill] sm:$0xff]  ;;  %v9269_v4 = vld [vmem:[#allocation20_spill] sm:$0xff] }
 0x6fe   :  { %5621 = vmatpush1.bf16.msra.mxu0 %v9259_v46  ;;  %5685 = vmatpush1.bf16.msra.mxu1 %v9260_v18  ;;  %v9270_v46 = vld [vmem:[#allocation45_spill] sm:$0xff] }
 0x6ff   :  { %5623 = vmatprep.subr.bf16.mxu0 %v9261_v39  ;;  %5687 = vmatprep.subr.bf16.mxu1 %v9262_v31  ;;  %v9271_v18 = vld [vmem:[#allocation21_spill] sm:$0xff]  ;;  %v9272_v39 = vld [vmem:[#allocation47_spill] sm:$0xff]  ;;  %v9273_v31 = vld [vmem:[#allocation22_spill] sm:$0xff] }
 0x702   :  { %5625 = vmatpush1.bf16.msra.mxu0 %v9263_v1  ;;  %5689 = vmatpush1.bf16.msra.mxu1 %v9264_v62  ;;  %v9274_v1 = vld [vmem:[#allocation49_spill] sm:$0xff]  ;;  %v9275_v62 = vld [vmem:[#allocation23_spill] sm:$0xff] }
 0x703   :  { %5627 = vmatprep.subr.bf16.mxu0 %v9265_v7  ;;  %5691 = vmatprep.subr.bf16.mxu1 %v9266_v19  ;;  %v9276_v7 = vld [vmem:[#allocation51_spill] sm:$0xff]  ;;  %v9277_v19 = vld [vmem:[#allocation24_spill] sm:$0xff] }
 0x706   :  { %5629 = vmatpush1.bf16.msra.mxu0 %v9267_v45  ;;  %5693 = vmatpush1.bf16.msra.mxu1 %v9268_v41  ;;  %v9278_v45 = vld [vmem:[#allocation53_spill] sm:$0xff] }
 0x707   :  { %5631 = vmatprep.subr.bf16.mxu0 %v9269_v4  ;;  %5695 = vmatprep.subr.bf16.mxu1 %v9270_v46  ;;  %v9279_v41 = vld [vmem:[#allocation25_spill] sm:$0xff]  ;;  %v9280_v4 = vld [vmem:[#allocation55_spill] sm:$0xff]  ;;  %v9281_v46 = vld [vmem:[#allocation26_spill] sm:$0xff] }
 0x70a   :  { %5633 = vmatpush1.bf16.msra.mxu0 %v9271_v18  ;;  %5697 = vmatpush1.bf16.msra.mxu1 %v9272_v39  ;;  %v9282_v18 = vld [vmem:[#allocation57_spill] sm:$0xff]  ;;  %v9283_v39 = vld [vmem:[#allocation28_spill] sm:$0xff] }
 0x70b   :  { %5635 = vmatprep.subr.bf16.mxu0 %v9273_v31  ;;  %5699 = vmatprep.subr.bf16.mxu1 %v9274_v1  ;;  %v9284_v31 = vld [vmem:[#allocation59_spill] sm:$0xff]  ;;  %v9285_v1 = vld [vmem:[#allocation30_spill] sm:$0xff] }
 0x70e   :  { %5637 = vmatpush1.bf16.msra.mxu0 %v9275_v62  ;;  %5701 = vmatpush1.bf16.msra.mxu1 %v9276_v7  ;;  %v9286_v62 = vld [vmem:[#allocation61_spill] sm:$0xff]  ;;  %v9287_v7 = vld [vmem:[#allocation32_spill] sm:$0xff] }
 0x70f   :  { %5639 = vmatprep.subr.bf16.mxu0 %v9277_v19  ;;  %5703 = vmatprep.subr.bf16.mxu1 %v9278_v45  ;;  %v9288_v19 = vld [vmem:[#allocation63_spill] sm:$0xff]  ;;  %v9289_v45 = vld [vmem:[#allocation34_spill] sm:$0xff] }
 0x712   :  { %5641 = vmatpush1.bf16.msra.mxu0 %v9279_v41  ;;  %5705 = vmatpush1.bf16.msra.mxu1 %v9280_v4  ;;  %v9290_v41 = vld [vmem:[#allocation65_spill] sm:$0xff]  ;;  %v9291_v4 = vld [vmem:[#allocation36_spill] sm:$0xff] }
 0x713   :  { %5643 = vmatprep.subr.bf16.mxu0 %v9281_v46  ;;  %5707 = vmatprep.subr.bf16.mxu1 %v9282_v18  ;;  %v9292_v46 = vld [vmem:[#allocation67_spill] sm:$0xff]  ;;  %v9293_v18 = vld [vmem:[#allocation38_spill] sm:$0xff] }
 0x716   :  { %5645 = vmatpush1.bf16.msra.mxu0 %v9283_v39  ;;  %5709 = vmatpush1.bf16.msra.mxu1 %v9284_v31  ;;  %v9294_v39 = vld [vmem:[#allocation69_spill] sm:$0xff]  ;;  %v9295_v31 = vld [vmem:[#allocation40_spill] sm:$0xff] }
 0x717   :  { %5647 = vmatprep.subr.bf16.mxu0 %v9285_v1  ;;  %5711 = vmatprep.subr.bf16.mxu1 %v9286_v62  ;;  %v9296_v1 = vld [vmem:[#allocation71_spill] sm:$0xff]  ;;  %v9297_v62 = vld [vmem:[#allocation42_spill] sm:$0xff] }
 0x71a   :  { %5649 = vmatpush1.bf16.msra.mxu0 %v9287_v7  ;;  %5713 = vmatpush1.bf16.msra.mxu1 %v9288_v19  ;;  %v9298_v7 = vld [vmem:[#allocation73_spill] sm:$0xff]  ;;  %v9299_v19 = vld [vmem:[#allocation44_spill] sm:$0xff] }
 0x71b   :  { %5651 = vmatprep.subr.bf16.mxu0 %v9289_v45  ;;  %5715 = vmatprep.subr.bf16.mxu1 %v9290_v41  ;;  %v9300_v45 = vld [vmem:[#allocation75_spill] sm:$0xff]  ;;  %v9301_v41 = vld [vmem:[#allocation46_spill] sm:$0xff] }
 0x71e   :  { %5653 = vmatpush1.bf16.msra.mxu0 %v9291_v4  ;;  %5717 = vmatpush1.bf16.msra.mxu1 %v9292_v46  ;;  %v9302_v4 = vld [vmem:[#allocation77_spill] sm:$0xff]  ;;  %v9303_v46 = vld [vmem:[#allocation48_spill] sm:$0xff] }
 0x71f   :  { %5655 = vmatprep.subr.bf16.mxu0 %v9293_v18  ;;  %5719 = vmatprep.subr.bf16.mxu1 %v9294_v39  ;;  %v9304_v18 = vld [vmem:[#allocation79_spill] sm:$0xff]  ;;  %v9305_v39 = vld [vmem:[#allocation50_spill] sm:$0xff] }
 0x722   :  { %5657 = vmatpush1.bf16.msra.mxu0 %v9295_v31  ;;  %5721 = vmatpush1.bf16.msra.mxu1 %v9296_v1  ;;  %v9306_v31 = vld [vmem:[#allocation81_spill] sm:$0xff]  ;;  %v9307_v1 = vld [vmem:[#allocation52_spill] sm:$0xff] }
 0x723   :  { %5659 = vmatprep.subr.bf16.mxu0 %v9297_v62  ;;  %5723 = vmatprep.subr.bf16.mxu1 %v9298_v7  ;;  %v9308_v62 = vld [vmem:[#allocation83_spill] sm:$0xff]  ;;  %v9309_v7 = vld [vmem:[#allocation54_spill] sm:$0xff] }
 0x726   :  { %5661 = vmatpush1.bf16.msra.mxu0 %v9299_v19  ;;  %5725 = vmatpush1.bf16.msra.mxu1 %v9300_v45  ;;  %v9310_v19 = vld [vmem:[#allocation85_spill] sm:$0xff]  ;;  %v9311_v45 = vld [vmem:[#allocation56_spill] sm:$0xff] }
 0x727   :  { %5663 = vmatprep.subr.bf16.mxu0 %v9301_v41  ;;  %5727 = vmatprep.subr.bf16.mxu1 %v9302_v4  ;;  %v9312_v41 = vld [vmem:[#allocation87_spill] sm:$0xff]  ;;  %v9313_v4 = vld [vmem:[#allocation58_spill] sm:$0xff] }
 0x72a   :  { %5665 = vmatpush1.bf16.msra.mxu0 %v9303_v46  ;;  %5729 = vmatpush1.bf16.msra.mxu1 %v9304_v18  ;;  %v9314_v46 = vld [vmem:[#allocation89_spill] sm:$0xff] }
 0x72b   :  { %5667 = vmatprep.subr.bf16.mxu0 %v9305_v39  ;;  %5731 = vmatprep.subr.bf16.mxu1 %v9306_v31  ;;  %v9315_v18 = vld [vmem:[#allocation145_spill] sm:$0xff]  ;;  %v9316_v39 = vld [vmem:[#allocation139_spill] sm:$0xff]  ;;  %v9317_v31 = vld [vmem:[#allocation146_spill] sm:$0xff] }
 0x72c   :  { %v287_v16 = vadd.f32 %v9316_v39, %v9315_v18 }
 0x72e   :  { %5669 = vmatpush1.bf16.msra.mxu0 %v9307_v1  ;;  %5733 = vmatpush1.bf16.msra.mxu1 %v9308_v62  ;;  %v289_v1 = vadd.f32 %v9318_v15, %v9317_v31 }
 0x72f   :  { %5671 = vmatprep.subr.bf16.mxu0 %v9309_v7  ;;  %5735 = vmatprep.subr.bf16.mxu1 %v9310_v19 }
 0x732   :  { %5673 = vmatpush1.bf16.msra.mxu0 %v9311_v45  ;;  %5737 = vmatpush1.bf16.msra.mxu1 %v9312_v41 }
 0x733   :  { %5739 = vmatprep.subr.bf16.mxu0 %v9313_v4  ;;  %5803 = vmatprep.subr.bf16.mxu1 %v9314_v46 }
 0x788   :  { %v2794_v57 = vpop.f32.mrb[26].mxu0  ;;  %v2865_v62 = vpop.f32.mrb[18].mxu1 }
 0x789   :  { %v3012_v34 = vadd.f32 %v2794_v57, %v287_v16  ;;  %v2796_v7 = vpop.f32.mrb[27].mxu0  ;;  %v2867_v33 = vpop.f32.mrb[19].mxu1  ;;  %v6196_v45 = vadd.f32 %v2865_v62, %v7278_v26 }
 0x78a   :  { %v3013_v19 = vadd.f32 %v2796_v7, %v289_v1  ;;  %v6197_v41 = vadd.f32 %v2867_v33, %v8945_v32 }
 0x78b   :  { %v3956_v23 = vmul.f32 -1.442695, %v3012_v34  ;;  %v3958_v4 = vmul.f32 -1.442695, %v6196_v45 }
 0x78c   :  { %v3957_v9 = vmul.f32 -1.442695, %v3013_v19  ;;  %v3959_v46 = vmul.f32 -1.442695, %v6197_v41  ;;  %v9319_v19 = vld [vmem:[#allocation149_spill] sm:$0xff] }
 0x78d   :  { %6455 = vpow2.f32 %v3956_v23 }
 0x78e   :  { %6457 = vpow2.f32 %v3958_v4 }
 0x78f   :  { %6459 = vpow2.f32 %v3957_v9 }
 0x790   :  { %6461 = vpow2.f32 %v3959_v46 }
 0x797   :  { %v6456_v39 = vpop.eup %6455 }
 0x798   :  { %v6458_v15 = vpop.eup %6457  ;;  %v3026_v57 = vadd.f32 1.0, %v6456_v39 }
 0x799   :  { %v6460_v31 = vpop.eup %6459  ;;  %v3038_v16 = vadd.f32 1.0, %v6458_v15 }
 0x79a   :  { %v6462_v18 = vpop.eup %6461  ;;  %v3027_v61 = vadd.f32 1.0, %v6460_v31  ;;  %6463 = vrcp.f32 %v3026_v57 }
 0x79b   :  { %v3039_v1 = vadd.f32 1.0, %v6462_v18  ;;  %6465 = vrcp.f32 %v3038_v16 }
 0x79c   :  { %6467 = vrcp.f32 %v3027_v61 }
 0x79d   :  { %6469 = vrcp.f32 %v3039_v1 }
 0x7a4   :  { %v6464_v18 = vpop.eup %6463 }
 0x7a5   :  { %v6466_v31 = vpop.eup %6465 }
 0x7a6   :  { %v6468_v61 = vpop.eup %6467  ;;  %v3058_v16 = vmul.f32 %v6466_v31, %v7902_v6 }
 0x7a7   :  { %v6470_v39 = vpop.eup %6469 }
 0x7c8   :  { %v2936_v62 = vpop.f32.mrb[18].mxu0  ;;  %v3007_v33 = vpop.f32.mrb[34].mxu1 }
 0x7c9   :  { %v6212_v34 = vadd.f32 %v2936_v62, %v8946_v55  ;;  %v6228_v23 = vadd.f32 %v3007_v33, %v9224_v47  ;;  %v2938_v7 = vpop.f32.mrb[19].mxu0  ;;  %v3009_v9 = vpop.f32.mrb[35].mxu1  ;;  %v3059_v33 = vmul.f32 %v6470_v39, %v7904_v5  ;;  %v9321_v39 = vld [vmem:[#allocation125_spill] sm:$0xff] }
 0x7ca   :  { %v6213_v45 = vadd.f32 %v2938_v7, %v9319_v19  ;;  %v6229_v41 = vadd.f32 %v3009_v9, %v7300_v37 }
 0x7cb   :  { %6471 = vtanh.f32 %v6212_v34  ;;  %v3960_v4 = vmul.f32 -1.442695, %v6228_v23 }
 0x7cc   :  { %6473 = vtanh.f32 %v6213_v45  ;;  %v3961_v46 = vmul.f32 -1.442695, %v6229_v41 }
 0x7cd   :  { %6475 = vpow2.f32 %v3960_v4 }
 0x7ce   :  { %6477 = vpow2.f32 %v3961_v46 }
 0x7d5   :  { %v6472_v15 = vpop.eup %6471 }
 0x7d6   :  { %v6474_v57 = vpop.eup %6473  ;;  %v3060_v62 = vmul.f32 %v6472_v15, %v6464_v18  ;;  %v9322_v15 = vld [vmem:[#allocation100_spill] sm:$0xff] }
 0x7d7   :  { %v6476_v1 = vpop.eup %6475  ;;  %v3061_v7 = vmul.f32 %v6474_v57, %v6468_v61  ;;  %v9320_v61 = vld [vmem:[#allocation98_spill] sm:$0xff] }
 0x7d8   :  { %v6478_v9 = vpop.eup %6477  ;;  %v8054_v34 = vadd.f32 %v3060_v62, %v3058_v16  ;;  %v3052_v23 = vadd.f32 1.0, %v6476_v1  ;;  %v9323_v57 = vld [vmem:[#allocation126_spill] sm:$0xff]  ;;  %v9325_v62 = vld [vmem:[#allocation127_spill] sm:$0xff]  ;;  %v9326_v1 = vld [vmem:[#allocation104_spill] sm:$0xff] }
 0x7d9   :  { %v8056_v45 = vadd.f32 %v3061_v7, %v3059_v33  ;;  %v3053_v41 = vadd.f32 1.0, %v6478_v9  ;;  %v9324_v16 = vld [vmem:[#allocation102_spill] sm:$0xff]  ;;  %v9327_v33 = vld [vmem:[#allocation128_spill] sm:$0xff]  ;;  %v9329_v9 = vld [vmem:[#allocation129_spill] sm:$0xff] }
 0x7da   :  { %6479 = vtanh.f32 %v8054_v34  ;;  %v9328_v7 = vld [vmem:[#allocation106_spill] sm:$0xff] }
 0x7db   :  { %6481 = vrcp.f32 %v3052_v23  ;;  %v9330_v23 = vld [vmem:[#allocation108_spill] sm:$0xff] }
 0x7dc   :  { %6483 = vtanh.f32 %v8056_v45 }
 0x7dd   :  { %6485 = vrcp.f32 %v3053_v41  ;;  %v9331_v41 = vld [vmem:[#allocation130_spill] sm:$0xff] }
 0x7e4   :  { %v6480_v4 = vpop.eup %6479 }
 0x7e5   :  { %v6482_v6 = vpop.eup %6481 }
 0x7e6   :  { %v6484_v46 = vpop.eup %6483  ;;  %v8060_v5 = vmul.f32 %v6482_v6, %v6480_v4  ;;  %v9332_v4 = vld [vmem:[#allocation110_spill] sm:$0xff]  ;;  %v9333_v6 = vld [vmem:[#allocation131_spill] sm:$0xff] }
 0x7e7   :  { %v6486_v18 = vpop.eup %6485 }
 0x7e8   :  { %v3067_v31 = vmul.f32 %v6486_v18, %v6484_v46  ;;  %v9334_v46 = vld [vmem:[#allocation112_spill] sm:$0xff] }
 0x7e9   :  { %v9335_v18 = vld [vmem:[#allocation132_spill] sm:$0xff] }
 0x7ea   :  { %3143 = vmatprep.mubr.f32.mxu0 %v3067_v31  ;;  %3214 = vmatprep.mubr.f32.mxu1 %v3067_v31 }
 0x7eb   :  { %3144 = vmatmul.mubr.f32.vlgmr.msra.gmra.mrb[28].mxu0 %v8060_v5  ;;  %3215 = vmatmul.mubr.f32.vlgmr.msra.gmra.mrb[20].mxu1 %v8060_v5 }
 0x7ec   :  { %5741 = vmatpush1.bf16.msra.mxu0 %v8856_v14  ;;  %5805 = vmatpush1.bf16.msra.mxu1 %v8857_v21 }
 0x7ed   :  { %3285 = vmatprep.mubr.f32.mxu0 %v3067_v31  ;;  %3356 = vmatprep.mubr.f32.mxu1 %v3067_v31  ;;  %v9336_v31 = vld [vmem:[#allocation114_spill] sm:$0xff] }
 0x7ee   :  { %5743 = vmatprep.subr.bf16.mxu0 %v8858_v44  ;;  %5807 = vmatprep.subr.bf16.mxu1 %v8859_v35 }
 0x7f0   :  { %5745 = vmatpush1.bf16.msra.mxu0 %v8860_v49  ;;  %5809 = vmatpush1.bf16.msra.mxu1 %v8861_v30 }
 0x7f1   :  { %5747 = vmatprep.subr.bf16.mxu0 %v8948_v48  ;;  %5811 = vmatprep.subr.bf16.mxu1 %v8949_v63 }
 0x7f4   :  { %5749 = vmatpush1.bf16.msra.mxu0 %v8864_v27  ;;  %5813 = vmatpush1.bf16.msra.mxu1 %v8950_v42 }
 0x7f5   :  { %5751 = vmatprep.subr.bf16.mxu0 %v8951_v38  ;;  %5815 = vmatprep.subr.bf16.mxu1 %v8952_v28 }
 0x7f8   :  { %5753 = vmatpush1.bf16.msra.mxu0 %v8868_v43  ;;  %5817 = vmatpush1.bf16.msra.mxu1 %v8953_v58 }
 0x7f9   :  { %5755 = vmatprep.subr.bf16.mxu0 %v8870_v36  ;;  %5819 = vmatprep.subr.bf16.mxu1 %v8954_v29 }
 0x7fc   :  { %5757 = vmatpush1.bf16.msra.mxu0 %v8872_v59  ;;  %5821 = vmatpush1.bf16.msra.mxu1 %v8955_v54 }
 0x7fd   :  { %5759 = vmatprep.subr.bf16.mxu0 %v8874_v50  ;;  %5823 = vmatprep.subr.bf16.mxu1 %v8956_v13 }
 0x800   :  { %5761 = vmatpush1.bf16.msra.mxu0 %v8875_v2  ;;  %5825 = vmatpush1.bf16.msra.mxu1 %v8957_v17 }
 0x801   :  { %5763 = vmatprep.subr.bf16.mxu0 %v8877_v51  ;;  %5827 = vmatprep.subr.bf16.mxu1 %v8958_v20 }
 0x804   :  { %5765 = vmatpush1.bf16.msra.mxu0 %v8878_v24  ;;  %5829 = vmatpush1.bf16.msra.mxu1 %v8959_v11 }
 0x805   :  { %5767 = vmatprep.subr.bf16.mxu0 %v9040_v40  ;;  %5831 = vmatprep.subr.bf16.mxu1 %v8960_v22 }
 0x808   :  { %5769 = vmatpush1.bf16.msra.mxu0 %v9041_v0  ;;  %5833 = vmatpush1.bf16.msra.mxu1 %v8961_v3 }
 0x809   :  { %5771 = vmatprep.subr.bf16.mxu0 %v8881_v53  ;;  %5835 = vmatprep.subr.bf16.mxu1 %v8962_v25 }
 0x80c   :  { %5773 = vmatpush1.bf16.msra.mxu0 %v8882_v56  ;;  %5837 = vmatpush1.bf16.msra.mxu1 %v8963_v12 }
 0x80d   :  { %5775 = vmatprep.subr.bf16.mxu0 %v8883_v10  ;;  %5839 = vmatprep.subr.bf16.mxu1 %v8964_v60 }
 0x810   :  { %5777 = vmatpush1.bf16.msra.mxu0 %v8884_v8  ;;  %5841 = vmatpush1.bf16.msra.mxu1 %v8965_v52 }
 0x811   :  { %5779 = vmatprep.subr.bf16.mxu0 %v9320_v61  ;;  %5843 = vmatprep.subr.bf16.mxu1 %v9321_v39 }
 0x814   :  { %5781 = vmatpush1.bf16.msra.mxu0 %v9322_v15  ;;  %5845 = vmatpush1.bf16.msra.mxu1 %v9323_v57 }
 0x815   :  { %5783 = vmatprep.subr.bf16.mxu0 %v9324_v16  ;;  %5847 = vmatprep.subr.bf16.mxu1 %v9325_v62  ;;  %v9413_v62 = vld [vmem:[#allocation142_spill] sm:$0xff] }
 0x818   :  { %5785 = vmatpush1.bf16.msra.mxu0 %v9326_v1  ;;  %5849 = vmatpush1.bf16.msra.mxu1 %v9327_v33  ;;  %v9337_v1 = vld [vmem:[#allocation133_spill] sm:$0xff]  ;;  %v9338_v33 = vld [vmem:[#allocation116_spill] sm:$0xff] }
 0x819   :  { %5787 = vmatprep.subr.bf16.mxu0 %v9328_v7  ;;  %5851 = vmatprep.subr.bf16.mxu1 %v9329_v9  ;;  %v9339_v7 = vld [vmem:[#allocation134_spill] sm:$0xff] }
 0x81a   :  { %v9340_v9 = vld [vmem:[#allocation118_spill] sm:$0xff] }
 0x81c   :  { %5789 = vmatpush1.bf16.msra.mxu0 %v9330_v23  ;;  %5853 = vmatpush1.bf16.msra.mxu1 %v9331_v41  ;;  %v9341_v23 = vld [vmem:[#allocation135_spill] sm:$0xff]  ;;  %v9342_v41 = vld [vmem:[#allocation120_spill] sm:$0xff] }
 0x81d   :  { %5791 = vmatprep.subr.bf16.mxu0 %v9332_v4  ;;  %5855 = vmatprep.subr.bf16.mxu1 %v9333_v6  ;;  %v9343_v4 = vld [vmem:[#allocation136_spill] sm:$0xff]  ;;  %v9344_v6 = vld [vmem:[#allocation9_spill] sm:$0xff] }
 0x820   :  { %5793 = vmatpush1.bf16.msra.mxu0 %v9334_v46  ;;  %5857 = vmatpush1.bf16.msra.mxu1 %v9335_v18  ;;  %v9345_v46 = vld [vmem:[#allocation18_spill] sm:$0xff] }
 0x821   :  { %5795 = vmatprep.subr.bf16.mxu0 %v9336_v31  ;;  %5859 = vmatprep.subr.bf16.mxu1 %v9337_v1  ;;  %v9346_v1 = vld [vmem:[#allocation10_spill] sm:$0xff]  ;;  %v9355_v31 = vld [vmem:[#allocation35_spill] sm:$0xff] }
 0x824   :  { %5797 = vmatpush1.bf16.msra.mxu0 %v9338_v33  ;;  %5861 = vmatpush1.bf16.msra.mxu1 %v9339_v7  ;;  %v9347_v33 = vld [vmem:[#allocation27_spill] sm:$0xff] }
 0x825   :  { %5799 = vmatprep.subr.bf16.mxu0 %v9340_v9  ;;  %5863 = vmatprep.subr.bf16.mxu1 %v9341_v23  ;;  %v9348_v7 = vld [vmem:[#allocation11_spill] sm:$0xff]  ;;  %v9349_v9 = vld [vmem:[#allocation29_spill] sm:$0xff]  ;;  %v9350_v23 = vld [vmem:[#allocation12_spill] sm:$0xff] }
 0x828   :  { %5801 = vmatpush1.bf16.msra.mxu0 %v9342_v41  ;;  %5865 = vmatpush1.bf16.msra.mxu1 %v9343_v4  ;;  %v9351_v41 = vld [vmem:[#allocation31_spill] sm:$0xff]  ;;  %v9352_v4 = vld [vmem:[#allocation13_spill] sm:$0xff] }
 0x829   :  { %5867 = vmatprep.subr.bf16.mxu0 %v9344_v6  ;;  %5931 = vmatprep.subr.bf16.mxu1 %v9345_v46  ;;  %v9353_v6 = vld [vmem:[#allocation33_spill] sm:$0xff]  ;;  %v9354_v46 = vld [vmem:[#allocation14_spill] sm:$0xff] }
 0x82b   :  { %3286 = vmatmul.mubr.f32.vlgmr.msra.gmra.mrb[20].mxu0 %v8060_v5  ;;  %3357 = vmatmul.mubr.f32.vlgmr.msra.gmra.mrb[36].mxu1 %v8060_v5  ;;  %v9356_v5 = vld [vmem:[#allocation15_spill] sm:$0xff] }
 0x82c   :  { %5869 = vmatpush1.bf16.msra.mxu0 %v9346_v1  ;;  %5933 = vmatpush1.bf16.msra.mxu1 %v9347_v33  ;;  %v9357_v1 = vld [vmem:[#allocation37_spill] sm:$0xff]  ;;  %v9358_v33 = vld [vmem:[#allocation16_spill] sm:$0xff] }
 0x82d   :  { %5871 = vmatprep.subr.bf16.mxu0 %v9348_v7  ;;  %5935 = vmatprep.subr.bf16.mxu1 %v9349_v9  ;;  %v9359_v7 = vld [vmem:[#allocation39_spill] sm:$0xff]  ;;  %v9360_v9 = vld [vmem:[#allocation17_spill] sm:$0xff] }
 0x830   :  { %5873 = vmatpush1.bf16.msra.mxu0 %v9350_v23  ;;  %5937 = vmatpush1.bf16.msra.mxu1 %v9351_v41  ;;  %v9361_v23 = vld [vmem:[#allocation41_spill] sm:$0xff]  ;;  %v9362_v41 = vld [vmem:[#allocation19_spill] sm:$0xff] }
 0x831   :  { %5875 = vmatprep.subr.bf16.mxu0 %v9352_v4  ;;  %5939 = vmatprep.subr.bf16.mxu1 %v9353_v6  ;;  %v9363_v4 = vld [vmem:[#allocation43_spill] sm:$0xff]  ;;  %v9364_v6 = vld [vmem:[#allocation20_spill] sm:$0xff] }
 0x834   :  { %5877 = vmatpush1.bf16.msra.mxu0 %v9354_v46  ;;  %5941 = vmatpush1.bf16.msra.mxu1 %v9355_v31  ;;  %v9365_v46 = vld [vmem:[#allocation45_spill] sm:$0xff] }
 0x835   :  { %5879 = vmatprep.subr.bf16.mxu0 %v9356_v5  ;;  %5943 = vmatprep.subr.bf16.mxu1 %v9357_v1  ;;  %v9366_v31 = vld [vmem:[#allocation21_spill] sm:$0xff]  ;;  %v9367_v5 = vld [vmem:[#allocation47_spill] sm:$0xff]  ;;  %v9368_v1 = vld [vmem:[#allocation22_spill] sm:$0xff] }
 0x838   :  { %5881 = vmatpush1.bf16.msra.mxu0 %v9358_v33  ;;  %5945 = vmatpush1.bf16.msra.mxu1 %v9359_v7  ;;  %v9369_v33 = vld [vmem:[#allocation49_spill] sm:$0xff]  ;;  %v9370_v7 = vld [vmem:[#allocation23_spill] sm:$0xff] }
 0x839   :  { %5883 = vmatprep.subr.bf16.mxu0 %v9360_v9  ;;  %5947 = vmatprep.subr.bf16.mxu1 %v9361_v23  ;;  %v9371_v9 = vld [vmem:[#allocation51_spill] sm:$0xff]  ;;  %v9372_v23 = vld [vmem:[#allocation24_spill] sm:$0xff] }
 0x83c   :  { %5885 = vmatpush1.bf16.msra.mxu0 %v9362_v41  ;;  %5949 = vmatpush1.bf16.msra.mxu1 %v9363_v4  ;;  %v9373_v41 = vld [vmem:[#allocation53_spill] sm:$0xff] }
 0x83d   :  { %5887 = vmatprep.subr.bf16.mxu0 %v9364_v6  ;;  %5951 = vmatprep.subr.bf16.mxu1 %v9365_v46  ;;  %v9374_v4 = vld [vmem:[#allocation25_spill] sm:$0xff]  ;;  %v9375_v6 = vld [vmem:[#allocation55_spill] sm:$0xff]  ;;  %v9376_v46 = vld [vmem:[#allocation26_spill] sm:$0xff] }
 0x840   :  { %5889 = vmatpush1.bf16.msra.mxu0 %v9366_v31  ;;  %5953 = vmatpush1.bf16.msra.mxu1 %v9367_v5  ;;  %v9377_v31 = vld [vmem:[#allocation57_spill] sm:$0xff]  ;;  %v9378_v5 = vld [vmem:[#allocation28_spill] sm:$0xff] }
 0x841   :  { %5891 = vmatprep.subr.bf16.mxu0 %v9368_v1  ;;  %5955 = vmatprep.subr.bf16.mxu1 %v9369_v33  ;;  %v9379_v1 = vld [vmem:[#allocation59_spill] sm:$0xff]  ;;  %v9380_v33 = vld [vmem:[#allocation30_spill] sm:$0xff] }
 0x844   :  { %5893 = vmatpush1.bf16.msra.mxu0 %v9370_v7  ;;  %5957 = vmatpush1.bf16.msra.mxu1 %v9371_v9  ;;  %v9381_v7 = vld [vmem:[#allocation61_spill] sm:$0xff]  ;;  %v9382_v9 = vld [vmem:[#allocation32_spill] sm:$0xff] }
 0x845   :  { %5895 = vmatprep.subr.bf16.mxu0 %v9372_v23  ;;  %5959 = vmatprep.subr.bf16.mxu1 %v9373_v41  ;;  %v9383_v23 = vld [vmem:[#allocation63_spill] sm:$0xff]  ;;  %v9384_v41 = vld [vmem:[#allocation34_spill] sm:$0xff] }
 0x848   :  { %5897 = vmatpush1.bf16.msra.mxu0 %v9374_v4  ;;  %5961 = vmatpush1.bf16.msra.mxu1 %v9375_v6  ;;  %v9385_v4 = vld [vmem:[#allocation65_spill] sm:$0xff]  ;;  %v9386_v6 = vld [vmem:[#allocation36_spill] sm:$0xff] }
 0x849   :  { %5899 = vmatprep.subr.bf16.mxu0 %v9376_v46  ;;  %5963 = vmatprep.subr.bf16.mxu1 %v9377_v31  ;;  %v9387_v46 = vld [vmem:[#allocation67_spill] sm:$0xff]  ;;  %v9388_v31 = vld [vmem:[#allocation38_spill] sm:$0xff] }
 0x84c   :  { %5901 = vmatpush1.bf16.msra.mxu0 %v9378_v5  ;;  %5965 = vmatpush1.bf16.msra.mxu1 %v9379_v1  ;;  %v9389_v5 = vld [vmem:[#allocation69_spill] sm:$0xff]  ;;  %v9390_v1 = vld [vmem:[#allocation40_spill] sm:$0xff] }
 0x84d   :  { %5903 = vmatprep.subr.bf16.mxu0 %v9380_v33  ;;  %5967 = vmatprep.subr.bf16.mxu1 %v9381_v7  ;;  %v9391_v33 = vld [vmem:[#allocation71_spill] sm:$0xff]  ;;  %v9392_v7 = vld [vmem:[#allocation42_spill] sm:$0xff] }
 0x850   :  { %5905 = vmatpush1.bf16.msra.mxu0 %v9382_v9  ;;  %5969 = vmatpush1.bf16.msra.mxu1 %v9383_v23  ;;  %v9393_v9 = vld [vmem:[#allocation73_spill] sm:$0xff]  ;;  %v9394_v23 = vld [vmem:[#allocation44_spill] sm:$0xff] }
 0x851   :  { %5907 = vmatprep.subr.bf16.mxu0 %v9384_v41  ;;  %5971 = vmatprep.subr.bf16.mxu1 %v9385_v4  ;;  %v9395_v41 = vld [vmem:[#allocation75_spill] sm:$0xff]  ;;  %v9396_v4 = vld [vmem:[#allocation46_spill] sm:$0xff] }
 0x854   :  { %5909 = vmatpush1.bf16.msra.mxu0 %v9386_v6  ;;  %5973 = vmatpush1.bf16.msra.mxu1 %v9387_v46  ;;  %v9397_v6 = vld [vmem:[#allocation77_spill] sm:$0xff]  ;;  %v9398_v46 = vld [vmem:[#allocation48_spill] sm:$0xff] }
 0x855   :  { %5911 = vmatprep.subr.bf16.mxu0 %v9388_v31  ;;  %5975 = vmatprep.subr.bf16.mxu1 %v9389_v5  ;;  %v9399_v31 = vld [vmem:[#allocation79_spill] sm:$0xff]  ;;  %v9400_v5 = vld [vmem:[#allocation50_spill] sm:$0xff] }
 0x858   :  { %5913 = vmatpush1.bf16.msra.mxu0 %v9390_v1  ;;  %5977 = vmatpush1.bf16.msra.mxu1 %v9391_v33  ;;  %v9401_v1 = vld [vmem:[#allocation81_spill] sm:$0xff]  ;;  %v9402_v33 = vld [vmem:[#allocation52_spill] sm:$0xff] }
 0x859   :  { %5915 = vmatprep.subr.bf16.mxu0 %v9392_v7  ;;  %5979 = vmatprep.subr.bf16.mxu1 %v9393_v9  ;;  %v9403_v7 = vld [vmem:[#allocation83_spill] sm:$0xff]  ;;  %v9404_v9 = vld [vmem:[#allocation54_spill] sm:$0xff] }
 0x85c   :  { %5917 = vmatpush1.bf16.msra.mxu0 %v9394_v23  ;;  %5981 = vmatpush1.bf16.msra.mxu1 %v9395_v41  ;;  %v9405_v23 = vld [vmem:[#allocation85_spill] sm:$0xff]  ;;  %v9406_v41 = vld [vmem:[#allocation56_spill] sm:$0xff] }
 0x85d   :  { %5919 = vmatprep.subr.bf16.mxu0 %v9396_v4  ;;  %5983 = vmatprep.subr.bf16.mxu1 %v9397_v6  ;;  %v9407_v4 = vld [vmem:[#allocation87_spill] sm:$0xff]  ;;  %v9408_v6 = vld [vmem:[#allocation58_spill] sm:$0xff] }
 0x860   :  { %5921 = vmatpush1.bf16.msra.mxu0 %v9398_v46  ;;  %5985 = vmatpush1.bf16.msra.mxu1 %v9399_v31  ;;  %v9409_v46 = vld [vmem:[#allocation89_spill] sm:$0xff] }
 0x861   :  { %5923 = vmatprep.subr.bf16.mxu0 %v9400_v5  ;;  %5987 = vmatprep.subr.bf16.mxu1 %v9401_v1  ;;  %v9410_v31 = vld [vmem:[#allocation145_spill] sm:$0xff]  ;;  %v9412_v1 = vld [vmem:[#allocation146_spill] sm:$0xff] }
 0x862   :  { %v9411_v5 = vld [vmem:[#allocation141_spill] sm:$0xff] }
 0x863   :  { %v293_v18 = vadd.f32 %v9411_v5, %v9410_v31 }
 0x864   :  { %5925 = vmatpush1.bf16.msra.mxu0 %v9402_v33  ;;  %5989 = vmatpush1.bf16.msra.mxu1 %v9403_v7  ;;  %v295_v33 = vadd.f32 %v9413_v62, %v9412_v1 }
 0x865   :  { %5927 = vmatprep.subr.bf16.mxu0 %v9404_v9  ;;  %5991 = vmatprep.subr.bf16.mxu1 %v9405_v23 }
 0x868   :  { %5929 = vmatpush1.bf16.msra.mxu0 %v9406_v41  ;;  %5993 = vmatpush1.bf16.msra.mxu1 %v9407_v4 }
 0x869   :  { %5995 = vmatprep.subr.bf16.mxu0 %v9408_v6  ;;  %6059 = vmatprep.subr.bf16.mxu1 %v9409_v46 }
 0x8be   :  { %v3145_v16 = vpop.f32.mrb[28].mxu0  ;;  %v3216_v7 = vpop.f32.mrb[20].mxu1 }
 0x8bf   :  { %v3363_v57 = vadd.f32 %v3145_v16, %v293_v18  ;;  %v3147_v9 = vpop.f32.mrb[29].mxu0  ;;  %v3218_v15 = vpop.f32.mrb[21].mxu1  ;;  %v6198_v41 = vadd.f32 %v3216_v7, %v7278_v26 }
 0x8c0   :  { %v3364_v23 = vadd.f32 %v3147_v9, %v295_v33  ;;  %v6199_v4 = vadd.f32 %v3218_v15, %v8945_v32 }
 0x8c1   :  { %v3962_v39 = vmul.f32 -1.442695, %v3363_v57  ;;  %v3964_v6 = vmul.f32 -1.442695, %v6198_v41 }
 0x8c2   :  { %v3963_v61 = vmul.f32 -1.442695, %v3364_v23  ;;  %v3965_v46 = vmul.f32 -1.442695, %v6199_v4 }
 0x8c3   :  { %6487 = vpow2.f32 %v3962_v39 }
 0x8c4   :  { %6489 = vpow2.f32 %v3964_v6 }
 0x8c5   :  { %6491 = vpow2.f32 %v3963_v61 }
 0x8c6   :  { %6493 = vpow2.f32 %v3965_v46 }
 0x8cd   :  { %v6488_v5 = vpop.eup %6487 }
 0x8ce   :  { %v6490_v62 = vpop.eup %6489  ;;  %v3377_v16 = vadd.f32 1.0, %v6488_v5 }
 0x8cf   :  { %v6492_v1 = vpop.eup %6491  ;;  %v3389_v18 = vadd.f32 1.0, %v6490_v62 }
 0x8d0   :  { %v6494_v31 = vpop.eup %6493  ;;  %v3378_v52 = vadd.f32 1.0, %v6492_v1  ;;  %6495 = vrcp.f32 %v3377_v16 }
 0x8d1   :  { %v3390_v33 = vadd.f32 1.0, %v6494_v31  ;;  %6497 = vrcp.f32 %v3389_v18 }
 0x8d2   :  { %6499 = vrcp.f32 %v3378_v52 }
 0x8d3   :  { %6501 = vrcp.f32 %v3390_v33 }
 0x8da   :  { %v6496_v1 = vpop.eup %6495 }
 0x8db   :  { %v6498_v6 = vpop.eup %6497 }
 0x8dc   :  { %v6500_v52 = vpop.eup %6499  ;;  %v3409_v16 = vmul.f32 %v6498_v6, %v8054_v34  ;;  %v3790_v6 = vld [vmem:[%s8398_s4 + $0xa0] sm:$0xff] }
 0x8dd   :  { %v6502_v46 = vpop.eup %6501 }
 0x8fe   :  { %v3287_v7 = vpop.f32.mrb[20].mxu0  ;;  %v3358_v15 = vpop.f32.mrb[36].mxu1 }
 0x8ff   :  { %v6214_v57 = vadd.f32 %v3287_v7, %v8946_v55  ;;  %v6230_v39 = vadd.f32 %v3358_v15, %v9224_v47  ;;  %v3289_v9 = vpop.f32.mrb[21].mxu0  ;;  %v3360_v61 = vpop.f32.mrb[37].mxu1  ;;  %v3410_v7 = vmul.f32 %v6502_v46, %v8056_v45 }
 0x900   :  { %v6215_v23 = vadd.f32 %v3289_v9, %v9319_v19  ;;  %v6231_v41 = vadd.f32 %v3360_v61, %v7300_v37 }
 0x901   :  { %6503 = vtanh.f32 %v6214_v57  ;;  %v3966_v4 = vmul.f32 -1.442695, %v6230_v39 }
 0x902   :  { %6505 = vtanh.f32 %v6215_v23  ;;  %v3967_v31 = vmul.f32 -1.442695, %v6231_v41 }
 0x903   :  { %6507 = vpow2.f32 %v3966_v4 }
 0x904   :  { %6509 = vpow2.f32 %v3967_v31 }
 0x90b   :  { %v6504_v5 = vpop.eup %6503 }
 0x90c   :  { %v6506_v62 = vpop.eup %6505  ;;  %v3411_v18 = vmul.f32 %v6504_v5, %v6496_v1  ;;  %v3774_v5 = vld [vmem:[%s8398_s4 + $0x20] sm:$0xff] }
 0x90d   :  { %v6508_v33 = vpop.eup %6507  ;;  %v3412_v15 = vmul.f32 %v6506_v62, %v6500_v52  ;;  %v3791_v52 = vld [vmem:[%s8398_s4 + $0xa8] sm:$0xff] }
 0x90e   :  { %v6510_v9 = vpop.eup %6509  ;;  %v8206_v57 = vadd.f32 %v3411_v18, %v3409_v16  ;;  %v3403_v39 = vadd.f32 1.0, %v6508_v33  ;;  %v6130_v46 = vpack.c.bf16 %v3791_v52, %v3790_v6  ;;  %v3775_v62 = vld [vmem:[%s8398_s4 + $0x28] sm:$0xff]  ;;  %v3792_v18 = vld [vmem:[%s8398_s4 + $0xb0] sm:$0xff]  ;;  %v3793_v33 = vld [vmem:[%s8398_s4 + $0xb8] sm:$0xff] }
 0x90f   :  { %v8208_v61 = vadd.f32 %v3412_v15, %v3410_v7  ;;  %v3404_v23 = vadd.f32 1.0, %v6510_v9  ;;  %v6132_v16 = vpack.c.bf16 %v3775_v62, %v3774_v5  ;;  %v6134_v7 = vpack.c.bf16 %v3793_v33, %v3792_v18  ;;  %v3776_v15 = vld [vmem:[%s8398_s4 + $0x30] sm:$0xff]  ;;  %v3777_v9 = vld [vmem:[%s8398_s4 + $0x38] sm:$0xff] }
 0x910   :  { %6511 = vtanh.f32 %v8206_v57 }
 0x911   :  { %6513 = vrcp.f32 %v3403_v39  ;;  %v6136_v39 = vpack.c.bf16 %v3777_v9, %v3776_v15 }
 0x912   :  { %6515 = vtanh.f32 %v8208_v61 }
 0x913   :  { %6517 = vrcp.f32 %v3404_v23  ;;  %v3794_v23 = vld [vmem:[%s8398_s4 + $0xc0] sm:$0xff] }
 0x91a   :  { %v6512_v41 = vpop.eup %6511 }
 0x91b   :  { %v6514_v34 = vpop.eup %6513 }
 0x91c   :  { %v6516_v4 = vpop.eup %6515  ;;  %v8212_v45 = vmul.f32 %v6514_v34, %v6512_v41  ;;  %v3795_v41 = vld [vmem:[%s8398_s4 + $0xc8] sm:$0xff] }
 0x91d   :  { %v6518_v31 = vpop.eup %6517  ;;  %v6138_v34 = vpack.c.bf16 %v3795_v41, %v3794_v23 }
 0x91e   :  { %v3418_v1 = vmul.f32 %v6518_v31, %v6516_v4  ;;  %v3778_v4 = vld [vmem:[%s8398_s4 + $0x40] sm:$0xff]  ;;  %v3779_v31 = vld [vmem:[%s8398_s4 + $0x48] sm:$0xff] }
 0x920   :  { %3494 = vmatprep.mubr.f32.mxu0 %v3418_v1  ;;  %3565 = vmatprep.mubr.f32.mxu1 %v3418_v1 }
 0x921   :  { %3495 = vmatmul.mubr.f32.vlgmr.msra.gmra.mrb[30].mxu0 %v8212_v45  ;;  %3566 = vmatmul.mubr.f32.vlgmr.msra.gmra.mrb[22].mxu1 %v8212_v45 }
 0x922   :  { %5997 = vmatpush1.bf16.msra.mxu0 %v8856_v14  ;;  %6061 = vmatpush1.bf16.msra.mxu1 %v8857_v21  ;;  %v9414_v14 = vld [vmem:[#allocation124_spill] sm:$0xff]  ;;  %v9415_v21 = vld [vmem:[#allocation98_spill] sm:$0xff] }
 0x923   :  { %3636 = vmatprep.mubr.f32.mxu0 %v3418_v1  ;;  %3707 = vmatprep.mubr.f32.mxu1 %v3418_v1  ;;  %v6140_v1 = vpack.c.bf16 %v3779_v31, %v3778_v4 }
 0x924   :  { %5999 = vmatprep.subr.bf16.mxu0 %v8858_v44  ;;  %6063 = vmatprep.subr.bf16.mxu1 %v8859_v35  ;;  %v9416_v44 = vld [vmem:[#allocation125_spill] sm:$0xff]  ;;  %v9417_v35 = vld [vmem:[#allocation100_spill] sm:$0xff] }
 0x926   :  { %6001 = vmatpush1.bf16.msra.mxu0 %v8860_v49  ;;  %6065 = vmatpush1.bf16.msra.mxu1 %v8861_v30  ;;  %v9419_v49 = vld [vmem:[#allocation102_spill] sm:$0xff]  ;;  %v9420_v30 = vld [vmem:[#allocation127_spill] sm:$0xff] }
 0x927   :  { %6003 = vmatprep.subr.bf16.mxu0 %v8948_v48  ;;  %6067 = vmatprep.subr.bf16.mxu1 %v8949_v63  ;;  %v9432_v48 = vld [vmem:[#allocation133_spill] sm:$0xff]  ;;  %v9433_v63 = vld [vmem:[#allocation116_spill] sm:$0xff] }
 0x92a   :  { %6005 = vmatpush1.bf16.msra.mxu0 %v8864_v27  ;;  %6069 = vmatpush1.bf16.msra.mxu1 %v8950_v42  ;;  %v9423_v27 = vld [vmem:[#allocation106_spill] sm:$0xff] }
 0x92b   :  { %6007 = vmatprep.subr.bf16.mxu0 %v8951_v38  ;;  %6071 = vmatprep.subr.bf16.mxu1 %v8952_v28  ;;  %v9434_v42 = vld [vmem:[#allocation134_spill] sm:$0xff]  ;;  %v9436_v28 = vld [vmem:[#allocation135_spill] sm:$0xff] }
 0x92c   :  { %v9435_v38 = vld [vmem:[#allocation118_spill] sm:$0xff] }
 0x92e   :  { %6009 = vmatpush1.bf16.msra.mxu0 %v8868_v43  ;;  %6073 = vmatpush1.bf16.msra.mxu1 %v8953_v58  ;;  %v9428_v43 = vld [vmem:[#allocation131_spill] sm:$0xff]  ;;  %v9437_v58 = vld [vmem:[#allocation120_spill] sm:$0xff] }
 0x92f   :  { %6011 = vmatprep.subr.bf16.mxu0 %v8870_v36  ;;  %6075 = vmatprep.subr.bf16.mxu1 %v8954_v29  ;;  %v9430_v36 = vld [vmem:[#allocation132_spill] sm:$0xff] }
 0x930   :  { %v9438_v29 = vld [vmem:[#allocation136_spill] sm:$0xff] }
 0x932   :  { %6013 = vmatpush1.bf16.msra.mxu0 %v8872_v59  ;;  %6077 = vmatpush1.bf16.msra.mxu1 %v8955_v54  ;;  %v9431_v59 = vld [vmem:[#allocation114_spill] sm:$0xff]  ;;  %v3786_v54 = vld [vmem:[%s8398_s4 + $0x80] sm:$0xff] }
 0x933   :  { %6015 = vmatprep.subr.bf16.mxu0 %v8874_v50  ;;  %6079 = vmatprep.subr.bf16.mxu1 %v8956_v13  ;;  %v9421_v50 = vld [vmem:[#allocation104_spill] sm:$0xff]  ;;  %v3787_v13 = vld [vmem:[%s8398_s4 + $0x88] sm:$0xff] }
 0x936   :  { %6017 = vmatpush1.bf16.msra.mxu0 %v8875_v2  ;;  %6081 = vmatpush1.bf16.msra.mxu1 %v8957_v17  ;;  %v9425_v2 = vld [vmem:[#allocation108_spill] sm:$0xff]  ;;  %v6122_v17 = vpack.c.bf16 %v3787_v13, %v3786_v54 }
 0x937   :  { %6019 = vmatprep.subr.bf16.mxu0 %v8877_v51  ;;  %6083 = vmatprep.subr.bf16.mxu1 %v8958_v20  ;;  %v9427_v51 = vld [vmem:[#allocation110_spill] sm:$0xff]  ;;  %v3770_v20 = vld [vmem:[%s8398_s4] sm:$0xff] }
 0x93a   :  { %6021 = vmatpush1.bf16.msra.mxu0 %v8878_v24  ;;  %6085 = vmatpush1.bf16.msra.mxu1 %v8959_v11  ;;  %v9429_v24 = vld [vmem:[#allocation112_spill] sm:$0xff]  ;;  %v3771_v11 = vld [vmem:[%s8398_s4 + $0x8] sm:$0xff] }
 0x93b   :  { %6023 = vmatprep.subr.bf16.mxu0 %v9040_v40  ;;  %6087 = vmatprep.subr.bf16.mxu1 %v8960_v22  ;;  %v6124_v22 = vpack.c.bf16 %v3771_v11, %v3770_v20  ;;  %v3773_v40 = vld [vmem:[%s8398_s4 + $0x18] sm:$0xff] }
 0x93e   :  { %6025 = vmatpush1.bf16.msra.mxu0 %v9041_v0  ;;  %6089 = vmatpush1.bf16.msra.mxu1 %v8961_v3  ;;  %v3788_v3 = vld [vmem:[%s8398_s4 + $0x90] sm:$0xff] }
 0x93f   :  { %6027 = vmatprep.subr.bf16.mxu0 %v8881_v53  ;;  %6091 = vmatprep.subr.bf16.mxu1 %v8962_v25  ;;  %v9418_v53 = vld [vmem:[#allocation126_spill] sm:$0xff]  ;;  %v3789_v25 = vld [vmem:[%s8398_s4 + $0x98] sm:$0xff] }
 0x942   :  { %6029 = vmatpush1.bf16.msra.mxu0 %v8882_v56  ;;  %6093 = vmatpush1.bf16.msra.mxu1 %v8963_v12  ;;  %v9426_v56 = vld [vmem:[#allocation130_spill] sm:$0xff]  ;;  %v6126_v12 = vpack.c.bf16 %v3789_v25, %v3788_v3 }
 0x943   :  { %6031 = vmatprep.subr.bf16.mxu0 %v8883_v10  ;;  %6095 = vmatprep.subr.bf16.mxu1 %v8964_v60  ;;  %v9422_v10 = vld [vmem:[#allocation128_spill] sm:$0xff]  ;;  %v3772_v60 = vld [vmem:[%s8398_s4 + $0x10] sm:$0xff] }
 0x944   :  { %v6128_v0 = vpack.c.bf16 %v3773_v40, %v3772_v60 }
 0x946   :  { %6033 = vmatpush1.bf16.msra.mxu0 %v8884_v8  ;;  %6097 = vmatpush1.bf16.msra.mxu1 %v9414_v14  ;;  %v9424_v8 = vld [vmem:[#allocation129_spill] sm:$0xff]  ;;  %v3797_v14 = vld [vmem:[%s8398_s4 + $0xd8] sm:$0xff] }
 0x947   :  { %6035 = vmatprep.subr.bf16.mxu0 %v9415_v21  ;;  %6099 = vmatprep.subr.bf16.mxu1 %v9416_v44  ;;  %v3780_v44 = vld [vmem:[%s8398_s4 + $0x50] sm:$0xff] }
 0x94a   :  { %6037 = vmatpush1.bf16.msra.mxu0 %v9417_v35  ;;  %6101 = vmatpush1.bf16.msra.mxu1 %v9418_v53  ;;  %v3781_v35 = vld [vmem:[%s8398_s4 + $0x58] sm:$0xff]  ;;  %v3798_v53 = vld [vmem:[%s8398_s4 + $0xe0] sm:$0xff] }
 0x94b   :  { %6039 = vmatprep.subr.bf16.mxu0 %v9419_v49  ;;  %6103 = vmatprep.subr.bf16.mxu1 %v9420_v30  ;;  %v6144_v49 = vpack.c.bf16 %v3781_v35, %v3780_v44  ;;  %v3799_v30 = vld [vmem:[%s8398_s4 + $0xe8] sm:$0xff] }
 0x94e   :  { %6041 = vmatpush1.bf16.msra.mxu0 %v9421_v50  ;;  %6105 = vmatpush1.bf16.msra.mxu1 %v9422_v10  ;;  %v3782_v50 = vld [vmem:[%s8398_s4 + $0x60] sm:$0xff]  ;;  %v3783_v10 = vld [vmem:[%s8398_s4 + $0x68] sm:$0xff] }
 0x94f   :  { %6043 = vmatprep.subr.bf16.mxu0 %v9423_v27  ;;  %6107 = vmatprep.subr.bf16.mxu1 %v9424_v8  ;;  %v6146_v27 = vpack.c.bf16 %v3799_v30, %v3798_v53  ;;  %v3800_v8 = vld [vmem:[%s8398_s4 + $0xf0] sm:$0xff] }
 0x952   :  { %6045 = vmatpush1.bf16.msra.mxu0 %v9425_v2  ;;  %6109 = vmatpush1.bf16.msra.mxu1 %v9426_v56  ;;  %v3801_v2 = vld [vmem:[%s8398_s4 + $0xf8] sm:$0xff]  ;;  %v6148_v56 = vpack.c.bf16 %v3783_v10, %v3782_v50 }
 0x953   :  { %6047 = vmatprep.subr.bf16.mxu0 %v9427_v51  ;;  %6111 = vmatprep.subr.bf16.mxu1 %v9428_v43  ;;  %v6150_v51 = vpack.c.bf16 %v3801_v2, %v3800_v8  ;;  %v3784_v43 = vld [vmem:[%s8398_s4 + $0x70] sm:$0xff] }
 0x956   :  { %6049 = vmatpush1.bf16.msra.mxu0 %v9429_v24  ;;  %6113 = vmatpush1.bf16.msra.mxu1 %v9430_v36  ;;  %v3785_v24 = vld [vmem:[%s8398_s4 + $0x78] sm:$0xff] }
 0x957   :  { %6051 = vmatprep.subr.bf16.mxu0 %v9431_v59  ;;  %6115 = vmatprep.subr.bf16.mxu1 %v9432_v48  ;;  %v6152_v36 = vpack.c.bf16 %v3785_v24, %v3784_v43  ;;  %v9439_v59 = vld [vmem:[#allocation145_spill] sm:$0xff]  ;;  %v9440_v48 = vld [vmem:[#allocation143_spill] sm:$0xff] }
 0x95a   :  { %6053 = vmatpush1.bf16.msra.mxu0 %v9433_v63  ;;  %6117 = vmatpush1.bf16.msra.mxu1 %v9434_v42  ;;  %v299_v63 = vadd.f32 %v9440_v48, %v9439_v59  ;;  %v9441_v42 = vld [vmem:[#allocation146_spill] sm:$0xff] }
 0x95b   :  { %6055 = vmatprep.subr.bf16.mxu0 %v9435_v38  ;;  %6119 = vmatprep.subr.bf16.mxu1 %v9436_v28  ;;  %v9442_v38 = vld [vmem:[#allocation144_spill] sm:$0xff] }
 0x95c   :  { %v301_v28 = vadd.f32 %v9442_v38, %v9441_v42 }
 0x95e   :  { %6057 = vmatpush1.bf16.msra.mxu0 %v9437_v58  ;;  %6121 = vmatpush1.bf16.msra.mxu1 %v9438_v29 }
 0x95f   :  { %6123 = vmatprep.subr.bf16.mxu0 %v6122_v17 }
 0x961   :  { %3637 = vmatmul.mubr.f32.vlgmr.msra.gmra.mrb[22].mxu0 %v8212_v45  ;;  %3708 = vmatmul.mubr.f32.vlgmr.msra.gmra.mrb[38].mxu1 %v8212_v45  ;;  %v3796_v45 = vld [vmem:[%s8398_s4 + $0xd0] sm:$0xff] }
 0x962   :  { %6125 = vmatpush3.bf16.msra.mxu0 %v6124_v22  ;;  %v6142_v21 = vpack.c.bf16 %v3797_v14, %v3796_v45 }
 0x963   :  { %6127 = vmatprep.subr.bf16.mxu0 %v6126_v12 }
 0x966   :  { %6129 = vmatpush3.bf16.msra.mxu0 %v6128_v0 }
 0x967   :  { %6131 = vmatprep.subr.bf16.mxu0 %v6130_v46 }
 0x96a   :  { %6133 = vmatpush3.bf16.msra.mxu0 %v6132_v16 }
 0x96b   :  { %6135 = vmatprep.subr.bf16.mxu0 %v6134_v7 }
 0x96e   :  { %6137 = vmatpush3.bf16.msra.mxu0 %v6136_v39 }
 0x96f   :  { %6139 = vmatprep.subr.bf16.mxu0 %v6138_v34 }
 0x972   :  { %6141 = vmatpush3.bf16.msra.mxu0 %v6140_v1 }
 0x973   :  { %6143 = vmatprep.subr.bf16.mxu0 %v6142_v21 }
 0x976   :  { %6145 = vmatpush3.bf16.msra.mxu0 %v6144_v49 }
 0x977   :  { %6147 = vmatprep.subr.bf16.mxu0 %v6146_v27 }
 0x97a   :  { %6149 = vmatpush3.bf16.msra.mxu0 %v6148_v56 }
 0x97b   :  { %6151 = vmatprep.subr.bf16.mxu0 %v6150_v51 }
 0x97e   :  { %6153 = vmatpush3.bf16.msra.mxu0 %v6152_v36 }
 0x9f4   :  { %v3496_v58 = vpop.f32.mrb[30].mxu0  ;;  %v3567_v29 = vpop.f32.mrb[22].mxu1 }
 0x9f5   :  { %v3714_v54 = vadd.f32 %v3496_v58, %v299_v63  ;;  %v3498_v13 = vpop.f32.mrb[31].mxu0  ;;  %v3569_v17 = vpop.f32.mrb[23].mxu1  ;;  %v6200_v11 = vadd.f32 %v3567_v29, %v7278_v26 }
 0x9f6   :  { %v3715_v20 = vadd.f32 %v3498_v13, %v301_v28  ;;  %v6201_v22 = vadd.f32 %v3569_v17, %v8945_v32 }
 0x9f7   :  { %v3968_v3 = vmul.f32 -1.442695, %v3714_v54  ;;  %v3970_v25 = vmul.f32 -1.442695, %v6200_v11 }
 0x9f8   :  { %v3969_v12 = vmul.f32 -1.442695, %v3715_v20  ;;  %v3971_v60 = vmul.f32 -1.442695, %v6201_v22 }
 0x9f9   :  { %6519 = vpow2.f32 %v3968_v3 }
 0x9fa   :  { %6521 = vpow2.f32 %v3970_v25 }
 0x9fb   :  { %6523 = vpow2.f32 %v3969_v12 }
 0x9fc   :  { %6525 = vpow2.f32 %v3971_v60 }
 0xa03   :  { %v6520_v40 = vpop.eup %6519 }
 0xa04   :  { %v6522_v0 = vpop.eup %6521  ;;  %v3728_v46 = vadd.f32 1.0, %v6520_v40 }
 0xa05   :  { %v6524_v6 = vpop.eup %6523  ;;  %v3740_v5 = vadd.f32 1.0, %v6522_v0 }
 0xa06   :  { %v6526_v52 = vpop.eup %6525  ;;  %v3729_v62 = vadd.f32 1.0, %v6524_v6  ;;  %6527 = vrcp.f32 %v3728_v46 }
 0xa07   :  { %v3741_v16 = vadd.f32 1.0, %v6526_v52  ;;  %6529 = vrcp.f32 %v3740_v5 }
 0xa08   :  { %6531 = vrcp.f32 %v3729_v62 }
 0xa09   :  { %6533 = vrcp.f32 %v3741_v16 }
 0xa10   :  { %v6528_v34 = vpop.eup %6527 }
 0xa11   :  { %v6530_v4 = vpop.eup %6529 }
 0xa12   :  { %v6532_v31 = vpop.eup %6531 }
 0xa13   :  { %v6534_v1 = vpop.eup %6533 }
 0xa34   :  { %v3638_v26 = vpop.f32.mrb[22].mxu0  ;;  %v3709_v32 = vpop.f32.mrb[38].mxu1 }
 0xa35   :  { %v6216_v18 = vadd.f32 %v3638_v26, %v8946_v55  ;;  %v6232_v33 = vadd.f32 %v3709_v32, %v9224_v47  ;;  %v3640_v7 = vpop.f32.mrb[23].mxu0  ;;  %v3711_v15 = vpop.f32.mrb[39].mxu1  ;;  %v3760_v47 = vmul.f32 %v6530_v4, %v8206_v57 }
 0xa36   :  { %v6217_v9 = vadd.f32 %v3640_v7, %v9319_v19  ;;  %v6233_v39 = vadd.f32 %v3711_v15, %v7300_v37  ;;  %v3761_v19 = vmul.f32 %v6534_v1, %v8208_v61  ;;  %v3974_v61 = vld [vmem:[%s8399_s5] ss:$0 sm:$0xff] }
 0xa37   :  { %6535 = vtanh.f32 %v6216_v18  ;;  %v3972_v23 = vmul.f32 -1.442695, %v6232_v33 }
 0xa38   :  { %6537 = vtanh.f32 %v6217_v9  ;;  %v3973_v41 = vmul.f32 -1.442695, %v6233_v39 }
 0xa39   :  { %6539 = vpow2.f32 %v3972_v23 }
 0xa3a   :  { %6541 = vpow2.f32 %v3973_v41 }
 0xa41   :  { %v6536_v55 = vpop.eup %6535 }
 0xa42   :  { %v6538_v45 = vpop.eup %6537  ;;  %v3762_v14 = vmul.f32 %v6536_v55, %v6528_v34 }
 0xa43   :  { %v6540_v21 = vpop.eup %6539  ;;  %v3763_v44 = vmul.f32 %v6538_v45, %v6532_v31 }
 0xa44   :  { %v6542_v37 = vpop.eup %6541  ;;  %v3764_v35 = vadd.f32 %v3762_v14, %v3760_v47  ;;  %v3754_v53 = vadd.f32 1.0, %v6540_v21 }
 0xa45   :  { %v3765_v49 = vadd.f32 %v3763_v44, %v3761_v19  ;;  %v3755_v30 = vadd.f32 1.0, %v6542_v37 }
 0xa46   :  { %6543 = vtanh.f32 %v3764_v35 }
 0xa47   :  { %6545 = vrcp.f32 %v3754_v53 }
 0xa48   :  { %6547 = vtanh.f32 %v3765_v49 }
 0xa49   :  { %6549 = vrcp.f32 %v3755_v30 }
 0xa50   :  { %v6544_v50 = vpop.eup %6543 }
 0xa51   :  { %v6546_v10 = vpop.eup %6545 }
 0xa52   :  { %v6548_v27 = vpop.eup %6547  ;;  %v3768_v8 = vmul.f32 %v6546_v10, %v6544_v50 }
 0xa53   :  { %v6550_v2 = vpop.eup %6549 }
 0xa54   :  { %v3769_v57 = vmul.f32 %v6550_v2, %v6548_v27 }
 0xa56   :  { %3873 = vmatprep.mubr.f32.mxu0 %v3769_v57 }
 0xa57   :  { %3874 = vmatmul.mubr.f32.vlgmr.msra.gmra.mrb[32].mxu0 %v3768_v8 }
 0xb2a   :  { %v4007_v56 = vpop.f32.mrb[32].mxu0 }
 0xb2b   :  { %v4008_v51 = vpop.f32.mrb[33].mxu0 }
 0xb2c   :  { %v4009_v43 = vadd.f32 %v4008_v51, %v4007_v56 }
 0xb2e   :  { %v3876_v24 = vadd.f32 %v4009_v43, %v3974_v61 }
 0xb30   :  { %3880 = vst.msk [vmem:[%s8400_s6] sm:$0xff] %vm3879_vm1, %v3876_v24 }
 0xb31   :  { %3885 = vsyncpa [#allocation4], 1 }
 0xb32   :  { %3886 = vsyncpa [#allocation6], 1 }

</bundles_post_ra>
